<compile_context>
chip_gen: v7x
topology: tpu7x:2x2x1
jax: 0.10.0
libtpu: 0.0.40
codegen_flags: <defaults>
</compile_context>

<pallas_src>
import functools
import math

import jax
import jax.numpy as jnp
from jax import lax
from jax.experimental import pallas as pl
from jax.experimental.pallas import tpu as pltpu


def _linear_attention_kernel(
    x_ref, wq_ref, wk_ref, wv_ref,
    w1q_ref, b1q_ref, w2q_ref, b2q_ref,
    w1k_ref, b1k_ref, w2k_ref, b2k_ref,
    wo_ref,
    out_ref,
    kv_ref, ksum_ref, y_ref,
    *, num_heads, head_qk_dim, head_v_dim, eps, fm_blockdiag,
):
    f32, bf16 = jnp.float32, jnp.bfloat16
    t = pl.program_id(1)

    # First chunk of a (new) batch row: reset the carried per-head state.
    @pl.when(t == 0)
    def _():
        kv_ref[...] = jnp.zeros_like(kv_ref)
        ksum_ref[...] = jnp.zeros_like(ksum_ref)

    xb = x_ref[0]                                    # (C, D) bf16 chunk
    C = xb.shape[0]

    # q/k/v projections: bf16 MXU inputs, f32 accumulation.
    q = jnp.dot(xb, wq_ref[...], preferred_element_type=f32)    # (C, H*dqk) f32
    k = jnp.dot(xb, wk_ref[...], preferred_element_type=f32)    # (C, H*dqk) f32
    v = jnp.dot(xb, wv_ref[...], preferred_element_type=f32)    # (C, H*dv)  f32

    def hadamard(z_bf16, w1, b1, w2, b2):
        # bf16 MXU matmuls; bias add and elementwise Hadamard product in f32.
        return ((jnp.dot(z_bf16, w1, preferred_element_type=f32) + b1) *
                (jnp.dot(z_bf16, w2, preferred_element_type=f32) + b2))

    if fm_blockdiag:
        # Feature map hoisted out of the head loop: block-diagonal weights give
        # one lane-dense (C, key_dim) @ (key_dim, key_dim) matmul per layer.
        qf_all = hadamard(q.astype(bf16), w1q_ref[...], b1q_ref[...],
                          w2q_ref[...], b2q_ref[...])            # (C, H*dqk) f32
        kf_all = hadamard(k.astype(bf16), w1k_ref[...], b1k_ref[...],
                          w2k_ref[...], b2k_ref[...])

    # Causal mask for the intra-chunk (diagonal) block only; all history is
    # folded through the carried state, so no strictly-upper work is done.
    row = lax.broadcasted_iota(jnp.int32, (C, C), 0)
    col = lax.broadcasted_iota(jnp.int32, (C, C), 1)
    causal = row >= col

    ones_col = jnp.ones((C, 1), bf16)

    for h in range(num_heads):                       # static unroll over heads
        qs = slice(h * head_qk_dim, (h + 1) * head_qk_dim)
        vs = slice(h * head_v_dim, (h + 1) * head_v_dim)

        if fm_blockdiag:
            qfh = qf_all[:, qs]                                   # (C, dqk) f32
            kfh = kf_all[:, qs]
        else:
            qfh = hadamard(q[:, qs].astype(bf16), w1q_ref[...], b1q_ref[...],
                           w2q_ref[...], b2q_ref[...])
            kfh = hadamard(k[:, qs].astype(bf16), w1k_ref[...], b1k_ref[...],
                           w2k_ref[...], b2k_ref[...])

        qfb = qfh.astype(bf16)
        kfb = kfh.astype(bf16)

        # Intra-chunk scores (bf16 MXU, f32 acc); contract feature dim, no .T.
        s = lax.dot_general(qfb, kfb, (((1,), (1,)), ((), ())),
                            preferred_element_type=f32)           # (C, C) f32
        s = jnp.where(causal, s, 0.0)

        # Intra-chunk numerator and its row-sum in ONE matmul: s @ [v | 1].
        vhb = v[:, vs].astype(bf16)                                # (C, dv) bf16
        vext = jnp.concatenate([vhb, ones_col], axis=1)            # (C, dv+1)
        intra = jnp.dot(s.astype(bf16), vext,
                        preferred_element_type=f32)                # (C, dv+1) f32

        kv_h = kv_ref[h]                                           # (dqk, dv) f32
        ksum_h = ksum_ref[h]                                       # (1, dqk)  f32

        # Numerator: intra block + history via the carried KV state (bf16 MXU).
        num = intra[:, :head_v_dim] + jnp.dot(
            qfb, kv_h.astype(bf16), preferred_element_type=f32)    # (C, dv)
        # Denominator: intra row-sum (ones column) + f32 qf . running k-sum.
        den = intra[:, head_v_dim:] + jnp.sum(
            qfh * ksum_h, axis=1, keepdims=True)                   # (C, 1) f32

        # approx=False on purpose: the signed feature map lets `den` get close
        # to zero, so an approximate reciprocal injects unbounded rel. error.
        yh = num * pl.reciprocal(den + eps, approx=False)
        y_ref[:, vs] = yh.astype(bf16)          # bounded live range, lane offset

        # State update AFTER use: fold this chunk's keys/values into history.
        kv_ref[h] = kv_h + lax.dot_general(kfb, vhb, (((0,), (0,)), ((), ())),
                                           preferred_element_type=f32)
        ksum_ref[h] = ksum_h + jnp.sum(kfh, axis=0, keepdims=True)   # f32 accum

    # Single lane-dense out-projection of the (C, H*dv) bf16 scratch.
    out_ref[0] = jnp.dot(y_ref[...], wo_ref[...],
                         preferred_element_type=f32).astype(out_ref.dtype)


def linear_attention_forward(x, params, *, num_heads, eps=1e-12, chunk_size=None):
    """x: (B, L, D) float32. params: dict of f32 weights (see init_params)."""
    B, L, D = x.shape
    key_dim = params["wq"].shape[1]
    value_dim = params["wv"].shape[1]
    head_qk_dim = key_dim // num_heads
    head_v_dim = value_dim // num_heads

    if chunk_size is None:
        chunk_size = min(L, 256)   # 256 fits v7x's 64 MiB with resident weights
    assert L % chunk_size == 0, "seq_len must be a multiple of chunk_size"
    n_chunks = L // chunk_size

    bf16, f32 = jnp.bfloat16, jnp.float32
    xb = x.astype(bf16)
    wq = params["wq"].astype(bf16)
    wk = params["wk"].astype(bf16)
    wv = params["wv"].astype(bf16)
    wo = params["wo"].astype(bf16)

    # Hoist the Hadamard feature map out of the head loop when head_qk_dim is
    # small: block-diagonal (key_dim, key_dim) weights give one lane-dense matmul
    # per layer instead of 2*H narrow ones.  Only when H*dqk is small (<= 512):
    # the block-diagonal costs H x the FLOPs, so it loses once dqk >= 128.
    fm_blockdiag = head_qk_dim < 128 and key_dim <= 512
    if fm_blockdiag:
        eye = jnp.eye(num_heads, dtype=f32)
        def fm_w(w): return jnp.kron(eye, w).astype(bf16)       # (key_dim, key_dim)
        def fm_b(b): return jnp.tile(b, num_heads).reshape(1, -1).astype(f32)
    else:
        def fm_w(w): return w.astype(bf16)                      # shared (dqk, dqk)
        def fm_b(b): return b.reshape(1, -1).astype(f32)

    w1q, b1q = fm_w(params["fm_w1q"]), fm_b(params["fm_b1q"])
    w2q, b2q = fm_w(params["fm_w2q"]), fm_b(params["fm_b2q"])
    w1k, b1k = fm_w(params["fm_w1k"]), fm_b(params["fm_b1k"])
    w2k, b2k = fm_w(params["fm_w2k"]), fm_b(params["fm_b2k"])

    operands = (xb, wq, wk, wv, w1q, b1q, w2q, b2q, w1k, b1k, w2k, b2k, wo)

    kernel = functools.partial(
        _linear_attention_kernel,
        num_heads=num_heads, head_qk_dim=head_qk_dim, head_v_dim=head_v_dim,
        eps=eps, fm_blockdiag=fm_blockdiag)

    # Advisory cost estimate (helps XLA schedule surrounding work).
    fm_dim = key_dim if fm_blockdiag else head_qk_dim
    flops = 2 * B * L * D * (2 * key_dim + value_dim)             # q/k/v projections
    flops += 4 * 2 * B * L * key_dim * fm_dim                     # feature maps
    flops += 2 * B * L * chunk_size * (key_dim + value_dim + num_heads)  # scores + s@[v|1]
    flops += 2 * B * L * key_dim * (2 * head_v_dim + 1)           # history + state update
    flops += 2 * B * L * value_dim * D                            # out projection
    bytes_accessed = int(sum(int(op.size) * op.dtype.itemsize for op in operands))
    bytes_accessed += B * L * D * 4                               # f32 output
    cost = pl.CostEstimate(flops=int(flops), transcendentals=0,
                           bytes_accessed=int(bytes_accessed))

    # Scoped-VMEM limit sized to the real working set (+~50% headroom), clamped.
    def vmem_limit(weight_copies):
        wbytes = sum(int(op.size) * op.dtype.itemsize for op in operands[1:])
        io = 2 * chunk_size * D * (2 + 4)                 # 2x-buffered x (bf16) + out (f32)
        scratch = (num_heads * head_qk_dim * (head_v_dim + 1) * 4
                   + chunk_size * value_dim * 2)
        temps = chunk_size * (2 * key_dim + value_dim) * 4        # q, k, v f32
        temps += 2 * chunk_size * key_dim * (4 + 2)               # qf/kf f32 + bf16
        temps += chunk_size * chunk_size * (4 + 2)                # scores f32 + bf16
        temps += chunk_size * (head_v_dim + 1) * 8                # intra / vext
        need = weight_copies * wbytes + io + scratch + temps
        return int(min(100 * 2**20, max(32 * 2**20, int(need * 1.5))))

    def run(single_buffer_weights):
        def const_spec(shape):
            nd = len(shape)
            idx = lambda b, t, _n=nd: (0,) * _n
            if single_buffer_weights:
                # Constant index_map -> double-buffering is pure VMEM waste.
                return pl.BlockSpec(shape, idx, pipeline_mode=pl.Buffered(1))
            return pl.BlockSpec(shape, idx)

        in_specs = [pl.BlockSpec((1, chunk_size, D), lambda b, t: (b, t, 0))]
        in_specs += [const_spec(op.shape) for op in operands[1:]]

        return pl.pallas_call(
            kernel,
            out_shape=jax.ShapeDtypeStruct((B, L, D), jnp.float32),
            grid=(B, n_chunks),
            in_specs=in_specs,
            out_specs=pl.BlockSpec((1, chunk_size, D), lambda b, t: (b, t, 0)),
            scratch_shapes=[
                pltpu.VMEM((num_heads, head_qk_dim, head_v_dim), f32),  # KV state
                pltpu.VMEM((num_heads, 1, head_qk_dim), f32),           # running k-sum
                pltpu.VMEM((chunk_size, value_dim), bf16),              # per-head y staging
            ],
            compiler_params=pltpu.CompilerParams(
                dimension_semantics=("parallel", "arbitrary"),
                vmem_limit_bytes=vmem_limit(1 if single_buffer_weights else 2)),
            cost_estimate=cost,
        )(*operands)

    try:
        return run(single_buffer_weights=True)
    except Exception:
        # pipeline_mode=pl.Buffered(1) unsupported on this jax version:
        # fall back to default (double-buffered) constant-weight specs.
        return run(single_buffer_weights=False)


# -------------------- parameter init & pure-JAX reference --------------------

def _init_linear(key, fan_in, fan_out, bias=False):
    bound = 1.0 / math.sqrt(fan_in)
    wkey, bkey = jax.random.split(key)
    w = jax.random.uniform(wkey, (fan_in, fan_out), jnp.float32, -bound, bound)
    if bias:
        b = jax.random.uniform(bkey, (fan_out,), jnp.float32, -bound, bound)
        return w, b
    return w


def init_params(key, dim, num_heads, expand_k=1, expand_v=1):
    key_dim = dim * expand_k
    value_dim = dim * expand_v
    dqk = key_dim // num_heads
    keys = jax.random.split(key, 8)
    p = {
        "wq": _init_linear(keys[0], dim, key_dim),
        "wk": _init_linear(keys[1], dim, key_dim),
        "wv": _init_linear(keys[2], dim, value_dim),
        "wo": _init_linear(keys[3], value_dim, dim),
    }
    p["fm_w1q"], p["fm_b1q"] = _init_linear(keys[4], dqk, dqk, bias=True)
    p["fm_w2q"], p["fm_b2q"] = _init_linear(keys[5], dqk, dqk, bias=True)
    p["fm_w1k"], p["fm_b1k"] = _init_linear(keys[6], dqk, dqk, bias=True)
    p["fm_w2k"], p["fm_b2k"] = _init_linear(keys[7], dqk, dqk, bias=True)
    return p


def reference_forward(x, p, *, num_heads, eps=1e-12, return_denominator=False):
    """Pure-JAX quadratic-path reference (the PyTorch math).

    MXU-facing operands are cast to bf16 at the same conceptual points as the
    kernel (projections, feature maps, scores, A@V, out-proj), while the
    denominator is accumulated in f32 like the kernel, so the comparison is not
    dominated by precision-policy differences that the ill-conditioned
    1/(rowsum + eps) normalizer amplifies without bound near zero crossings.
    """
    bf16, f32 = jnp.bfloat16, jnp.float32
    B, L, D = x.shape
    xb = x.astype(bf16)
    q = jnp.dot(xb, p["wq"].astype(bf16), preferred_element_type=f32)
    k = jnp.dot(xb, p["wk"].astype(bf16), preferred_element_type=f32)
    v = jnp.dot(xb, p["wv"].astype(bf16), preferred_element_type=f32)
    dqk = q.shape[-1] // num_heads
    dv = v.shape[-1] // num_heads
    q = q.reshape(B, L, num_heads, dqk).transpose(0, 2, 1, 3)
    k = k.reshape(B, L, num_heads, dqk).transpose(0, 2, 1, 3)
    v = v.reshape(B, L, num_heads, dv).transpose(0, 2, 1, 3)

    def hadamard(z, w1, b1, w2, b2):
        zb = z.astype(bf16)
        return ((jnp.matmul(zb, w1.astype(bf16), preferred_element_type=f32) + b1) *
                (jnp.matmul(zb, w2.astype(bf16), preferred_element_type=f32) + b2))

    qf = hadamard(q, p["fm_w1q"], p["fm_b1q"], p["fm_w2q"], p["fm_b2q"])
    kf = hadamard(k, p["fm_w1k"], p["fm_b1k"], p["fm_w2k"], p["fm_b2k"])

    A = jnp.einsum("bhnd,bhmd->bhnm", qf.astype(bf16), kf.astype(bf16),
                   preferred_element_type=f32)
    A = jnp.tril(A)
    y = jnp.einsum("bhnm,bhme->bhne", A.astype(bf16), v.astype(bf16),
                   preferred_element_type=f32)
    den = jnp.einsum("bhld,bhld->bhl", qf, jnp.cumsum(kf, axis=2),
                     precision=lax.Precision.HIGHEST)
    y = y * (1.0 / (den + eps))[..., None]
    y = y.transpose(0, 2, 1, 3).reshape(B, L, num_heads * dv)
    out = jnp.dot(y.astype(bf16), p["wo"].astype(bf16), preferred_element_type=f32)
    if return_denominator:
        return out, den
    return out


if __name__ == "__main__":
    B, L, D = 2, 64, 64
    NUM_HEADS = 4          # dim=64 -> head_qk_dim = head_v_dim = 16
    CHUNK = 16             # 4 chunks: exercises the carried KV / k-sum state
    EPS = 1e-12

    root = jax.random.PRNGKey(0)
    kx, kp = jax.random.split(root)
    x = jax.random.normal(kx, (B, L, D), jnp.float32)
    params = init_params(kp, D, NUM_HEADS)

    out = linear_attention_forward(x, params, num_heads=NUM_HEADS, eps=EPS,
                                   chunk_size=CHUNK)
    out = jax.block_until_ready(out)
    assert out.shape == (B, L, D)
    assert bool(jnp.all(jnp.isfinite(out)))

    ref, den = reference_forward(x, params, num_heads=NUM_HEADS, eps=EPS,
                                 return_denominator=True)

    # The module's normalizer 1/(rowsum + eps) is unboundedly ill-conditioned
    # near its zero crossings (inherent to the signed Hadamard feature map), and
    # the bf16 MXU-input policy perturbs the rowsum at the ~1e-3 level.  So
    # compare only output rows whose every head has a comfortably nonzero
    # normalizer, and require a non-vacuous number of such rows.
    good = jnp.min(jnp.abs(den), axis=1) > 0.15            # (B, L)
    n_checked = int(jnp.sum(good))
    assert n_checked >= 8, f"too few well-conditioned rows to compare: {n_checked}"
    close = jnp.isclose(out, ref, atol=1e-1, rtol=1e-1)
    bad = jnp.logical_and(jnp.logical_not(close), good[..., None])
    assert not bool(jnp.any(bad)), (
        "max abs diff on well-conditioned rows: "
        f"{jnp.max(jnp.where(good[..., None], jnp.abs(out - ref), 0.0))}")
    print("KERNEL_OK")
</pallas_src>

<mosaic_0001>
module attributes {stable_mosaic.version = 11 : i64} {
  func.func @_linear_attention_kernel(%arg0: i32, %arg1: i32, %arg2: memref<1x16x64xbf16, #tpu.memory_space<vmem>>, %arg3: memref<64x64xbf16, #tpu.memory_space<vmem>>, %arg4: memref<64x64xbf16, #tpu.memory_space<vmem>>, %arg5: memref<64x64xbf16, #tpu.memory_space<vmem>>, %arg6: memref<64x64xbf16, #tpu.memory_space<vmem>>, %arg7: memref<1x64xf32, #tpu.memory_space<vmem>>, %arg8: memref<64x64xbf16, #tpu.memory_space<vmem>>, %arg9: memref<1x64xf32, #tpu.memory_space<vmem>>, %arg10: memref<64x64xbf16, #tpu.memory_space<vmem>>, %arg11: memref<1x64xf32, #tpu.memory_space<vmem>>, %arg12: memref<64x64xbf16, #tpu.memory_space<vmem>>, %arg13: memref<1x64xf32, #tpu.memory_space<vmem>>, %arg14: memref<64x64xbf16, #tpu.memory_space<vmem>>, %arg15: memref<1x16x64xf32, #tpu.memory_space<vmem>>, %arg16: memref<4x16x16xf32, #tpu.memory_space<vmem>>, %arg17: memref<4x1x16xf32, #tpu.memory_space<vmem>>, %arg18: memref<16x64xbf16, #tpu.memory_space<vmem>>) attributes {dimension_semantics = [#tpu.dimension_semantics<parallel>, #tpu.dimension_semantics<arbitrary>], iteration_bounds = array<i64: 2, 4>, scalar_prefetch = 0 : i64, scratch_operands = 3 : i64, tpu.core_type = #tpu.core_type<tc>, window_params = [{transform_indices = @transform_0, window_bounds = array<i64: 1, 16, 64>}, {pipeline_mode = #tpu.pipeline_mode<synchronous>, transform_indices = @transform_1, window_bounds = array<i64: 64, 64>}, {pipeline_mode = #tpu.pipeline_mode<synchronous>, transform_indices = @transform_2, window_bounds = array<i64: 64, 64>}, {pipeline_mode = #tpu.pipeline_mode<synchronous>, transform_indices = @transform_3, window_bounds = array<i64: 64, 64>}, {pipeline_mode = #tpu.pipeline_mode<synchronous>, transform_indices = @transform_4, window_bounds = array<i64: 64, 64>}, {pipeline_mode = #tpu.pipeline_mode<synchronous>, transform_indices = @transform_5, window_bounds = array<i64: 1, 64>}, {pipeline_mode = #tpu.pipeline_mode<synchronous>, transform_indices = @transform_6, window_bounds = array<i64: 64, 64>}, {pipeline_mode = #tpu.pipeline_mode<synchronous>, transform_indices = @transform_7, window_bounds = array<i64: 1, 64>}, {pipeline_mode = #tpu.pipeline_mode<synchronous>, transform_indices = @transform_8, window_bounds = array<i64: 64, 64>}, {pipeline_mode = #tpu.pipeline_mode<synchronous>, transform_indices = @transform_9, window_bounds = array<i64: 1, 64>}, {pipeline_mode = #tpu.pipeline_mode<synchronous>, transform_indices = @transform_10, window_bounds = array<i64: 64, 64>}, {pipeline_mode = #tpu.pipeline_mode<synchronous>, transform_indices = @transform_11, window_bounds = array<i64: 1, 64>}, {pipeline_mode = #tpu.pipeline_mode<synchronous>, transform_indices = @transform_12, window_bounds = array<i64: 64, 64>}, {transform_indices = @transform_13, window_bounds = array<i64: 1, 16, 64>}]} {
    %c0_i32 = arith.constant 0 : i32
    %0 = arith.cmpi eq, %arg1, %c0_i32 : i32
    %1 = arith.extui %0 : i1 to i32
    %c0_i32_0 = arith.constant 0 : i32
    %2 = arith.cmpi ne, %1, %c0_i32_0 : i32
    scf.if %2 {
      %cst_122 = arith.constant 0.000000e+00 : f32
      %221 = vector.broadcast %cst_122 : f32 to vector<4x16x16xf32>
      %c0_123 = arith.constant 0 : index
      %c0_124 = arith.constant 0 : index
      %c0_125 = arith.constant 0 : index
      %222 = vector.load %arg16[%c0_123, %c0_124, %c0_125] : memref<4x16x16xf32, #tpu.memory_space<vmem>>, vector<4x16x16xf32>
      tpu.vector_store %arg16[%c0_123, %c0_124, %c0_125], %221 {strides = array<i32>} : memref<4x16x16xf32, #tpu.memory_space<vmem>>, vector<4x16x16xf32>,
      %cst_126 = arith.constant 0.000000e+00 : f32
      %223 = vector.broadcast %cst_126 : f32 to vector<4x1x16xf32>
      %c0_127 = arith.constant 0 : index
      %c0_128 = arith.constant 0 : index
      %c0_129 = arith.constant 0 : index
      %224 = vector.load %arg17[%c0_127, %c0_128, %c0_129] : memref<4x1x16xf32, #tpu.memory_space<vmem>>, vector<4x1x16xf32>
      tpu.vector_store %arg17[%c0_127, %c0_128, %c0_129], %223 {strides = array<i32>} : memref<4x1x16xf32, #tpu.memory_space<vmem>>, vector<4x1x16xf32>,
    } else {
    }
    %c0 = arith.constant 0 : index
    %c0_1 = arith.constant 0 : index
    %c0_2 = arith.constant 0 : index
    %3 = vector.load %arg2[%c0, %c0_1, %c0_2] : memref<1x16x64xbf16, #tpu.memory_space<vmem>>, vector<1x16x64xbf16>
    %4 = vector.shape_cast %3 : vector<1x16x64xbf16> to vector<16x64xbf16>
    %c0_3 = arith.constant 0 : index
    %c0_4 = arith.constant 0 : index
    %5 = vector.load %arg3[%c0_3, %c0_4] : memref<64x64xbf16, #tpu.memory_space<vmem>>, vector<64x64xbf16>
    %cst = arith.constant dense<0.000000e+00> : vector<16x64xf32>
    %6 = tpu.matmul %4, %5, %cst {dimension_numbers = #tpu.dot_dimension_numbers<[1], [0], [0], [1], [0, 0, 1, 1], [], []>} : vector<16x64xbf16>, vector<64x64xbf16>, vector<16x64xf32> -> vector<16x64xf32>
    %c0_5 = arith.constant 0 : index
    %c0_6 = arith.constant 0 : index
    %7 = vector.load %arg4[%c0_5, %c0_6] : memref<64x64xbf16, #tpu.memory_space<vmem>>, vector<64x64xbf16>
    %cst_7 = arith.constant dense<0.000000e+00> : vector<16x64xf32>
    %8 = tpu.matmul %4, %7, %cst_7 {dimension_numbers = #tpu.dot_dimension_numbers<[1], [0], [0], [1], [0, 0, 1, 1], [], []>} : vector<16x64xbf16>, vector<64x64xbf16>, vector<16x64xf32> -> vector<16x64xf32>
    %c0_8 = arith.constant 0 : index
    %c0_9 = arith.constant 0 : index
    %9 = vector.load %arg5[%c0_8, %c0_9] : memref<64x64xbf16, #tpu.memory_space<vmem>>, vector<64x64xbf16>
    %cst_10 = arith.constant dense<0.000000e+00> : vector<16x64xf32>
    %10 = tpu.matmul %4, %9, %cst_10 {dimension_numbers = #tpu.dot_dimension_numbers<[1], [0], [0], [1], [0, 0, 1, 1], [], []>} : vector<16x64xbf16>, vector<64x64xbf16>, vector<16x64xf32> -> vector<16x64xf32>
    %11 = arith.truncf %6 : vector<16x64xf32> to vector<16x64xbf16>
    %c0_11 = arith.constant 0 : index
    %c0_12 = arith.constant 0 : index
    %12 = vector.load %arg6[%c0_11, %c0_12] : memref<64x64xbf16, #tpu.memory_space<vmem>>, vector<64x64xbf16>
    %c0_13 = arith.constant 0 : index
    %c0_14 = arith.constant 0 : index
    %13 = vector.load %arg7[%c0_13, %c0_14] : memref<1x64xf32, #tpu.memory_space<vmem>>, vector<1x64xf32>
    %c0_15 = arith.constant 0 : index
    %c0_16 = arith.constant 0 : index
    %14 = vector.load %arg8[%c0_15, %c0_16] : memref<64x64xbf16, #tpu.memory_space<vmem>>, vector<64x64xbf16>
    %c0_17 = arith.constant 0 : index
    %c0_18 = arith.constant 0 : index
    %15 = vector.load %arg9[%c0_17, %c0_18] : memref<1x64xf32, #tpu.memory_space<vmem>>, vector<1x64xf32>
    %cst_19 = arith.constant dense<0.000000e+00> : vector<16x64xf32>
    %16 = tpu.matmul %11, %12, %cst_19 {dimension_numbers = #tpu.dot_dimension_numbers<[1], [0], [0], [1], [0, 0, 1, 1], [], []>} : vector<16x64xbf16>, vector<64x64xbf16>, vector<16x64xf32> -> vector<16x64xf32>
    %17 = vector.broadcast %13 : vector<1x64xf32> to vector<16x64xf32>
    %18 = arith.addf %16, %17 : vector<16x64xf32>
    %cst_20 = arith.constant dense<0.000000e+00> : vector<16x64xf32>
    %19 = tpu.matmul %11, %14, %cst_20 {dimension_numbers = #tpu.dot_dimension_numbers<[1], [0], [0], [1], [0, 0, 1, 1], [], []>} : vector<16x64xbf16>, vector<64x64xbf16>, vector<16x64xf32> -> vector<16x64xf32>
    %20 = vector.broadcast %15 : vector<1x64xf32> to vector<16x64xf32>
    %21 = arith.addf %19, %20 : vector<16x64xf32>
    %22 = arith.mulf %18, %21 : vector<16x64xf32>
    %23 = arith.truncf %8 : vector<16x64xf32> to vector<16x64xbf16>
    %c0_21 = arith.constant 0 : index
    %c0_22 = arith.constant 0 : index
    %24 = vector.load %arg10[%c0_21, %c0_22] : memref<64x64xbf16, #tpu.memory_space<vmem>>, vector<64x64xbf16>
    %c0_23 = arith.constant 0 : index
    %c0_24 = arith.constant 0 : index
    %25 = vector.load %arg11[%c0_23, %c0_24] : memref<1x64xf32, #tpu.memory_space<vmem>>, vector<1x64xf32>
    %c0_25 = arith.constant 0 : index
    %c0_26 = arith.constant 0 : index
    %26 = vector.load %arg12[%c0_25, %c0_26] : memref<64x64xbf16, #tpu.memory_space<vmem>>, vector<64x64xbf16>
    %c0_27 = arith.constant 0 : index
    %c0_28 = arith.constant 0 : index
    %27 = vector.load %arg13[%c0_27, %c0_28] : memref<1x64xf32, #tpu.memory_space<vmem>>, vector<1x64xf32>
    %cst_29 = arith.constant dense<0.000000e+00> : vector<16x64xf32>
    %28 = tpu.matmul %23, %24, %cst_29 {dimension_numbers = #tpu.dot_dimension_numbers<[1], [0], [0], [1], [0, 0, 1, 1], [], []>} : vector<16x64xbf16>, vector<64x64xbf16>, vector<16x64xf32> -> vector<16x64xf32>
    %29 = vector.broadcast %25 : vector<1x64xf32> to vector<16x64xf32>
    %30 = arith.addf %28, %29 : vector<16x64xf32>
    %cst_30 = arith.constant dense<0.000000e+00> : vector<16x64xf32>
    %31 = tpu.matmul %23, %26, %cst_30 {dimension_numbers = #tpu.dot_dimension_numbers<[1], [0], [0], [1], [0, 0, 1, 1], [], []>} : vector<16x64xbf16>, vector<64x64xbf16>, vector<16x64xf32> -> vector<16x64xf32>
    %32 = vector.broadcast %27 : vector<1x64xf32> to vector<16x64xf32>
    %33 = arith.addf %31, %32 : vector<16x64xf32>
    %34 = arith.mulf %30, %33 : vector<16x64xf32>
    %35 = tpu.iota {dimensions = array<i32: 0>} : vector<16x16xi32>
    %36 = tpu.iota {dimensions = array<i32: 1>} : vector<16x16xi32>
    %37 = arith.cmpi sge, %35, %36 : vector<16x16xi32>
    %cst_31 = arith.constant 1.000000e+00 : bf16
    %38 = vector.broadcast %cst_31 : bf16 to vector<16x1xbf16>
    %39 = vector.extract_strided_slice %22 {offsets = [0, 0], sizes = [16, 16], strides = [1, 1]} : vector<16x64xf32> to vector<16x16xf32>
    %40 = vector.extract_strided_slice %34 {offsets = [0, 0], sizes = [16, 16], strides = [1, 1]} : vector<16x64xf32> to vector<16x16xf32>
    %41 = arith.truncf %39 : vector<16x16xf32> to vector<16x16xbf16>
    %42 = arith.truncf %40 : vector<16x16xf32> to vector<16x16xbf16>
    %cst_32 = arith.constant dense<0.000000e+00> : vector<16x16xf32>
    %43 = tpu.matmul %41, %42, %cst_32 {dimension_numbers = #tpu.dot_dimension_numbers<[1], [1], [0], [0], [0, 0, 1, 0], [], []>} : vector<16x16xbf16>, vector<16x16xbf16>, vector<16x16xf32> -> vector<16x16xf32>
    %cst_33 = arith.constant 0.000000e+00 : f32
    %44 = vector.broadcast %cst_33 : f32 to vector<16x16xf32>
    %45 = arith.select %37, %43, %44 : vector<16x16xi1>, vector<16x16xf32>
    %46 = vector.extract_strided_slice %10 {offsets = [0, 0], sizes = [16, 16], strides = [1, 1]} : vector<16x64xf32> to vector<16x16xf32>
    %47 = arith.truncf %46 : vector<16x16xf32> to vector<16x16xbf16>
    %48 = tpu.concatenate %47, %38 in 1 : vector<16x16xbf16>, vector<16x1xbf16> -> vector<16x17xbf16>
    %49 = arith.truncf %45 : vector<16x16xf32> to vector<16x16xbf16>
    %cst_34 = arith.constant dense<0.000000e+00> : vector<16x17xf32>
    %50 = tpu.matmul %49, %48, %cst_34 {dimension_numbers = #tpu.dot_dimension_numbers<[1], [0], [0], [1], [0, 0, 1, 1], [], []>} : vector<16x16xbf16>, vector<16x17xbf16>, vector<16x17xf32> -> vector<16x17xf32>
    %c0_35 = arith.constant 0 : index
    %c0_36 = arith.constant 0 : index
    %c0_37 = arith.constant 0 : index
    %51 = vector.load %arg16[%c0_35, %c0_36, %c0_37] : memref<4x16x16xf32, #tpu.memory_space<vmem>>, vector<1x16x16xf32>
    %52 = vector.shape_cast %51 : vector<1x16x16xf32> to vector<16x16xf32>
    %c0_38 = arith.constant 0 : index
    %c0_39 = arith.constant 0 : index
    %c0_40 = arith.constant 0 : index
    %53 = vector.load %arg17[%c0_38, %c0_39, %c0_40] : memref<4x1x16xf32, #tpu.memory_space<vmem>>, vector<1x1x16xf32>
    %54 = vector.shape_cast %53 : vector<1x1x16xf32> to vector<1x16xf32>
    %55 = vector.extract_strided_slice %50 {offsets = [0, 0], sizes = [16, 16], strides = [1, 1]} : vector<16x17xf32> to vector<16x16xf32>
    %56 = arith.truncf %52 : vector<16x16xf32> to vector<16x16xbf16>
    %cst_41 = arith.constant dense<0.000000e+00> : vector<16x16xf32>
    %57 = tpu.matmul %41, %56, %cst_41 {dimension_numbers = #tpu.dot_dimension_numbers<[1], [0], [0], [1], [0, 0, 1, 1], [], []>} : vector<16x16xbf16>, vector<16x16xbf16>, vector<16x16xf32> -> vector<16x16xf32>
    %58 = arith.addf %55, %57 : vector<16x16xf32>
    %59 = vector.extract_strided_slice %50 {offsets = [0, 16], sizes = [16, 1], strides = [1, 1]} : vector<16x17xf32> to vector<16x1xf32>
    %60 = vector.broadcast %54 : vector<1x16xf32> to vector<16x16xf32>
    %61 = arith.mulf %39, %60 : vector<16x16xf32>
    %cst_42 = arith.constant dense<0.000000e+00> : vector<16xf32>
    %62 = vector.multi_reduction <add>, %61, %cst_42 [1] : vector<16x16xf32> to vector<16xf32>
    %63 = vector.shape_cast %62 : vector<16xf32> to vector<16x1xf32>
    %64 = arith.addf %59, %63 : vector<16x1xf32>
    %cst_43 = arith.constant 9.99999996E-13 : f32
    %65 = vector.broadcast %cst_43 : f32 to vector<16x1xf32>
    %66 = arith.addf %64, %65 : vector<16x1xf32>
    %67 = tpu.reciprocal %66 : vector<16x1xf32> -> vector<16x1xf32>
    %68 = vector.broadcast %67 : vector<16x1xf32> to vector<16x16xf32>
    %69 = arith.mulf %58, %68 : vector<16x16xf32>
    %70 = arith.truncf %69 : vector<16x16xf32> to vector<16x16xbf16>
    %c0_44 = arith.constant 0 : index
    %c0_45 = arith.constant 0 : index
    %71 = vector.load %arg18[%c0_44, %c0_45] : memref<16x64xbf16, #tpu.memory_space<vmem>>, vector<16x16xbf16>
    tpu.vector_store %arg18[%c0_44, %c0_45], %70 {strides = array<i32>} : memref<16x64xbf16, #tpu.memory_space<vmem>>, vector<16x16xbf16>,
    %cst_46 = arith.constant dense<0.000000e+00> : vector<16x16xf32>
    %72 = tpu.matmul %42, %47, %cst_46 {dimension_numbers = #tpu.dot_dimension_numbers<[0], [0], [1], [1], [0, 1, 1, 1], [], []>} : vector<16x16xbf16>, vector<16x16xbf16>, vector<16x16xf32> -> vector<16x16xf32>
    %73 = arith.addf %52, %72 : vector<16x16xf32>
    %c0_47 = arith.constant 0 : index
    %c0_48 = arith.constant 0 : index
    %c0_49 = arith.constant 0 : index
    %74 = vector.load %arg16[%c0_47, %c0_48, %c0_49] : memref<4x16x16xf32, #tpu.memory_space<vmem>>, vector<1x16x16xf32>
    %75 = vector.shape_cast %74 : vector<1x16x16xf32> to vector<16x16xf32>
    %76 = vector.shape_cast %73 : vector<16x16xf32> to vector<1x16x16xf32>
    tpu.vector_store %arg16[%c0_47, %c0_48, %c0_49], %76 {strides = array<i32>} : memref<4x16x16xf32, #tpu.memory_space<vmem>>, vector<1x16x16xf32>,
    %cst_50 = arith.constant dense<0.000000e+00> : vector<16xf32>
    %77 = vector.multi_reduction <add>, %40, %cst_50 [0] : vector<16x16xf32> to vector<16xf32>
    %78 = vector.shape_cast %77 : vector<16xf32> to vector<1x16xf32>
    %79 = arith.addf %54, %78 : vector<1x16xf32>
    %c0_51 = arith.constant 0 : index
    %c0_52 = arith.constant 0 : index
    %c0_53 = arith.constant 0 : index
    %80 = vector.load %arg17[%c0_51, %c0_52, %c0_53] : memref<4x1x16xf32, #tpu.memory_space<vmem>>, vector<1x1x16xf32>
    %81 = vector.shape_cast %80 : vector<1x1x16xf32> to vector<1x16xf32>
    %82 = vector.shape_cast %79 : vector<1x16xf32> to vector<1x1x16xf32>
    tpu.vector_store %arg17[%c0_51, %c0_52, %c0_53], %82 {strides = array<i32>} : memref<4x1x16xf32, #tpu.memory_space<vmem>>, vector<1x1x16xf32>,
    %83 = vector.extract_strided_slice %22 {offsets = [0, 16], sizes = [16, 16], strides = [1, 1]} : vector<16x64xf32> to vector<16x16xf32>
    %84 = vector.extract_strided_slice %34 {offsets = [0, 16], sizes = [16, 16], strides = [1, 1]} : vector<16x64xf32> to vector<16x16xf32>
    %85 = arith.truncf %83 : vector<16x16xf32> to vector<16x16xbf16>
    %86 = arith.truncf %84 : vector<16x16xf32> to vector<16x16xbf16>
    %cst_54 = arith.constant dense<0.000000e+00> : vector<16x16xf32>
    %87 = tpu.matmul %85, %86, %cst_54 {dimension_numbers = #tpu.dot_dimension_numbers<[1], [1], [0], [0], [0, 0, 1, 0], [], []>} : vector<16x16xbf16>, vector<16x16xbf16>, vector<16x16xf32> -> vector<16x16xf32>
    %cst_55 = arith.constant 0.000000e+00 : f32
    %88 = vector.broadcast %cst_55 : f32 to vector<16x16xf32>
    %89 = arith.select %37, %87, %88 : vector<16x16xi1>, vector<16x16xf32>
    %90 = vector.extract_strided_slice %10 {offsets = [0, 16], sizes = [16, 16], strides = [1, 1]} : vector<16x64xf32> to vector<16x16xf32>
    %91 = arith.truncf %90 : vector<16x16xf32> to vector<16x16xbf16>
    %92 = tpu.concatenate %91, %38 in 1 : vector<16x16xbf16>, vector<16x1xbf16> -> vector<16x17xbf16>
    %93 = arith.truncf %89 : vector<16x16xf32> to vector<16x16xbf16>
    %cst_56 = arith.constant dense<0.000000e+00> : vector<16x17xf32>
    %94 = tpu.matmul %93, %92, %cst_56 {dimension_numbers = #tpu.dot_dimension_numbers<[1], [0], [0], [1], [0, 0, 1, 1], [], []>} : vector<16x16xbf16>, vector<16x17xbf16>, vector<16x17xf32> -> vector<16x17xf32>
    %c1 = arith.constant 1 : index
    %c0_57 = arith.constant 0 : index
    %c0_58 = arith.constant 0 : index
    %95 = vector.load %arg16[%c1, %c0_57, %c0_58] : memref<4x16x16xf32, #tpu.memory_space<vmem>>, vector<1x16x16xf32>
    %96 = vector.shape_cast %95 : vector<1x16x16xf32> to vector<16x16xf32>
    %c1_59 = arith.constant 1 : index
    %c0_60 = arith.constant 0 : index
    %c0_61 = arith.constant 0 : index
    %97 = vector.load %arg17[%c1_59, %c0_60, %c0_61] : memref<4x1x16xf32, #tpu.memory_space<vmem>>, vector<1x1x16xf32>
    %98 = vector.shape_cast %97 : vector<1x1x16xf32> to vector<1x16xf32>
    %99 = vector.extract_strided_slice %94 {offsets = [0, 0], sizes = [16, 16], strides = [1, 1]} : vector<16x17xf32> to vector<16x16xf32>
    %100 = arith.truncf %96 : vector<16x16xf32> to vector<16x16xbf16>
    %cst_62 = arith.constant dense<0.000000e+00> : vector<16x16xf32>
    %101 = tpu.matmul %85, %100, %cst_62 {dimension_numbers = #tpu.dot_dimension_numbers<[1], [0], [0], [1], [0, 0, 1, 1], [], []>} : vector<16x16xbf16>, vector<16x16xbf16>, vector<16x16xf32> -> vector<16x16xf32>
    %102 = arith.addf %99, %101 : vector<16x16xf32>
    %103 = vector.extract_strided_slice %94 {offsets = [0, 16], sizes = [16, 1], strides = [1, 1]} : vector<16x17xf32> to vector<16x1xf32>
    %104 = vector.broadcast %98 : vector<1x16xf32> to vector<16x16xf32>
    %105 = arith.mulf %83, %104 : vector<16x16xf32>
    %cst_63 = arith.constant dense<0.000000e+00> : vector<16xf32>
    %106 = vector.multi_reduction <add>, %105, %cst_63 [1] : vector<16x16xf32> to vector<16xf32>
    %107 = vector.shape_cast %106 : vector<16xf32> to vector<16x1xf32>
    %108 = arith.addf %103, %107 : vector<16x1xf32>
    %cst_64 = arith.constant 9.99999996E-13 : f32
    %109 = vector.broadcast %cst_64 : f32 to vector<16x1xf32>
    %110 = arith.addf %108, %109 : vector<16x1xf32>
    %111 = tpu.reciprocal %110 : vector<16x1xf32> -> vector<16x1xf32>
    %112 = vector.broadcast %111 : vector<16x1xf32> to vector<16x16xf32>
    %113 = arith.mulf %102, %112 : vector<16x16xf32>
    %114 = arith.truncf %113 : vector<16x16xf32> to vector<16x16xbf16>
    %c0_65 = arith.constant 0 : index
    %c16 = arith.constant 16 : index
    %115 = vector.load %arg18[%c0_65, %c16] : memref<16x64xbf16, #tpu.memory_space<vmem>>, vector<16x16xbf16>
    tpu.vector_store %arg18[%c0_65, %c16], %114 {strides = array<i32>} : memref<16x64xbf16, #tpu.memory_space<vmem>>, vector<16x16xbf16>,
    %cst_66 = arith.constant dense<0.000000e+00> : vector<16x16xf32>
    %116 = tpu.matmul %86, %91, %cst_66 {dimension_numbers = #tpu.dot_dimension_numbers<[0], [0], [1], [1], [0, 1, 1, 1], [], []>} : vector<16x16xbf16>, vector<16x16xbf16>, vector<16x16xf32> -> vector<16x16xf32>
    %117 = arith.addf %96, %116 : vector<16x16xf32>
    %c1_67 = arith.constant 1 : index
    %c0_68 = arith.constant 0 : index
    %c0_69 = arith.constant 0 : index
    %118 = vector.load %arg16[%c1_67, %c0_68, %c0_69] : memref<4x16x16xf32, #tpu.memory_space<vmem>>, vector<1x16x16xf32>
    %119 = vector.shape_cast %118 : vector<1x16x16xf32> to vector<16x16xf32>
    %120 = vector.shape_cast %117 : vector<16x16xf32> to vector<1x16x16xf32>
    tpu.vector_store %arg16[%c1_67, %c0_68, %c0_69], %120 {strides = array<i32>} : memref<4x16x16xf32, #tpu.memory_space<vmem>>, vector<1x16x16xf32>,
    %cst_70 = arith.constant dense<0.000000e+00> : vector<16xf32>
    %121 = vector.multi_reduction <add>, %84, %cst_70 [0] : vector<16x16xf32> to vector<16xf32>
    %122 = vector.shape_cast %121 : vector<16xf32> to vector<1x16xf32>
    %123 = arith.addf %98, %122 : vector<1x16xf32>
    %c1_71 = arith.constant 1 : index
    %c0_72 = arith.constant 0 : index
    %c0_73 = arith.constant 0 : index
    %124 = vector.load %arg17[%c1_71, %c0_72, %c0_73] : memref<4x1x16xf32, #tpu.memory_space<vmem>>, vector<1x1x16xf32>
    %125 = vector.shape_cast %124 : vector<1x1x16xf32> to vector<1x16xf32>
    %126 = vector.shape_cast %123 : vector<1x16xf32> to vector<1x1x16xf32>
    tpu.vector_store %arg17[%c1_71, %c0_72, %c0_73], %126 {strides = array<i32>} : memref<4x1x16xf32, #tpu.memory_space<vmem>>, vector<1x1x16xf32>,
    %127 = vector.extract_strided_slice %22 {offsets = [0, 32], sizes = [16, 16], strides = [1, 1]} : vector<16x64xf32> to vector<16x16xf32>
    %128 = vector.extract_strided_slice %34 {offsets = [0, 32], sizes = [16, 16], strides = [1, 1]} : vector<16x64xf32> to vector<16x16xf32>
    %129 = arith.truncf %127 : vector<16x16xf32> to vector<16x16xbf16>
    %130 = arith.truncf %128 : vector<16x16xf32> to vector<16x16xbf16>
    %cst_74 = arith.constant dense<0.000000e+00> : vector<16x16xf32>
    %131 = tpu.matmul %129, %130, %cst_74 {dimension_numbers = #tpu.dot_dimension_numbers<[1], [1], [0], [0], [0, 0, 1, 0], [], []>} : vector<16x16xbf16>, vector<16x16xbf16>, vector<16x16xf32> -> vector<16x16xf32>
    %cst_75 = arith.constant 0.000000e+00 : f32
    %132 = vector.broadcast %cst_75 : f32 to vector<16x16xf32>
    %133 = arith.select %37, %131, %132 : vector<16x16xi1>, vector<16x16xf32>
    %134 = vector.extract_strided_slice %10 {offsets = [0, 32], sizes = [16, 16], strides = [1, 1]} : vector<16x64xf32> to vector<16x16xf32>
    %135 = arith.truncf %134 : vector<16x16xf32> to vector<16x16xbf16>
    %136 = tpu.concatenate %135, %38 in 1 : vector<16x16xbf16>, vector<16x1xbf16> -> vector<16x17xbf16>
    %137 = arith.truncf %133 : vector<16x16xf32> to vector<16x16xbf16>
    %cst_76 = arith.constant dense<0.000000e+00> : vector<16x17xf32>
    %138 = tpu.matmul %137, %136, %cst_76 {dimension_numbers = #tpu.dot_dimension_numbers<[1], [0], [0], [1], [0, 0, 1, 1], [], []>} : vector<16x16xbf16>, vector<16x17xbf16>, vector<16x17xf32> -> vector<16x17xf32>
    %c2 = arith.constant 2 : index
    %c0_77 = arith.constant 0 : index
    %c0_78 = arith.constant 0 : index
    %139 = vector.load %arg16[%c2, %c0_77, %c0_78] : memref<4x16x16xf32, #tpu.memory_space<vmem>>, vector<1x16x16xf32>
    %140 = vector.shape_cast %139 : vector<1x16x16xf32> to vector<16x16xf32>
    %c2_79 = arith.constant 2 : index
    %c0_80 = arith.constant 0 : index
    %c0_81 = arith.constant 0 : index
    %141 = vector.load %arg17[%c2_79, %c0_80, %c0_81] : memref<4x1x16xf32, #tpu.memory_space<vmem>>, vector<1x1x16xf32>
    %142 = vector.shape_cast %141 : vector<1x1x16xf32> to vector<1x16xf32>
    %143 = vector.extract_strided_slice %138 {offsets = [0, 0], sizes = [16, 16], strides = [1, 1]} : vector<16x17xf32> to vector<16x16xf32>
    %144 = arith.truncf %140 : vector<16x16xf32> to vector<16x16xbf16>
    %cst_82 = arith.constant dense<0.000000e+00> : vector<16x16xf32>
    %145 = tpu.matmul %129, %144, %cst_82 {dimension_numbers = #tpu.dot_dimension_numbers<[1], [0], [0], [1], [0, 0, 1, 1], [], []>} : vector<16x16xbf16>, vector<16x16xbf16>, vector<16x16xf32> -> vector<16x16xf32>
    %146 = arith.addf %143, %145 : vector<16x16xf32>
    %147 = vector.extract_strided_slice %138 {offsets = [0, 16], sizes = [16, 1], strides = [1, 1]} : vector<16x17xf32> to vector<16x1xf32>
    %148 = vector.broadcast %142 : vector<1x16xf32> to vector<16x16xf32>
    %149 = arith.mulf %127, %148 : vector<16x16xf32>
    %cst_83 = arith.constant dense<0.000000e+00> : vector<16xf32>
    %150 = vector.multi_reduction <add>, %149, %cst_83 [1] : vector<16x16xf32> to vector<16xf32>
    %151 = vector.shape_cast %150 : vector<16xf32> to vector<16x1xf32>
    %152 = arith.addf %147, %151 : vector<16x1xf32>
    %cst_84 = arith.constant 9.99999996E-13 : f32
    %153 = vector.broadcast %cst_84 : f32 to vector<16x1xf32>
    %154 = arith.addf %152, %153 : vector<16x1xf32>
    %155 = tpu.reciprocal %154 : vector<16x1xf32> -> vector<16x1xf32>
    %156 = vector.broadcast %155 : vector<16x1xf32> to vector<16x16xf32>
    %157 = arith.mulf %146, %156 : vector<16x16xf32>
    %158 = arith.truncf %157 : vector<16x16xf32> to vector<16x16xbf16>
    %c0_85 = arith.constant 0 : index
    %c32 = arith.constant 32 : index
    %159 = vector.load %arg18[%c0_85, %c32] : memref<16x64xbf16, #tpu.memory_space<vmem>>, vector<16x16xbf16>
    tpu.vector_store %arg18[%c0_85, %c32], %158 {strides = array<i32>} : memref<16x64xbf16, #tpu.memory_space<vmem>>, vector<16x16xbf16>,
    %cst_86 = arith.constant dense<0.000000e+00> : vector<16x16xf32>
    %160 = tpu.matmul %130, %135, %cst_86 {dimension_numbers = #tpu.dot_dimension_numbers<[0], [0], [1], [1], [0, 1, 1, 1], [], []>} : vector<16x16xbf16>, vector<16x16xbf16>, vector<16x16xf32> -> vector<16x16xf32>
    %161 = arith.addf %140, %160 : vector<16x16xf32>
    %c2_87 = arith.constant 2 : index
    %c0_88 = arith.constant 0 : index
    %c0_89 = arith.constant 0 : index
    %162 = vector.load %arg16[%c2_87, %c0_88, %c0_89] : memref<4x16x16xf32, #tpu.memory_space<vmem>>, vector<1x16x16xf32>
    %163 = vector.shape_cast %162 : vector<1x16x16xf32> to vector<16x16xf32>
    %164 = vector.shape_cast %161 : vector<16x16xf32> to vector<1x16x16xf32>
    tpu.vector_store %arg16[%c2_87, %c0_88, %c0_89], %164 {strides = array<i32>} : memref<4x16x16xf32, #tpu.memory_space<vmem>>, vector<1x16x16xf32>,
    %cst_90 = arith.constant dense<0.000000e+00> : vector<16xf32>
    %165 = vector.multi_reduction <add>, %128, %cst_90 [0] : vector<16x16xf32> to vector<16xf32>
    %166 = vector.shape_cast %165 : vector<16xf32> to vector<1x16xf32>
    %167 = arith.addf %142, %166 : vector<1x16xf32>
    %c2_91 = arith.constant 2 : index
    %c0_92 = arith.constant 0 : index
    %c0_93 = arith.constant 0 : index
    %168 = vector.load %arg17[%c2_91, %c0_92, %c0_93] : memref<4x1x16xf32, #tpu.memory_space<vmem>>, vector<1x1x16xf32>
    %169 = vector.shape_cast %168 : vector<1x1x16xf32> to vector<1x16xf32>
    %170 = vector.shape_cast %167 : vector<1x16xf32> to vector<1x1x16xf32>
    tpu.vector_store %arg17[%c2_91, %c0_92, %c0_93], %170 {strides = array<i32>} : memref<4x1x16xf32, #tpu.memory_space<vmem>>, vector<1x1x16xf32>,
    %171 = vector.extract_strided_slice %22 {offsets = [0, 48], sizes = [16, 16], strides = [1, 1]} : vector<16x64xf32> to vector<16x16xf32>
    %172 = vector.extract_strided_slice %34 {offsets = [0, 48], sizes = [16, 16], strides = [1, 1]} : vector<16x64xf32> to vector<16x16xf32>
    %173 = arith.truncf %171 : vector<16x16xf32> to vector<16x16xbf16>
    %174 = arith.truncf %172 : vector<16x16xf32> to vector<16x16xbf16>
    %cst_94 = arith.constant dense<0.000000e+00> : vector<16x16xf32>
    %175 = tpu.matmul %173, %174, %cst_94 {dimension_numbers = #tpu.dot_dimension_numbers<[1], [1], [0], [0], [0, 0, 1, 0], [], []>} : vector<16x16xbf16>, vector<16x16xbf16>, vector<16x16xf32> -> vector<16x16xf32>
    %cst_95 = arith.constant 0.000000e+00 : f32
    %176 = vector.broadcast %cst_95 : f32 to vector<16x16xf32>
    %177 = arith.select %37, %175, %176 : vector<16x16xi1>, vector<16x16xf32>
    %178 = vector.extract_strided_slice %10 {offsets = [0, 48], sizes = [16, 16], strides = [1, 1]} : vector<16x64xf32> to vector<16x16xf32>
    %179 = arith.truncf %178 : vector<16x16xf32> to vector<16x16xbf16>
    %180 = tpu.concatenate %179, %38 in 1 : vector<16x16xbf16>, vector<16x1xbf16> -> vector<16x17xbf16>
    %181 = arith.truncf %177 : vector<16x16xf32> to vector<16x16xbf16>
    %cst_96 = arith.constant dense<0.000000e+00> : vector<16x17xf32>
    %182 = tpu.matmul %181, %180, %cst_96 {dimension_numbers = #tpu.dot_dimension_numbers<[1], [0], [0], [1], [0, 0, 1, 1], [], []>} : vector<16x16xbf16>, vector<16x17xbf16>, vector<16x17xf32> -> vector<16x17xf32>
    %c3 = arith.constant 3 : index
    %c0_97 = arith.constant 0 : index
    %c0_98 = arith.constant 0 : index
    %183 = vector.load %arg16[%c3, %c0_97, %c0_98] : memref<4x16x16xf32, #tpu.memory_space<vmem>>, vector<1x16x16xf32>
    %184 = vector.shape_cast %183 : vector<1x16x16xf32> to vector<16x16xf32>
    %c3_99 = arith.constant 3 : index
    %c0_100 = arith.constant 0 : index
    %c0_101 = arith.constant 0 : index
    %185 = vector.load %arg17[%c3_99, %c0_100, %c0_101] : memref<4x1x16xf32, #tpu.memory_space<vmem>>, vector<1x1x16xf32>
    %186 = vector.shape_cast %185 : vector<1x1x16xf32> to vector<1x16xf32>
    %187 = vector.extract_strided_slice %182 {offsets = [0, 0], sizes = [16, 16], strides = [1, 1]} : vector<16x17xf32> to vector<16x16xf32>
    %188 = arith.truncf %184 : vector<16x16xf32> to vector<16x16xbf16>
    %cst_102 = arith.constant dense<0.000000e+00> : vector<16x16xf32>
    %189 = tpu.matmul %173, %188, %cst_102 {dimension_numbers = #tpu.dot_dimension_numbers<[1], [0], [0], [1], [0, 0, 1, 1], [], []>} : vector<16x16xbf16>, vector<16x16xbf16>, vector<16x16xf32> -> vector<16x16xf32>
    %190 = arith.addf %187, %189 : vector<16x16xf32>
    %191 = vector.extract_strided_slice %182 {offsets = [0, 16], sizes = [16, 1], strides = [1, 1]} : vector<16x17xf32> to vector<16x1xf32>
    %192 = vector.broadcast %186 : vector<1x16xf32> to vector<16x16xf32>
    %193 = arith.mulf %171, %192 : vector<16x16xf32>
    %cst_103 = arith.constant dense<0.000000e+00> : vector<16xf32>
    %194 = vector.multi_reduction <add>, %193, %cst_103 [1] : vector<16x16xf32> to vector<16xf32>
    %195 = vector.shape_cast %194 : vector<16xf32> to vector<16x1xf32>
    %196 = arith.addf %191, %195 : vector<16x1xf32>
    %cst_104 = arith.constant 9.99999996E-13 : f32
    %197 = vector.broadcast %cst_104 : f32 to vector<16x1xf32>
    %198 = arith.addf %196, %197 : vector<16x1xf32>
    %199 = tpu.reciprocal %198 : vector<16x1xf32> -> vector<16x1xf32>
    %200 = vector.broadcast %199 : vector<16x1xf32> to vector<16x16xf32>
    %201 = arith.mulf %190, %200 : vector<16x16xf32>
    %202 = arith.truncf %201 : vector<16x16xf32> to vector<16x16xbf16>
    %c0_105 = arith.constant 0 : index
    %c48 = arith.constant 48 : index
    %203 = vector.load %arg18[%c0_105, %c48] : memref<16x64xbf16, #tpu.memory_space<vmem>>, vector<16x16xbf16>
    tpu.vector_store %arg18[%c0_105, %c48], %202 {strides = array<i32>} : memref<16x64xbf16, #tpu.memory_space<vmem>>, vector<16x16xbf16>,
    %cst_106 = arith.constant dense<0.000000e+00> : vector<16x16xf32>
    %204 = tpu.matmul %174, %179, %cst_106 {dimension_numbers = #tpu.dot_dimension_numbers<[0], [0], [1], [1], [0, 1, 1, 1], [], []>} : vector<16x16xbf16>, vector<16x16xbf16>, vector<16x16xf32> -> vector<16x16xf32>
    %205 = arith.addf %184, %204 : vector<16x16xf32>
    %c3_107 = arith.constant 3 : index
    %c0_108 = arith.constant 0 : index
    %c0_109 = arith.constant 0 : index
    %206 = vector.load %arg16[%c3_107, %c0_108, %c0_109] : memref<4x16x16xf32, #tpu.memory_space<vmem>>, vector<1x16x16xf32>
    %207 = vector.shape_cast %206 : vector<1x16x16xf32> to vector<16x16xf32>
    %208 = vector.shape_cast %205 : vector<16x16xf32> to vector<1x16x16xf32>
    tpu.vector_store %arg16[%c3_107, %c0_108, %c0_109], %208 {strides = array<i32>} : memref<4x16x16xf32, #tpu.memory_space<vmem>>, vector<1x16x16xf32>,
    %cst_110 = arith.constant dense<0.000000e+00> : vector<16xf32>
    %209 = vector.multi_reduction <add>, %172, %cst_110 [0] : vector<16x16xf32> to vector<16xf32>
    %210 = vector.shape_cast %209 : vector<16xf32> to vector<1x16xf32>
    %211 = arith.addf %186, %210 : vector<1x16xf32>
    %c3_111 = arith.constant 3 : index
    %c0_112 = arith.constant 0 : index
    %c0_113 = arith.constant 0 : index
    %212 = vector.load %arg17[%c3_111, %c0_112, %c0_113] : memref<4x1x16xf32, #tpu.memory_space<vmem>>, vector<1x1x16xf32>
    %213 = vector.shape_cast %212 : vector<1x1x16xf32> to vector<1x16xf32>
    %214 = vector.shape_cast %211 : vector<1x16xf32> to vector<1x1x16xf32>
    tpu.vector_store %arg17[%c3_111, %c0_112, %c0_113], %214 {strides = array<i32>} : memref<4x1x16xf32, #tpu.memory_space<vmem>>, vector<1x1x16xf32>,
    %c0_114 = arith.constant 0 : index
    %c0_115 = arith.constant 0 : index
    %215 = vector.load %arg18[%c0_114, %c0_115] : memref<16x64xbf16, #tpu.memory_space<vmem>>, vector<16x64xbf16>
    %c0_116 = arith.constant 0 : index
    %c0_117 = arith.constant 0 : index
    %216 = vector.load %arg14[%c0_116, %c0_117] : memref<64x64xbf16, #tpu.memory_space<vmem>>, vector<64x64xbf16>
    %cst_118 = arith.constant dense<0.000000e+00> : vector<16x64xf32>
    %217 = tpu.matmul %215, %216, %cst_118 {dimension_numbers = #tpu.dot_dimension_numbers<[1], [0], [0], [1], [0, 0, 1, 1], [], []>} : vector<16x64xbf16>, vector<64x64xbf16>, vector<16x64xf32> -> vector<16x64xf32>
    %c0_119 = arith.constant 0 : index
    %c0_120 = arith.constant 0 : index
    %c0_121 = arith.constant 0 : index
    %218 = vector.load %arg15[%c0_119, %c0_120, %c0_121] : memref<1x16x64xf32, #tpu.memory_space<vmem>>, vector<1x16x64xf32>
    %219 = vector.shape_cast %218 : vector<1x16x64xf32> to vector<16x64xf32>
    %220 = vector.shape_cast %217 : vector<16x64xf32> to vector<1x16x64xf32>
    tpu.vector_store %arg15[%c0_119, %c0_120, %c0_121], %220 {strides = array<i32>} : memref<1x16x64xf32, #tpu.memory_space<vmem>>, vector<1x16x64xf32>,
    return
  }
  func.func @transform_0(%arg0: i32, %arg1: i32) -> (i32, i32, i32) {
    %c0_i32 = arith.constant 0 : i32
    %c0_i32_0 = arith.constant 0 : i32
    return %arg0, %arg1, %c0_i32 : i32, i32, i32
  }
  func.func @transform_1(%arg0: i32, %arg1: i32) -> (i32, i32) {
    %c0_i32 = arith.constant 0 : i32
    %c0_i32_0 = arith.constant 0 : i32
    %c0_i32_1 = arith.constant 0 : i32
    return %c0_i32, %c0_i32_0 : i32, i32
  }
  func.func @transform_2(%arg0: i32, %arg1: i32) -> (i32, i32) {
    %c0_i32 = arith.constant 0 : i32
    %c0_i32_0 = arith.constant 0 : i32
    %c0_i32_1 = arith.constant 0 : i32
    return %c0_i32, %c0_i32_0 : i32, i32
  }
  func.func @transform_3(%arg0: i32, %arg1: i32) -> (i32, i32) {
    %c0_i32 = arith.constant 0 : i32
    %c0_i32_0 = arith.constant 0 : i32
    %c0_i32_1 = arith.constant 0 : i32
    return %c0_i32, %c0_i32_0 : i32, i32
  }
  func.func @transform_4(%arg0: i32, %arg1: i32) -> (i32, i32) {
    %c0_i32 = arith.constant 0 : i32
    %c0_i32_0 = arith.constant 0 : i32
    %c0_i32_1 = arith.constant 0 : i32
    return %c0_i32, %c0_i32_0 : i32, i32
  }
  func.func @transform_5(%arg0: i32, %arg1: i32) -> (i32, i32) {
    %c0_i32 = arith.constant 0 : i32
    %c0_i32_0 = arith.constant 0 : i32
    %c0_i32_1 = arith.constant 0 : i32
    return %c0_i32, %c0_i32_0 : i32, i32
  }
  func.func @transform_6(%arg0: i32, %arg1: i32) -> (i32, i32) {
    %c0_i32 = arith.constant 0 : i32
    %c0_i32_0 = arith.constant 0 : i32
    %c0_i32_1 = arith.constant 0 : i32
    return %c0_i32, %c0_i32_0 : i32, i32
  }
  func.func @transform_7(%arg0: i32, %arg1: i32) -> (i32, i32) {
    %c0_i32 = arith.constant 0 : i32
    %c0_i32_0 = arith.constant 0 : i32
    %c0_i32_1 = arith.constant 0 : i32
    return %c0_i32, %c0_i32_0 : i32, i32
  }
  func.func @transform_8(%arg0: i32, %arg1: i32) -> (i32, i32) {
    %c0_i32 = arith.constant 0 : i32
    %c0_i32_0 = arith.constant 0 : i32
    %c0_i32_1 = arith.constant 0 : i32
    return %c0_i32, %c0_i32_0 : i32, i32
  }
  func.func @transform_9(%arg0: i32, %arg1: i32) -> (i32, i32) {
    %c0_i32 = arith.constant 0 : i32
    %c0_i32_0 = arith.constant 0 : i32
    %c0_i32_1 = arith.constant 0 : i32
    return %c0_i32, %c0_i32_0 : i32, i32
  }
  func.func @transform_10(%arg0: i32, %arg1: i32) -> (i32, i32) {
    %c0_i32 = arith.constant 0 : i32
    %c0_i32_0 = arith.constant 0 : i32
    %c0_i32_1 = arith.constant 0 : i32
    return %c0_i32, %c0_i32_0 : i32, i32
  }
  func.func @transform_11(%arg0: i32, %arg1: i32) -> (i32, i32) {
    %c0_i32 = arith.constant 0 : i32
    %c0_i32_0 = arith.constant 0 : i32
    %c0_i32_1 = arith.constant 0 : i32
    return %c0_i32, %c0_i32_0 : i32, i32
  }
  func.func @transform_12(%arg0: i32, %arg1: i32) -> (i32, i32) {
    %c0_i32 = arith.constant 0 : i32
    %c0_i32_0 = arith.constant 0 : i32
    %c0_i32_1 = arith.constant 0 : i32
    return %c0_i32, %c0_i32_0 : i32, i32
  }
  func.func @transform_13(%arg0: i32, %arg1: i32) -> (i32, i32, i32) {
    %c0_i32 = arith.constant 0 : i32
    %c0_i32_0 = arith.constant 0 : i32
    return %arg0, %arg1, %c0_i32 : i32, i32, i32
  }
}

module attributes {stable_mosaic.version = 11 : i64} {
  func.func @_linear_attention_kernel(%arg0: i32, %arg1: i32, %arg2: memref<1x16x64xbf16, #tpu.memory_space<vmem>>, %arg3: memref<64x64xbf16, #tpu.memory_space<vmem>>, %arg4: memref<64x64xbf16, #tpu.memory_space<vmem>>, %arg5: memref<64x64xbf16, #tpu.memory_space<vmem>>, %arg6: memref<64x64xbf16, #tpu.memory_space<vmem>>, %arg7: memref<1x64xf32, #tpu.memory_space<vmem>>, %arg8: memref<64x64xbf16, #tpu.memory_space<vmem>>, %arg9: memref<1x64xf32, #tpu.memory_space<vmem>>, %arg10: memref<64x64xbf16, #tpu.memory_space<vmem>>, %arg11: memref<1x64xf32, #tpu.memory_space<vmem>>, %arg12: memref<64x64xbf16, #tpu.memory_space<vmem>>, %arg13: memref<1x64xf32, #tpu.memory_space<vmem>>, %arg14: memref<64x64xbf16, #tpu.memory_space<vmem>>, %arg15: memref<1x16x64xf32, #tpu.memory_space<vmem>>, %arg16: memref<4x16x16xf32, #tpu.memory_space<vmem>>, %arg17: memref<4x1x16xf32, #tpu.memory_space<vmem>>, %arg18: memref<16x64xbf16, #tpu.memory_space<vmem>>) attributes {dimension_semantics = [#tpu.dimension_semantics<parallel>, #tpu.dimension_semantics<arbitrary>], iteration_bounds = array<i64: 2, 4>, scalar_prefetch = 0 : i64, scratch_operands = 3 : i64, tpu.core_type = #tpu.core_type<tc>, window_params = [{transform_indices = @transform_0, window_bounds = array<i64: 1, 16, 64>}, {pipeline_mode = #tpu.pipeline_mode<synchronous>, transform_indices = @transform_1, window_bounds = array<i64: 64, 64>}, {pipeline_mode = #tpu.pipeline_mode<synchronous>, transform_indices = @transform_2, window_bounds = array<i64: 64, 64>}, {pipeline_mode = #tpu.pipeline_mode<synchronous>, transform_indices = @transform_3, window_bounds = array<i64: 64, 64>}, {pipeline_mode = #tpu.pipeline_mode<synchronous>, transform_indices = @transform_4, window_bounds = array<i64: 64, 64>}, {pipeline_mode = #tpu.pipeline_mode<synchronous>, transform_indices = @transform_5, window_bounds = array<i64: 1, 64>}, {pipeline_mode = #tpu.pipeline_mode<synchronous>, transform_indices = @transform_6, window_bounds = array<i64: 64, 64>}, {pipeline_mode = #tpu.pipeline_mode<synchronous>, transform_indices = @transform_7, window_bounds = array<i64: 1, 64>}, {pipeline_mode = #tpu.pipeline_mode<synchronous>, transform_indices = @transform_8, window_bounds = array<i64: 64, 64>}, {pipeline_mode = #tpu.pipeline_mode<synchronous>, transform_indices = @transform_9, window_bounds = array<i64: 1, 64>}, {pipeline_mode = #tpu.pipeline_mode<synchronous>, transform_indices = @transform_10, window_bounds = array<i64: 64, 64>}, {pipeline_mode = #tpu.pipeline_mode<synchronous>, transform_indices = @transform_11, window_bounds = array<i64: 1, 64>}, {pipeline_mode = #tpu.pipeline_mode<synchronous>, transform_indices = @transform_12, window_bounds = array<i64: 64, 64>}, {transform_indices = @transform_13, window_bounds = array<i64: 1, 16, 64>}]} {
    %c0_i32 = arith.constant 0 : i32
    %0 = arith.cmpi eq, %arg1, %c0_i32 : i32
    %1 = arith.extui %0 : i1 to i32
    %c0_i32_0 = arith.constant 0 : i32
    %2 = arith.cmpi ne, %1, %c0_i32_0 : i32
    scf.if %2 {
      %cst_122 = arith.constant 0.000000e+00 : f32
      %221 = vector.broadcast %cst_122 : f32 to vector<4x16x16xf32>
      %c0_123 = arith.constant 0 : index
      %c0_124 = arith.constant 0 : index
      %c0_125 = arith.constant 0 : index
      %222 = vector.load %arg16[%c0_123, %c0_124, %c0_125] : memref<4x16x16xf32, #tpu.memory_space<vmem>>, vector<4x16x16xf32>
      tpu.vector_store %arg16[%c0_123, %c0_124, %c0_125], %221 {strides = array<i32>} : memref<4x16x16xf32, #tpu.memory_space<vmem>>, vector<4x16x16xf32>,
      %cst_126 = arith.constant 0.000000e+00 : f32
      %223 = vector.broadcast %cst_126 : f32 to vector<4x1x16xf32>
      %c0_127 = arith.constant 0 : index
      %c0_128 = arith.constant 0 : index
      %c0_129 = arith.constant 0 : index
      %224 = vector.load %arg17[%c0_127, %c0_128, %c0_129] : memref<4x1x16xf32, #tpu.memory_space<vmem>>, vector<4x1x16xf32>
      tpu.vector_store %arg17[%c0_127, %c0_128, %c0_129], %223 {strides = array<i32>} : memref<4x1x16xf32, #tpu.memory_space<vmem>>, vector<4x1x16xf32>,
    } else {
    }
    %c0 = arith.constant 0 : index
    %c0_1 = arith.constant 0 : index
    %c0_2 = arith.constant 0 : index
    %3 = vector.load %arg2[%c0, %c0_1, %c0_2] : memref<1x16x64xbf16, #tpu.memory_space<vmem>>, vector<1x16x64xbf16>
    %4 = vector.shape_cast %3 : vector<1x16x64xbf16> to vector<16x64xbf16>
    %c0_3 = arith.constant 0 : index
    %c0_4 = arith.constant 0 : index
    %5 = vector.load %arg3[%c0_3, %c0_4] : memref<64x64xbf16, #tpu.memory_space<vmem>>, vector<64x64xbf16>
    %cst = arith.constant dense<0.000000e+00> : vector<16x64xf32>
    %6 = tpu.matmul %4, %5, %cst {dimension_numbers = #tpu.dot_dimension_numbers<[1], [0], [0], [1], [0, 0, 1, 1], [], []>} : vector<16x64xbf16>, vector<64x64xbf16>, vector<16x64xf32> -> vector<16x64xf32>
    %c0_5 = arith.constant 0 : index
    %c0_6 = arith.constant 0 : index
    %7 = vector.load %arg4[%c0_5, %c0_6] : memref<64x64xbf16, #tpu.memory_space<vmem>>, vector<64x64xbf16>
    %cst_7 = arith.constant dense<0.000000e+00> : vector<16x64xf32>
    %8 = tpu.matmul %4, %7, %cst_7 {dimension_numbers = #tpu.dot_dimension_numbers<[1], [0], [0], [1], [0, 0, 1, 1], [], []>} : vector<16x64xbf16>, vector<64x64xbf16>, vector<16x64xf32> -> vector<16x64xf32>
    %c0_8 = arith.constant 0 : index
    %c0_9 = arith.constant 0 : index
    %9 = vector.load %arg5[%c0_8, %c0_9] : memref<64x64xbf16, #tpu.memory_space<vmem>>, vector<64x64xbf16>
    %cst_10 = arith.constant dense<0.000000e+00> : vector<16x64xf32>
    %10 = tpu.matmul %4, %9, %cst_10 {dimension_numbers = #tpu.dot_dimension_numbers<[1], [0], [0], [1], [0, 0, 1, 1], [], []>} : vector<16x64xbf16>, vector<64x64xbf16>, vector<16x64xf32> -> vector<16x64xf32>
    %11 = arith.truncf %6 : vector<16x64xf32> to vector<16x64xbf16>
    %c0_11 = arith.constant 0 : index
    %c0_12 = arith.constant 0 : index
    %12 = vector.load %arg6[%c0_11, %c0_12] : memref<64x64xbf16, #tpu.memory_space<vmem>>, vector<64x64xbf16>
    %c0_13 = arith.constant 0 : index
    %c0_14 = arith.constant 0 : index
    %13 = vector.load %arg7[%c0_13, %c0_14] : memref<1x64xf32, #tpu.memory_space<vmem>>, vector<1x64xf32>
    %c0_15 = arith.constant 0 : index
    %c0_16 = arith.constant 0 : index
    %14 = vector.load %arg8[%c0_15, %c0_16] : memref<64x64xbf16, #tpu.memory_space<vmem>>, vector<64x64xbf16>
    %c0_17 = arith.constant 0 : index
    %c0_18 = arith.constant 0 : index
    %15 = vector.load %arg9[%c0_17, %c0_18] : memref<1x64xf32, #tpu.memory_space<vmem>>, vector<1x64xf32>
    %cst_19 = arith.constant dense<0.000000e+00> : vector<16x64xf32>
    %16 = tpu.matmul %11, %12, %cst_19 {dimension_numbers = #tpu.dot_dimension_numbers<[1], [0], [0], [1], [0, 0, 1, 1], [], []>} : vector<16x64xbf16>, vector<64x64xbf16>, vector<16x64xf32> -> vector<16x64xf32>
    %17 = vector.broadcast %13 : vector<1x64xf32> to vector<16x64xf32>
    %18 = arith.addf %16, %17 : vector<16x64xf32>
    %cst_20 = arith.constant dense<0.000000e+00> : vector<16x64xf32>
    %19 = tpu.matmul %11, %14, %cst_20 {dimension_numbers = #tpu.dot_dimension_numbers<[1], [0], [0], [1], [0, 0, 1, 1], [], []>} : vector<16x64xbf16>, vector<64x64xbf16>, vector<16x64xf32> -> vector<16x64xf32>
    %20 = vector.broadcast %15 : vector<1x64xf32> to vector<16x64xf32>
    %21 = arith.addf %19, %20 : vector<16x64xf32>
    %22 = arith.mulf %18, %21 : vector<16x64xf32>
    %23 = arith.truncf %8 : vector<16x64xf32> to vector<16x64xbf16>
    %c0_21 = arith.constant 0 : index
    %c0_22 = arith.constant 0 : index
    %24 = vector.load %arg10[%c0_21, %c0_22] : memref<64x64xbf16, #tpu.memory_space<vmem>>, vector<64x64xbf16>
    %c0_23 = arith.constant 0 : index
    %c0_24 = arith.constant 0 : index
    %25 = vector.load %arg11[%c0_23, %c0_24] : memref<1x64xf32, #tpu.memory_space<vmem>>, vector<1x64xf32>
    %c0_25 = arith.constant 0 : index
    %c0_26 = arith.constant 0 : index
    %26 = vector.load %arg12[%c0_25, %c0_26] : memref<64x64xbf16, #tpu.memory_space<vmem>>, vector<64x64xbf16>
    %c0_27 = arith.constant 0 : index
    %c0_28 = arith.constant 0 : index
    %27 = vector.load %arg13[%c0_27, %c0_28] : memref<1x64xf32, #tpu.memory_space<vmem>>, vector<1x64xf32>
    %cst_29 = arith.constant dense<0.000000e+00> : vector<16x64xf32>
    %28 = tpu.matmul %23, %24, %cst_29 {dimension_numbers = #tpu.dot_dimension_numbers<[1], [0], [0], [1], [0, 0, 1, 1], [], []>} : vector<16x64xbf16>, vector<64x64xbf16>, vector<16x64xf32> -> vector<16x64xf32>
    %29 = vector.broadcast %25 : vector<1x64xf32> to vector<16x64xf32>
    %30 = arith.addf %28, %29 : vector<16x64xf32>
    %cst_30 = arith.constant dense<0.000000e+00> : vector<16x64xf32>
    %31 = tpu.matmul %23, %26, %cst_30 {dimension_numbers = #tpu.dot_dimension_numbers<[1], [0], [0], [1], [0, 0, 1, 1], [], []>} : vector<16x64xbf16>, vector<64x64xbf16>, vector<16x64xf32> -> vector<16x64xf32>
    %32 = vector.broadcast %27 : vector<1x64xf32> to vector<16x64xf32>
    %33 = arith.addf %31, %32 : vector<16x64xf32>
    %34 = arith.mulf %30, %33 : vector<16x64xf32>
    %35 = tpu.iota {dimensions = array<i32: 0>} : vector<16x16xi32>
    %36 = tpu.iota {dimensions = array<i32: 1>} : vector<16x16xi32>
    %37 = arith.cmpi sge, %35, %36 : vector<16x16xi32>
    %cst_31 = arith.constant 1.000000e+00 : bf16
    %38 = vector.broadcast %cst_31 : bf16 to vector<16x1xbf16>
    %39 = vector.extract_strided_slice %22 {offsets = [0, 0], sizes = [16, 16], strides = [1, 1]} : vector<16x64xf32> to vector<16x16xf32>
    %40 = vector.extract_strided_slice %34 {offsets = [0, 0], sizes = [16, 16], strides = [1, 1]} : vector<16x64xf32> to vector<16x16xf32>
    %41 = arith.truncf %39 : vector<16x16xf32> to vector<16x16xbf16>
    %42 = arith.truncf %40 : vector<16x16xf32> to vector<16x16xbf16>
    %cst_32 = arith.constant dense<0.000000e+00> : vector<16x16xf32>
    %43 = tpu.matmul %41, %42, %cst_32 {dimension_numbers = #tpu.dot_dimension_numbers<[1], [1], [0], [0], [0, 0, 1, 0], [], []>} : vector<16x16xbf16>, vector<16x16xbf16>, vector<16x16xf32> -> vector<16x16xf32>
    %cst_33 = arith.constant 0.000000e+00 : f32
    %44 = vector.broadcast %cst_33 : f32 to vector<16x16xf32>
    %45 = arith.select %37, %43, %44 : vector<16x16xi1>, vector<16x16xf32>
    %46 = vector.extract_strided_slice %10 {offsets = [0, 0], sizes = [16, 16], strides = [1, 1]} : vector<16x64xf32> to vector<16x16xf32>
    %47 = arith.truncf %46 : vector<16x16xf32> to vector<16x16xbf16>
    %48 = tpu.concatenate %47, %38 in 1 : vector<16x16xbf16>, vector<16x1xbf16> -> vector<16x17xbf16>
    %49 = arith.truncf %45 : vector<16x16xf32> to vector<16x16xbf16>
    %cst_34 = arith.constant dense<0.000000e+00> : vector<16x17xf32>
    %50 = tpu.matmul %49, %48, %cst_34 {dimension_numbers = #tpu.dot_dimension_numbers<[1], [0], [0], [1], [0, 0, 1, 1], [], []>} : vector<16x16xbf16>, vector<16x17xbf16>, vector<16x17xf32> -> vector<16x17xf32>
    %c0_35 = arith.constant 0 : index
    %c0_36 = arith.constant 0 : index
    %c0_37 = arith.constant 0 : index
    %51 = vector.load %arg16[%c0_35, %c0_36, %c0_37] : memref<4x16x16xf32, #tpu.memory_space<vmem>>, vector<1x16x16xf32>
    %52 = vector.shape_cast %51 : vector<1x16x16xf32> to vector<16x16xf32>
    %c0_38 = arith.constant 0 : index
    %c0_39 = arith.constant 0 : index
    %c0_40 = arith.constant 0 : index
    %53 = vector.load %arg17[%c0_38, %c0_39, %c0_40] : memref<4x1x16xf32, #tpu.memory_space<vmem>>, vector<1x1x16xf32>
    %54 = vector.shape_cast %53 : vector<1x1x16xf32> to vector<1x16xf32>
    %55 = vector.extract_strided_slice %50 {offsets = [0, 0], sizes = [16, 16], strides = [1, 1]} : vector<16x17xf32> to vector<16x16xf32>
    %56 = arith.truncf %52 : vector<16x16xf32> to vector<16x16xbf16>
    %cst_41 = arith.constant dense<0.000000e+00> : vector<16x16xf32>
    %57 = tpu.matmul %41, %56, %cst_41 {dimension_numbers = #tpu.dot_dimension_numbers<[1], [0], [0], [1], [0, 0, 1, 1], [], []>} : vector<16x16xbf16>, vector<16x16xbf16>, vector<16x16xf32> -> vector<16x16xf32>
    %58 = arith.addf %55, %57 : vector<16x16xf32>
    %59 = vector.extract_strided_slice %50 {offsets = [0, 16], sizes = [16, 1], strides = [1, 1]} : vector<16x17xf32> to vector<16x1xf32>
    %60 = vector.broadcast %54 : vector<1x16xf32> to vector<16x16xf32>
    %61 = arith.mulf %39, %60 : vector<16x16xf32>
    %cst_42 = arith.constant dense<0.000000e+00> : vector<16xf32>
    %62 = vector.multi_reduction <add>, %61, %cst_42 [1] : vector<16x16xf32> to vector<16xf32>
    %63 = vector.shape_cast %62 : vector<16xf32> to vector<16x1xf32>
    %64 = arith.addf %59, %63 : vector<16x1xf32>
    %cst_43 = arith.constant 9.99999996E-13 : f32
    %65 = vector.broadcast %cst_43 : f32 to vector<16x1xf32>
    %66 = arith.addf %64, %65 : vector<16x1xf32>
    %67 = tpu.reciprocal %66 : vector<16x1xf32> -> vector<16x1xf32>
    %68 = vector.broadcast %67 : vector<16x1xf32> to vector<16x16xf32>
    %69 = arith.mulf %58, %68 : vector<16x16xf32>
    %70 = arith.truncf %69 : vector<16x16xf32> to vector<16x16xbf16>
    %c0_44 = arith.constant 0 : index
    %c0_45 = arith.constant 0 : index
    %71 = vector.load %arg18[%c0_44, %c0_45] : memref<16x64xbf16, #tpu.memory_space<vmem>>, vector<16x16xbf16>
    tpu.vector_store %arg18[%c0_44, %c0_45], %70 {strides = array<i32>} : memref<16x64xbf16, #tpu.memory_space<vmem>>, vector<16x16xbf16>,
    %cst_46 = arith.constant dense<0.000000e+00> : vector<16x16xf32>
    %72 = tpu.matmul %42, %47, %cst_46 {dimension_numbers = #tpu.dot_dimension_numbers<[0], [0], [1], [1], [0, 1, 1, 1], [], []>} : vector<16x16xbf16>, vector<16x16xbf16>, vector<16x16xf32> -> vector<16x16xf32>
    %73 = arith.addf %52, %72 : vector<16x16xf32>
    %c0_47 = arith.constant 0 : index
    %c0_48 = arith.constant 0 : index
    %c0_49 = arith.constant 0 : index
    %74 = vector.load %arg16[%c0_47, %c0_48, %c0_49] : memref<4x16x16xf32, #tpu.memory_space<vmem>>, vector<1x16x16xf32>
    %75 = vector.shape_cast %74 : vector<1x16x16xf32> to vector<16x16xf32>
    %76 = vector.shape_cast %73 : vector<16x16xf32> to vector<1x16x16xf32>
    tpu.vector_store %arg16[%c0_47, %c0_48, %c0_49], %76 {strides = array<i32>} : memref<4x16x16xf32, #tpu.memory_space<vmem>>, vector<1x16x16xf32>,
    %cst_50 = arith.constant dense<0.000000e+00> : vector<16xf32>
    %77 = vector.multi_reduction <add>, %40, %cst_50 [0] : vector<16x16xf32> to vector<16xf32>
    %78 = vector.shape_cast %77 : vector<16xf32> to vector<1x16xf32>
    %79 = arith.addf %54, %78 : vector<1x16xf32>
    %c0_51 = arith.constant 0 : index
    %c0_52 = arith.constant 0 : index
    %c0_53 = arith.constant 0 : index
    %80 = vector.load %arg17[%c0_51, %c0_52, %c0_53] : memref<4x1x16xf32, #tpu.memory_space<vmem>>, vector<1x1x16xf32>
    %81 = vector.shape_cast %80 : vector<1x1x16xf32> to vector<1x16xf32>
    %82 = vector.shape_cast %79 : vector<1x16xf32> to vector<1x1x16xf32>
    tpu.vector_store %arg17[%c0_51, %c0_52, %c0_53], %82 {strides = array<i32>} : memref<4x1x16xf32, #tpu.memory_space<vmem>>, vector<1x1x16xf32>,
    %83 = vector.extract_strided_slice %22 {offsets = [0, 16], sizes = [16, 16], strides = [1, 1]} : vector<16x64xf32> to vector<16x16xf32>
    %84 = vector.extract_strided_slice %34 {offsets = [0, 16], sizes = [16, 16], strides = [1, 1]} : vector<16x64xf32> to vector<16x16xf32>
    %85 = arith.truncf %83 : vector<16x16xf32> to vector<16x16xbf16>
    %86 = arith.truncf %84 : vector<16x16xf32> to vector<16x16xbf16>
    %cst_54 = arith.constant dense<0.000000e+00> : vector<16x16xf32>
    %87 = tpu.matmul %85, %86, %cst_54 {dimension_numbers = #tpu.dot_dimension_numbers<[1], [1], [0], [0], [0, 0, 1, 0], [], []>} : vector<16x16xbf16>, vector<16x16xbf16>, vector<16x16xf32> -> vector<16x16xf32>
    %cst_55 = arith.constant 0.000000e+00 : f32
    %88 = vector.broadcast %cst_55 : f32 to vector<16x16xf32>
    %89 = arith.select %37, %87, %88 : vector<16x16xi1>, vector<16x16xf32>
    %90 = vector.extract_strided_slice %10 {offsets = [0, 16], sizes = [16, 16], strides = [1, 1]} : vector<16x64xf32> to vector<16x16xf32>
    %91 = arith.truncf %90 : vector<16x16xf32> to vector<16x16xbf16>
    %92 = tpu.concatenate %91, %38 in 1 : vector<16x16xbf16>, vector<16x1xbf16> -> vector<16x17xbf16>
    %93 = arith.truncf %89 : vector<16x16xf32> to vector<16x16xbf16>
    %cst_56 = arith.constant dense<0.000000e+00> : vector<16x17xf32>
    %94 = tpu.matmul %93, %92, %cst_56 {dimension_numbers = #tpu.dot_dimension_numbers<[1], [0], [0], [1], [0, 0, 1, 1], [], []>} : vector<16x16xbf16>, vector<16x17xbf16>, vector<16x17xf32> -> vector<16x17xf32>
    %c1 = arith.constant 1 : index
    %c0_57 = arith.constant 0 : index
    %c0_58 = arith.constant 0 : index
    %95 = vector.load %arg16[%c1, %c0_57, %c0_58] : memref<4x16x16xf32, #tpu.memory_space<vmem>>, vector<1x16x16xf32>
    %96 = vector.shape_cast %95 : vector<1x16x16xf32> to vector<16x16xf32>
    %c1_59 = arith.constant 1 : index
    %c0_60 = arith.constant 0 : index
    %c0_61 = arith.constant 0 : index
    %97 = vector.load %arg17[%c1_59, %c0_60, %c0_61] : memref<4x1x16xf32, #tpu.memory_space<vmem>>, vector<1x1x16xf32>
    %98 = vector.shape_cast %97 : vector<1x1x16xf32> to vector<1x16xf32>
    %99 = vector.extract_strided_slice %94 {offsets = [0, 0], sizes = [16, 16], strides = [1, 1]} : vector<16x17xf32> to vector<16x16xf32>
    %100 = arith.truncf %96 : vector<16x16xf32> to vector<16x16xbf16>
    %cst_62 = arith.constant dense<0.000000e+00> : vector<16x16xf32>
    %101 = tpu.matmul %85, %100, %cst_62 {dimension_numbers = #tpu.dot_dimension_numbers<[1], [0], [0], [1], [0, 0, 1, 1], [], []>} : vector<16x16xbf16>, vector<16x16xbf16>, vector<16x16xf32> -> vector<16x16xf32>
    %102 = arith.addf %99, %101 : vector<16x16xf32>
    %103 = vector.extract_strided_slice %94 {offsets = [0, 16], sizes = [16, 1], strides = [1, 1]} : vector<16x17xf32> to vector<16x1xf32>
    %104 = vector.broadcast %98 : vector<1x16xf32> to vector<16x16xf32>
    %105 = arith.mulf %83, %104 : vector<16x16xf32>
    %cst_63 = arith.constant dense<0.000000e+00> : vector<16xf32>
    %106 = vector.multi_reduction <add>, %105, %cst_63 [1] : vector<16x16xf32> to vector<16xf32>
    %107 = vector.shape_cast %106 : vector<16xf32> to vector<16x1xf32>
    %108 = arith.addf %103, %107 : vector<16x1xf32>
    %cst_64 = arith.constant 9.99999996E-13 : f32
    %109 = vector.broadcast %cst_64 : f32 to vector<16x1xf32>
    %110 = arith.addf %108, %109 : vector<16x1xf32>
    %111 = tpu.reciprocal %110 : vector<16x1xf32> -> vector<16x1xf32>
    %112 = vector.broadcast %111 : vector<16x1xf32> to vector<16x16xf32>
    %113 = arith.mulf %102, %112 : vector<16x16xf32>
    %114 = arith.truncf %113 : vector<16x16xf32> to vector<16x16xbf16>
    %c0_65 = arith.constant 0 : index
    %c16 = arith.constant 16 : index
    %115 = vector.load %arg18[%c0_65, %c16] : memref<16x64xbf16, #tpu.memory_space<vmem>>, vector<16x16xbf16>
    tpu.vector_store %arg18[%c0_65, %c16], %114 {strides = array<i32>} : memref<16x64xbf16, #tpu.memory_space<vmem>>, vector<16x16xbf16>,
    %cst_66 = arith.constant dense<0.000000e+00> : vector<16x16xf32>
    %116 = tpu.matmul %86, %91, %cst_66 {dimension_numbers = #tpu.dot_dimension_numbers<[0], [0], [1], [1], [0, 1, 1, 1], [], []>} : vector<16x16xbf16>, vector<16x16xbf16>, vector<16x16xf32> -> vector<16x16xf32>
    %117 = arith.addf %96, %116 : vector<16x16xf32>
    %c1_67 = arith.constant 1 : index
    %c0_68 = arith.constant 0 : index
    %c0_69 = arith.constant 0 : index
    %118 = vector.load %arg16[%c1_67, %c0_68, %c0_69] : memref<4x16x16xf32, #tpu.memory_space<vmem>>, vector<1x16x16xf32>
    %119 = vector.shape_cast %118 : vector<1x16x16xf32> to vector<16x16xf32>
    %120 = vector.shape_cast %117 : vector<16x16xf32> to vector<1x16x16xf32>
    tpu.vector_store %arg16[%c1_67, %c0_68, %c0_69], %120 {strides = array<i32>} : memref<4x16x16xf32, #tpu.memory_space<vmem>>, vector<1x16x16xf32>,
    %cst_70 = arith.constant dense<0.000000e+00> : vector<16xf32>
    %121 = vector.multi_reduction <add>, %84, %cst_70 [0] : vector<16x16xf32> to vector<16xf32>
    %122 = vector.shape_cast %121 : vector<16xf32> to vector<1x16xf32>
    %123 = arith.addf %98, %122 : vector<1x16xf32>
    %c1_71 = arith.constant 1 : index
    %c0_72 = arith.constant 0 : index
    %c0_73 = arith.constant 0 : index
    %124 = vector.load %arg17[%c1_71, %c0_72, %c0_73] : memref<4x1x16xf32, #tpu.memory_space<vmem>>, vector<1x1x16xf32>
    %125 = vector.shape_cast %124 : vector<1x1x16xf32> to vector<1x16xf32>
    %126 = vector.shape_cast %123 : vector<1x16xf32> to vector<1x1x16xf32>
    tpu.vector_store %arg17[%c1_71, %c0_72, %c0_73], %126 {strides = array<i32>} : memref<4x1x16xf32, #tpu.memory_space<vmem>>, vector<1x1x16xf32>,
    %127 = vector.extract_strided_slice %22 {offsets = [0, 32], sizes = [16, 16], strides = [1, 1]} : vector<16x64xf32> to vector<16x16xf32>
    %128 = vector.extract_strided_slice %34 {offsets = [0, 32], sizes = [16, 16], strides = [1, 1]} : vector<16x64xf32> to vector<16x16xf32>
    %129 = arith.truncf %127 : vector<16x16xf32> to vector<16x16xbf16>
    %130 = arith.truncf %128 : vector<16x16xf32> to vector<16x16xbf16>
    %cst_74 = arith.constant dense<0.000000e+00> : vector<16x16xf32>
    %131 = tpu.matmul %129, %130, %cst_74 {dimension_numbers = #tpu.dot_dimension_numbers<[1], [1], [0], [0], [0, 0, 1, 0], [], []>} : vector<16x16xbf16>, vector<16x16xbf16>, vector<16x16xf32> -> vector<16x16xf32>
    %cst_75 = arith.constant 0.000000e+00 : f32
    %132 = vector.broadcast %cst_75 : f32 to vector<16x16xf32>
    %133 = arith.select %37, %131, %132 : vector<16x16xi1>, vector<16x16xf32>
    %134 = vector.extract_strided_slice %10 {offsets = [0, 32], sizes = [16, 16], strides = [1, 1]} : vector<16x64xf32> to vector<16x16xf32>
    %135 = arith.truncf %134 : vector<16x16xf32> to vector<16x16xbf16>
    %136 = tpu.concatenate %135, %38 in 1 : vector<16x16xbf16>, vector<16x1xbf16> -> vector<16x17xbf16>
    %137 = arith.truncf %133 : vector<16x16xf32> to vector<16x16xbf16>
    %cst_76 = arith.constant dense<0.000000e+00> : vector<16x17xf32>
    %138 = tpu.matmul %137, %136, %cst_76 {dimension_numbers = #tpu.dot_dimension_numbers<[1], [0], [0], [1], [0, 0, 1, 1], [], []>} : vector<16x16xbf16>, vector<16x17xbf16>, vector<16x17xf32> -> vector<16x17xf32>
    %c2 = arith.constant 2 : index
    %c0_77 = arith.constant 0 : index
    %c0_78 = arith.constant 0 : index
    %139 = vector.load %arg16[%c2, %c0_77, %c0_78] : memref<4x16x16xf32, #tpu.memory_space<vmem>>, vector<1x16x16xf32>
    %140 = vector.shape_cast %139 : vector<1x16x16xf32> to vector<16x16xf32>
    %c2_79 = arith.constant 2 : index
    %c0_80 = arith.constant 0 : index
    %c0_81 = arith.constant 0 : index
    %141 = vector.load %arg17[%c2_79, %c0_80, %c0_81] : memref<4x1x16xf32, #tpu.memory_space<vmem>>, vector<1x1x16xf32>
    %142 = vector.shape_cast %141 : vector<1x1x16xf32> to vector<1x16xf32>
    %143 = vector.extract_strided_slice %138 {offsets = [0, 0], sizes = [16, 16], strides = [1, 1]} : vector<16x17xf32> to vector<16x16xf32>
    %144 = arith.truncf %140 : vector<16x16xf32> to vector<16x16xbf16>
    %cst_82 = arith.constant dense<0.000000e+00> : vector<16x16xf32>
    %145 = tpu.matmul %129, %144, %cst_82 {dimension_numbers = #tpu.dot_dimension_numbers<[1], [0], [0], [1], [0, 0, 1, 1], [], []>} : vector<16x16xbf16>, vector<16x16xbf16>, vector<16x16xf32> -> vector<16x16xf32>
    %146 = arith.addf %143, %145 : vector<16x16xf32>
    %147 = vector.extract_strided_slice %138 {offsets = [0, 16], sizes = [16, 1], strides = [1, 1]} : vector<16x17xf32> to vector<16x1xf32>
    %148 = vector.broadcast %142 : vector<1x16xf32> to vector<16x16xf32>
    %149 = arith.mulf %127, %148 : vector<16x16xf32>
    %cst_83 = arith.constant dense<0.000000e+00> : vector<16xf32>
    %150 = vector.multi_reduction <add>, %149, %cst_83 [1] : vector<16x16xf32> to vector<16xf32>
    %151 = vector.shape_cast %150 : vector<16xf32> to vector<16x1xf32>
    %152 = arith.addf %147, %151 : vector<16x1xf32>
    %cst_84 = arith.constant 9.99999996E-13 : f32
    %153 = vector.broadcast %cst_84 : f32 to vector<16x1xf32>
    %154 = arith.addf %152, %153 : vector<16x1xf32>
    %155 = tpu.reciprocal %154 : vector<16x1xf32> -> vector<16x1xf32>
    %156 = vector.broadcast %155 : vector<16x1xf32> to vector<16x16xf32>
    %157 = arith.mulf %146, %156 : vector<16x16xf32>
    %158 = arith.truncf %157 : vector<16x16xf32> to vector<16x16xbf16>
    %c0_85 = arith.constant 0 : index
    %c32 = arith.constant 32 : index
    %159 = vector.load %arg18[%c0_85, %c32] : memref<16x64xbf16, #tpu.memory_space<vmem>>, vector<16x16xbf16>
    tpu.vector_store %arg18[%c0_85, %c32], %158 {strides = array<i32>} : memref<16x64xbf16, #tpu.memory_space<vmem>>, vector<16x16xbf16>,
    %cst_86 = arith.constant dense<0.000000e+00> : vector<16x16xf32>
    %160 = tpu.matmul %130, %135, %cst_86 {dimension_numbers = #tpu.dot_dimension_numbers<[0], [0], [1], [1], [0, 1, 1, 1], [], []>} : vector<16x16xbf16>, vector<16x16xbf16>, vector<16x16xf32> -> vector<16x16xf32>
    %161 = arith.addf %140, %160 : vector<16x16xf32>
    %c2_87 = arith.constant 2 : index
    %c0_88 = arith.constant 0 : index
    %c0_89 = arith.constant 0 : index
    %162 = vector.load %arg16[%c2_87, %c0_88, %c0_89] : memref<4x16x16xf32, #tpu.memory_space<vmem>>, vector<1x16x16xf32>
    %163 = vector.shape_cast %162 : vector<1x16x16xf32> to vector<16x16xf32>
    %164 = vector.shape_cast %161 : vector<16x16xf32> to vector<1x16x16xf32>
    tpu.vector_store %arg16[%c2_87, %c0_88, %c0_89], %164 {strides = array<i32>} : memref<4x16x16xf32, #tpu.memory_space<vmem>>, vector<1x16x16xf32>,
    %cst_90 = arith.constant dense<0.000000e+00> : vector<16xf32>
    %165 = vector.multi_reduction <add>, %128, %cst_90 [0] : vector<16x16xf32> to vector<16xf32>
    %166 = vector.shape_cast %165 : vector<16xf32> to vector<1x16xf32>
    %167 = arith.addf %142, %166 : vector<1x16xf32>
    %c2_91 = arith.constant 2 : index
    %c0_92 = arith.constant 0 : index
    %c0_93 = arith.constant 0 : index
    %168 = vector.load %arg17[%c2_91, %c0_92, %c0_93] : memref<4x1x16xf32, #tpu.memory_space<vmem>>, vector<1x1x16xf32>
    %169 = vector.shape_cast %168 : vector<1x1x16xf32> to vector<1x16xf32>
    %170 = vector.shape_cast %167 : vector<1x16xf32> to vector<1x1x16xf32>
    tpu.vector_store %arg17[%c2_91, %c0_92, %c0_93], %170 {strides = array<i32>} : memref<4x1x16xf32, #tpu.memory_space<vmem>>, vector<1x1x16xf32>,
    %171 = vector.extract_strided_slice %22 {offsets = [0, 48], sizes = [16, 16], strides = [1, 1]} : vector<16x64xf32> to vector<16x16xf32>
    %172 = vector.extract_strided_slice %34 {offsets = [0, 48], sizes = [16, 16], strides = [1, 1]} : vector<16x64xf32> to vector<16x16xf32>
    %173 = arith.truncf %171 : vector<16x16xf32> to vector<16x16xbf16>
    %174 = arith.truncf %172 : vector<16x16xf32> to vector<16x16xbf16>
    %cst_94 = arith.constant dense<0.000000e+00> : vector<16x16xf32>
    %175 = tpu.matmul %173, %174, %cst_94 {dimension_numbers = #tpu.dot_dimension_numbers<[1], [1], [0], [0], [0, 0, 1, 0], [], []>} : vector<16x16xbf16>, vector<16x16xbf16>, vector<16x16xf32> -> vector<16x16xf32>
    %cst_95 = arith.constant 0.000000e+00 : f32
    %176 = vector.broadcast %cst_95 : f32 to vector<16x16xf32>
    %177 = arith.select %37, %175, %176 : vector<16x16xi1>, vector<16x16xf32>
    %178 = vector.extract_strided_slice %10 {offsets = [0, 48], sizes = [16, 16], strides = [1, 1]} : vector<16x64xf32> to vector<16x16xf32>
    %179 = arith.truncf %178 : vector<16x16xf32> to vector<16x16xbf16>
    %180 = tpu.concatenate %179, %38 in 1 : vector<16x16xbf16>, vector<16x1xbf16> -> vector<16x17xbf16>
    %181 = arith.truncf %177 : vector<16x16xf32> to vector<16x16xbf16>
    %cst_96 = arith.constant dense<0.000000e+00> : vector<16x17xf32>
    %182 = tpu.matmul %181, %180, %cst_96 {dimension_numbers = #tpu.dot_dimension_numbers<[1], [0], [0], [1], [0, 0, 1, 1], [], []>} : vector<16x16xbf16>, vector<16x17xbf16>, vector<16x17xf32> -> vector<16x17xf32>
    %c3 = arith.constant 3 : index
    %c0_97 = arith.constant 0 : index
    %c0_98 = arith.constant 0 : index
    %183 = vector.load %arg16[%c3, %c0_97, %c0_98] : memref<4x16x16xf32, #tpu.memory_space<vmem>>, vector<1x16x16xf32>
    %184 = vector.shape_cast %183 : vector<1x16x16xf32> to vector<16x16xf32>
    %c3_99 = arith.constant 3 : index
    %c0_100 = arith.constant 0 : index
    %c0_101 = arith.constant 0 : index
    %185 = vector.load %arg17[%c3_99, %c0_100, %c0_101] : memref<4x1x16xf32, #tpu.memory_space<vmem>>, vector<1x1x16xf32>
    %186 = vector.shape_cast %185 : vector<1x1x16xf32> to vector<1x16xf32>
    %187 = vector.extract_strided_slice %182 {offsets = [0, 0], sizes = [16, 16], strides = [1, 1]} : vector<16x17xf32> to vector<16x16xf32>
    %188 = arith.truncf %184 : vector<16x16xf32> to vector<16x16xbf16>
    %cst_102 = arith.constant dense<0.000000e+00> : vector<16x16xf32>
    %189 = tpu.matmul %173, %188, %cst_102 {dimension_numbers = #tpu.dot_dimension_numbers<[1], [0], [0], [1], [0, 0, 1, 1], [], []>} : vector<16x16xbf16>, vector<16x16xbf16>, vector<16x16xf32> -> vector<16x16xf32>
    %190 = arith.addf %187, %189 : vector<16x16xf32>
    %191 = vector.extract_strided_slice %182 {offsets = [0, 16], sizes = [16, 1], strides = [1, 1]} : vector<16x17xf32> to vector<16x1xf32>
    %192 = vector.broadcast %186 : vector<1x16xf32> to vector<16x16xf32>
    %193 = arith.mulf %171, %192 : vector<16x16xf32>
    %cst_103 = arith.constant dense<0.000000e+00> : vector<16xf32>
    %194 = vector.multi_reduction <add>, %193, %cst_103 [1] : vector<16x16xf32> to vector<16xf32>
    %195 = vector.shape_cast %194 : vector<16xf32> to vector<16x1xf32>
    %196 = arith.addf %191, %195 : vector<16x1xf32>
    %cst_104 = arith.constant 9.99999996E-13 : f32
    %197 = vector.broadcast %cst_104 : f32 to vector<16x1xf32>
    %198 = arith.addf %196, %197 : vector<16x1xf32>
    %199 = tpu.reciprocal %198 : vector<16x1xf32> -> vector<16x1xf32>
    %200 = vector.broadcast %199 : vector<16x1xf32> to vector<16x16xf32>
    %201 = arith.mulf %190, %200 : vector<16x16xf32>
    %202 = arith.truncf %201 : vector<16x16xf32> to vector<16x16xbf16>
    %c0_105 = arith.constant 0 : index
    %c48 = arith.constant 48 : index
    %203 = vector.load %arg18[%c0_105, %c48] : memref<16x64xbf16, #tpu.memory_space<vmem>>, vector<16x16xbf16>
    tpu.vector_store %arg18[%c0_105, %c48], %202 {strides = array<i32>} : memref<16x64xbf16, #tpu.memory_space<vmem>>, vector<16x16xbf16>,
    %cst_106 = arith.constant dense<0.000000e+00> : vector<16x16xf32>
    %204 = tpu.matmul %174, %179, %cst_106 {dimension_numbers = #tpu.dot_dimension_numbers<[0], [0], [1], [1], [0, 1, 1, 1], [], []>} : vector<16x16xbf16>, vector<16x16xbf16>, vector<16x16xf32> -> vector<16x16xf32>
    %205 = arith.addf %184, %204 : vector<16x16xf32>
    %c3_107 = arith.constant 3 : index
    %c0_108 = arith.constant 0 : index
    %c0_109 = arith.constant 0 : index
    %206 = vector.load %arg16[%c3_107, %c0_108, %c0_109] : memref<4x16x16xf32, #tpu.memory_space<vmem>>, vector<1x16x16xf32>
    %207 = vector.shape_cast %206 : vector<1x16x16xf32> to vector<16x16xf32>
    %208 = vector.shape_cast %205 : vector<16x16xf32> to vector<1x16x16xf32>
    tpu.vector_store %arg16[%c3_107, %c0_108, %c0_109], %208 {strides = array<i32>} : memref<4x16x16xf32, #tpu.memory_space<vmem>>, vector<1x16x16xf32>,
    %cst_110 = arith.constant dense<0.000000e+00> : vector<16xf32>
    %209 = vector.multi_reduction <add>, %172, %cst_110 [0] : vector<16x16xf32> to vector<16xf32>
    %210 = vector.shape_cast %209 : vector<16xf32> to vector<1x16xf32>
    %211 = arith.addf %186, %210 : vector<1x16xf32>
    %c3_111 = arith.constant 3 : index
    %c0_112 = arith.constant 0 : index
    %c0_113 = arith.constant 0 : index
    %212 = vector.load %arg17[%c3_111, %c0_112, %c0_113] : memref<4x1x16xf32, #tpu.memory_space<vmem>>, vector<1x1x16xf32>
    %213 = vector.shape_cast %212 : vector<1x1x16xf32> to vector<1x16xf32>
    %214 = vector.shape_cast %211 : vector<1x16xf32> to vector<1x1x16xf32>
    tpu.vector_store %arg17[%c3_111, %c0_112, %c0_113], %214 {strides = array<i32>} : memref<4x1x16xf32, #tpu.memory_space<vmem>>, vector<1x1x16xf32>,
    %c0_114 = arith.constant 0 : index
    %c0_115 = arith.constant 0 : index
    %215 = vector.load %arg18[%c0_114, %c0_115] : memref<16x64xbf16, #tpu.memory_space<vmem>>, vector<16x64xbf16>
    %c0_116 = arith.constant 0 : index
    %c0_117 = arith.constant 0 : index
    %216 = vector.load %arg14[%c0_116, %c0_117] : memref<64x64xbf16, #tpu.memory_space<vmem>>, vector<64x64xbf16>
    %cst_118 = arith.constant dense<0.000000e+00> : vector<16x64xf32>
    %217 = tpu.matmul %215, %216, %cst_118 {dimension_numbers = #tpu.dot_dimension_numbers<[1], [0], [0], [1], [0, 0, 1, 1], [], []>} : vector<16x64xbf16>, vector<64x64xbf16>, vector<16x64xf32> -> vector<16x64xf32>
    %c0_119 = arith.constant 0 : index
    %c0_120 = arith.constant 0 : index
    %c0_121 = arith.constant 0 : index
    %218 = vector.load %arg15[%c0_119, %c0_120, %c0_121] : memref<1x16x64xf32, #tpu.memory_space<vmem>>, vector<1x16x64xf32>
    %219 = vector.shape_cast %218 : vector<1x16x64xf32> to vector<16x64xf32>
    %220 = vector.shape_cast %217 : vector<16x64xf32> to vector<1x16x64xf32>
    tpu.vector_store %arg15[%c0_119, %c0_120, %c0_121], %220 {strides = array<i32>} : memref<1x16x64xf32, #tpu.memory_space<vmem>>, vector<1x16x64xf32>,
    return
  }
  func.func @transform_0(%arg0: i32, %arg1: i32) -> (i32, i32, i32) {
    %c0_i32 = arith.constant 0 : i32
    %c0_i32_0 = arith.constant 0 : i32
    return %arg0, %arg1, %c0_i32 : i32, i32, i32
  }
  func.func @transform_1(%arg0: i32, %arg1: i32) -> (i32, i32) {
    %c0_i32 = arith.constant 0 : i32
    %c0_i32_0 = arith.constant 0 : i32
    %c0_i32_1 = arith.constant 0 : i32
    return %c0_i32, %c0_i32_0 : i32, i32
  }
  func.func @transform_2(%arg0: i32, %arg1: i32) -> (i32, i32) {
    %c0_i32 = arith.constant 0 : i32
    %c0_i32_0 = arith.constant 0 : i32
    %c0_i32_1 = arith.constant 0 : i32
    return %c0_i32, %c0_i32_0 : i32, i32
  }
  func.func @transform_3(%arg0: i32, %arg1: i32) -> (i32, i32) {
    %c0_i32 = arith.constant 0 : i32
    %c0_i32_0 = arith.constant 0 : i32
    %c0_i32_1 = arith.constant 0 : i32
    return %c0_i32, %c0_i32_0 : i32, i32
  }
  func.func @transform_4(%arg0: i32, %arg1: i32) -> (i32, i32) {
    %c0_i32 = arith.constant 0 : i32
    %c0_i32_0 = arith.constant 0 : i32
    %c0_i32_1 = arith.constant 0 : i32
    return %c0_i32, %c0_i32_0 : i32, i32
  }
  func.func @transform_5(%arg0: i32, %arg1: i32) -> (i32, i32) {
    %c0_i32 = arith.constant 0 : i32
    %c0_i32_0 = arith.constant 0 : i32
    %c0_i32_1 = arith.constant 0 : i32
    return %c0_i32, %c0_i32_0 : i32, i32
  }
  func.func @transform_6(%arg0: i32, %arg1: i32) -> (i32, i32) {
    %c0_i32 = arith.constant 0 : i32
    %c0_i32_0 = arith.constant 0 : i32
    %c0_i32_1 = arith.constant 0 : i32
    return %c0_i32, %c0_i32_0 : i32, i32
  }
  func.func @transform_7(%arg0: i32, %arg1: i32) -> (i32, i32) {
    %c0_i32 = arith.constant 0 : i32
    %c0_i32_0 = arith.constant 0 : i32
    %c0_i32_1 = arith.constant 0 : i32
    return %c0_i32, %c0_i32_0 : i32, i32
  }
  func.func @transform_8(%arg0: i32, %arg1: i32) -> (i32, i32) {
    %c0_i32 = arith.constant 0 : i32
    %c0_i32_0 = arith.constant 0 : i32
    %c0_i32_1 = arith.constant 0 : i32
    return %c0_i32, %c0_i32_0 : i32, i32
  }
  func.func @transform_9(%arg0: i32, %arg1: i32) -> (i32, i32) {
    %c0_i32 = arith.constant 0 : i32
    %c0_i32_0 = arith.constant 0 : i32
    %c0_i32_1 = arith.constant 0 : i32
    return %c0_i32, %c0_i32_0 : i32, i32
  }
  func.func @transform_10(%arg0: i32, %arg1: i32) -> (i32, i32) {
    %c0_i32 = arith.constant 0 : i32
    %c0_i32_0 = arith.constant 0 : i32
    %c0_i32_1 = arith.constant 0 : i32
    return %c0_i32, %c0_i32_0 : i32, i32
  }
  func.func @transform_11(%arg0: i32, %arg1: i32) -> (i32, i32) {
    %c0_i32 = arith.constant 0 : i32
    %c0_i32_0 = arith.constant 0 : i32
    %c0_i32_1 = arith.constant 0 : i32
    return %c0_i32, %c0_i32_0 : i32, i32
  }
  func.func @transform_12(%arg0: i32, %arg1: i32) -> (i32, i32) {
    %c0_i32 = arith.constant 0 : i32
    %c0_i32_0 = arith.constant 0 : i32
    %c0_i32_1 = arith.constant 0 : i32
    return %c0_i32, %c0_i32_0 : i32, i32
  }
  func.func @transform_13(%arg0: i32, %arg1: i32) -> (i32, i32, i32) {
    %c0_i32 = arith.constant 0 : i32
    %c0_i32_0 = arith.constant 0 : i32
    return %arg0, %arg1, %c0_i32 : i32, i32, i32
  }
}

</mosaic_0001>

<bundles_post_ra>
// kernel: tpu_custom_call.1
= control target key start
LH: loop header
LB: loop body
LE: loop exit
PB: predicated region body
PF: predicated region fallthrough
CT: control target
= control target key end

     0   :  { %s4403_s0 = inlined_call_operand.hbm [shape: bf16[2,64,64], index: 0, kind: input, shape index: {}]   ;;  %s4404_s1 = inlined_call_operand.hbm [shape: bf16[64,64], index: 1, kind: input, shape index: {}]   ;;  %s4405_s2 = inlined_call_operand.hbm [shape: bf16[64,64], index: 2, kind: input, shape index: {}]   ;;  %s4406_s3 = inlined_call_operand.hbm [shape: bf16[64,64], index: 3, kind: input, shape index: {}]   ;;  %s4407_s4 = inlined_call_operand.hbm [shape: bf16[64,64], index: 4, kind: input, shape index: {}]   ;;  %s4408_s5 = inlined_call_operand.vmem [shape: f32[1,64], index: 5, kind: input, shape index: {}]   ;;  %s4409_s6 = inlined_call_operand.hbm [shape: bf16[64,64], index: 6, kind: input, shape index: {}]   ;;  %s4410_s7 = inlined_call_operand.vmem [shape: f32[1,64], index: 7, kind: input, shape index: {}]   ;;  %s4411_s8 = inlined_call_operand.hbm [shape: bf16[64,64], index: 8, kind: input, shape index: {}]   ;;  %s4412_s9 = inlined_call_operand.vmem [shape: f32[1,64], index: 9, kind: input, shape index: {}]   ;;  %s4413_s10 = inlined_call_operand.vmem [shape: bf16[64,64], index: 10, kind: input, shape index: {}]   ;;  %s4414_s11 = inlined_call_operand.vmem [shape: f32[1,64], index: 11, kind: input, shape index: {}]   ;;  %s4415_s12 = inlined_call_operand.hbm [shape: bf16[64,64], index: 12, kind: input, shape index: {}]   ;;  %s4416_s13 = inlined_call_operand.hbm [shape: f32[2,64,64], index: 13, kind: output, shape index: {}]  }
   0x1   :  { %4427 = sst [smem:[#allocation29_spill]] %s4404_s1 }
   0x2   :  { %4428 = sst [smem:[#allocation30_spill]] %s4405_s2 }
   0x3   :  { %4429 = sst [smem:[#allocation31_spill]] %s4406_s3 }
   0x4   :  { %4430 = sst [smem:[#allocation32_spill]] %s4407_s4 }
   0x5   :  { %4431 = sst [smem:[#allocation33_spill]] %s4408_s5 }
   0x6   :  { %4432 = sst [smem:[#allocation34_spill]] %s4410_s7 }
   0x7   :  { %4433 = sst [smem:[#allocation35_spill]] %s4412_s9 }
   0x8   :  { %4434 = sst [smem:[#allocation36_spill]] %s4413_s10 }
   0x9   :  { %4435 = sst [smem:[#allocation37_spill]] %s4414_s11 }
   0xa   :  { %4436 = sst [smem:[#allocation38_spill]] %s4416_s13 }
   0xb   :  { %18 = vsyncpa [#allocation6], 0 }
   0xc   :  { %20 = vsyncpa [#allocation6 + $0x1], 0 }
   0xd   :  { %21 = vsyncpa [#allocation9], 0 }
   0xe   :  { %22 = vsyncpa [#allocation12], 0 }
   0xf   :  { %23 = vsyncpa [#allocation15], 0 }
  0x10   :  { %24 = vsyncpa [#allocation18], 0 }
  0x11   :  { %25 = vsyncpa [#allocation7], 0 }
  0x12   :  { %27 = vsyncpa [#allocation7 + $0x1], 0  ;;  %s3581_s25 = smov 0   ;;  %s3583_s26 = smov 0  }
  0x13   :  { %s3585_s27 = smov 0   ;;  %s3587_s28 = smov 0  }
  0x14   :  { %s3589_s29 = smov 0   ;;  %s3591_s30 = smov 0  }
  0x15   :  { %s3593_s14 = smov 0   ;;  %s3595_s15 = smov 0  }
  0x16 LB: > { %4437 = sst [smem:[#allocation26_spill]] %s3469_s28  ;;  %s4417_s16 = sadd.s32 4294967295, %s3485_s15   ;;  %s3485_s15 = sphi %s3595_s15, %s33_s15   ;;  %s3481_s14 = sphi %s3593_s14, %s4477_s14   ;;  %s3477_s30 = sphi %s3591_s30, %s4476_s30   ;;  %s3473_s29 = sphi %s3589_s29, %s4475_s29   ;;  %s3469_s28 = sphi %s3587_s28, %s4474_s28   ;;  %s3465_s27 = sphi %s3585_s27, %s4473_s27   ;;  %s3461_s26 = sphi %s3583_s26, %s4472_s26   ;;  %s3457_s25 = sphi %s3581_s25, %s4471_s25  }
  0x17   : > { %4438 = sst [smem:[#allocation27_spill]] %s3473_s29  ;;  %p2574_p0 = scmp.ge.s32.totalorder %s3485_s15, 1 }
  0x18   : > { %p3625_p1 = scmp.eq.s32.totalorder %s4417_s16, 0  ;;  %p358_p2 = scmp.lt.s32.totalorder %s3485_s15, 9 }
  0x19   : > { %s3487_s19 = smov [#allocation8]   ;;  %s3488_s22 = smov [#allocation11]  }
  0x1a   : > { %s4439_s17 = scalar_select %p3625_p1, 1, 0 }
  0x1b   : > { %p3630_p3 = pnand %p2574_p0, %p358_p2  ;;  %s370_s20 = sshll.u32 %s3487_s19, 4  ;;  %s3634_s20 = int_to_ptr.vmem [resolvable:$true] %s370_s20 }
  0x1c   : > { %s396_s23 = sshll.u32 %s3488_s22, 4  ;;  %s3489_s24 = smov [#allocation14]   ;;  %s3644_s23 = int_to_ptr.vmem [resolvable:$true] %s396_s23 }
  0x1d   : > { %s4440_s18 = scalar_select %p3630_p3, 1, 0 }
  0x1e   : > { %p2961_p4 = pneg %p3630_p3  ;;  %s3646_s16 = sshll.u32 %s3489_s24, 4  ;;  %s426_s16 = int_to_ptr.vmem [resolvable:$true] %s3646_s16 }
  0x1f   : > { %4441 = sst [smem:[#allocation28_spill]] %s4440_s18  ;;  %s4443_s1 = sld [smem:[#allocation29_spill]] }
  0x20   : > { %p3640_p5 = pnand %p2961_p4, %p3625_p1 }
  0x22   : > { %p3656_p7 = pneg %p3640_p5 }
  0x25   : > { %s3145_s19 = scalar_lea.hbm %s4443_s1, 512 }
  0x26   : > { %p3146_p6 = scmp.ne.s32.totalorder %s4443_s1, %s3145_s19  ;;  %p3152_p10 = scmp.lt.u32.totalorder %s3145_s19, %s4443_s1 }
  0x28   : > { %p3148_p8 = pnand %p3656_p7, %p3146_p6 }
  0x2a   : > { %p3149_p9 = pneg %p3148_p8 }
  0x2c   : > { %p3154_p11 = pnand %p3152_p10, %p3149_p9 }
  0x2e   : > { %3157 = shalt.err (!%p3154_p11)
}
  0x2f   : > { %s3158_s9 = scalar_lea.vmem %s3634_s20, 512  ;;  %p3166_p2 = scmp.lt.s32.totalorder %s3634_s20, %s3634_s20 }
  0x30   : > { %p3159_p12 = scmp.ne.s32.totalorder %s3634_s20, %s3158_s9  ;;  %p3167_p4 = scmp.lt.s32.totalorder %s3158_s9, %s3158_s9 }
  0x32   : > { %p3161_p13 = pnand %p3159_p12, %p3656_p7  ;;  %p3168_p6 = por %p3167_p4, %p3166_p2 }
  0x34   : > { %p3162_p0 = pneg %p3161_p13 }
  0x36   : > { %p3169_p8 = pnand %p3168_p6, %p3162_p0 }
  0x38   : > { %3172 = shalt.err (!%p3169_p8)
}
  0x39   : > { %s4424_s11 = smov 64   ;;  %s4425_s13 = smov 4  }
  0x3a   : > { %2964 = dma.hbm_to_vmem [thread:$0]  (!%p3640_p5), %s4443_s1, 512, %s3634_s20, [#allocation9], %s4424_s11, %s4424_s11, %s4425_s13  }
  0x3b   : > { %s4445_s3 = sld [smem:[#allocation31_spill]] }
  0x41   : > { %s3173_s9 = scalar_lea.hbm %s4445_s3, 512 }
  0x42   : > { %p3174_p9 = scmp.ne.s32.totalorder %s4445_s3, %s3173_s9  ;;  %p3180_p12 = scmp.lt.u32.totalorder %s3173_s9, %s4445_s3 }
  0x44   : > { %p3176_p10 = pnand %p3174_p9, %p3656_p7 }
  0x46   : > { %p3177_p11 = pneg %p3176_p10 }
  0x48   : > { %p3182_p13 = pnand %p3180_p12, %p3177_p11 }
  0x4a   : > { %3185 = shalt.err (!%p3182_p13)
}
  0x4b   : > { %s3186_s20 = scalar_lea.vmem %s3644_s23, 512  ;;  %p3194_p6 = scmp.lt.s32.totalorder %s3644_s23, %s3644_s23 }
  0x4c   : > { %p3187_p0 = scmp.ne.s32.totalorder %s3644_s23, %s3186_s20  ;;  %p3195_p8 = scmp.lt.s32.totalorder %s3186_s20, %s3186_s20 }
  0x4e   : > { %p3189_p2 = pnand %p3187_p0, %p3656_p7  ;;  %p3196_p9 = por %p3195_p8, %p3194_p6 }
  0x50   : > { %p3190_p4 = pneg %p3189_p2 }
  0x52   : > { %p3197_p10 = pnand %p3196_p9, %p3190_p4 }
  0x54   : > { %3200 = shalt.err (!%p3197_p10)
}
  0x55   : > { %2970 = dma.hbm_to_vmem [thread:$0]  (!%p3640_p5), %s4445_s3, 512, %s3644_s23, [#allocation12], %s4424_s11, %s4424_s11, %s4425_s13  }
  0x56   : > { %s3201_s29 = scalar_lea.hbm %s4409_s6, 512 }
  0x57   : > { %p3202_p11 = scmp.ne.s32.totalorder %s4409_s6, %s3201_s29  ;;  %p3208_p0 = scmp.lt.u32.totalorder %s3201_s29, %s4409_s6 }
  0x59   : > { %p3204_p12 = pnand %p3202_p11, %p3656_p7 }
  0x5b   : > { %p3205_p13 = pneg %p3204_p12 }
  0x5d   : > { %p3210_p2 = pnand %p3208_p0, %p3205_p13 }
  0x5f   : > { %3213 = shalt.err (!%p3210_p2)
}
  0x60   : > { %s3214_s20 = scalar_lea.vmem %s426_s16, 512  ;;  %p3222_p9 = scmp.lt.s32.totalorder %s426_s16, %s426_s16 }
  0x61   : > { %p3215_p4 = scmp.ne.s32.totalorder %s426_s16, %s3214_s20  ;;  %p3223_p10 = scmp.lt.s32.totalorder %s3214_s20, %s3214_s20 }
  0x63   : > { %p3217_p6 = pnand %p3215_p4, %p3656_p7  ;;  %p3224_p3 = por %p3223_p10, %p3222_p9 }
  0x65   : > { %p3218_p8 = pneg %p3217_p6 }
  0x67   : > { %p3225_p1 = pnand %p3224_p3, %p3218_p8 }
  0x69   : > { %3228 = shalt.err (!%p3225_p1)
}
  0x6a   : > { %2976 = dma.hbm_to_vmem [thread:$0]  (!%p3640_p5), %s4409_s6, 512, %s426_s16, [#allocation15], %s4424_s11, %s4424_s11, %s4425_s13  }
  0x6b   : > { %s3492_s10 = smov [#allocation10]   ;;  %s3493_s18 = smov [#allocation13]  }
  0x6c   : > { %s383_s28 = sshll.u32 %s3492_s10, 4  ;;  %s409_s29 = sshll.u32 %s3493_s18, 4  ;;  %s384_s28 = int_to_ptr.vmem [resolvable:$true] %s383_s28  ;;  %s410_s29 = int_to_ptr.vmem [resolvable:$true] %s409_s29 }
  0x6d   : > { %s4446_s2 = sld [smem:[#allocation30_spill]] }
  0x73   : > { %s3229_s24 = scalar_lea.hbm %s4446_s2, 512 }
  0x74   : > { %p3230_p1 = scmp.ne.s32.totalorder %s4446_s2, %s3229_s24  ;;  %p3236_p12 = scmp.lt.u32.totalorder %s3229_s24, %s4446_s2 }
  0x76   : > { %p3232_p3 = pnand %p3230_p1, %p3656_p7 }
  0x78   : > { %p3233_p11 = pneg %p3232_p3 }
  0x7a   : > { %p3238_p13 = pnand %p3236_p12, %p3233_p11 }
  0x7c   : > { %3241 = shalt.err (!%p3238_p13)
}
  0x7d   : > { %s3242_s16 = scalar_lea.vmem %s384_s28, 512  ;;  %p3250_p6 = scmp.lt.s32.totalorder %s384_s28, %s384_s28 }
  0x7e   : > { %p3243_p0 = scmp.ne.s32.totalorder %s384_s28, %s3242_s16  ;;  %p3251_p8 = scmp.lt.s32.totalorder %s3242_s16, %s3242_s16 }
  0x80   : > { %p3245_p2 = pnand %p3243_p0, %p3656_p7  ;;  %p3252_p9 = por %p3251_p8, %p3250_p6 }
  0x82   : > { %p3246_p4 = pneg %p3245_p2 }
  0x84   : > { %p3253_p10 = pnand %p3252_p9, %p3246_p4 }
  0x86   : > { %3256 = shalt.err (!%p3253_p10)
}
  0x87   : > { %2967 = dma.hbm_to_vmem [thread:$0]  (!%p3640_p5), %s4446_s2, 512, %s384_s28, [#allocation9], %s4424_s11, %s4424_s11, %s4425_s13  }
  0x88   : > { %s4447_s4 = sld [smem:[#allocation32_spill]] }
  0x8e   : > { %s3257_s19 = scalar_lea.hbm %s4447_s4, 512 }
  0x8f   : > { %p3258_p1 = scmp.ne.s32.totalorder %s4447_s4, %s3257_s19  ;;  %p3264_p12 = scmp.lt.u32.totalorder %s3257_s19, %s4447_s4 }
  0x91   : > { %p3260_p3 = pnand %p3258_p1, %p3656_p7 }
  0x93   : > { %p3261_p11 = pneg %p3260_p3 }
  0x95   : > { %p3266_p13 = pnand %p3264_p12, %p3261_p11 }
  0x97   : > { %3269 = shalt.err (!%p3266_p13)
}
  0x98   : > { %s3270_s23 = scalar_lea.vmem %s410_s29, 512  ;;  %p3278_p6 = scmp.lt.s32.totalorder %s410_s29, %s410_s29 }
  0x99   : > { %p3271_p0 = scmp.ne.s32.totalorder %s410_s29, %s3270_s23  ;;  %p3279_p8 = scmp.lt.s32.totalorder %s3270_s23, %s3270_s23 }
  0x9b   : > { %p3273_p2 = pnand %p3271_p0, %p3656_p7  ;;  %p3280_p9 = por %p3279_p8, %p3278_p6 }
  0x9d   : > { %p3274_p4 = pneg %p3273_p2 }
  0x9f   : > { %p3281_p10 = pnand %p3280_p9, %p3274_p4 }
  0xa1   : > { %3284 = shalt.err (!%p3281_p10)
}
  0xa2   : > { %2973 = dma.hbm_to_vmem [thread:$0]  (!%p3640_p5), %s4447_s4, 512, %s410_s29, [#allocation12], %s4424_s11, %s4424_s11, %s4425_s13  }
  0xa3   : > { %s3494_s1 = smov [#allocation16]   ;;  %s3495_s10 = smov [#allocation17]  }
  0xa4   : > { %s441_s5 = sshll.u32 %s3494_s1, 4  ;;  %s463_s18 = sshll.u32 %s3495_s10, 4  ;;  %s442_s5 = int_to_ptr.vmem [resolvable:$true] %s441_s5  ;;  %s464_s18 = int_to_ptr.vmem [resolvable:$true] %s463_s18 }
  0xa5   : > { %s3285_s24 = scalar_lea.hbm %s4411_s8, 512 }
  0xa6   : > { %p3286_p1 = scmp.ne.s32.totalorder %s4411_s8, %s3285_s24  ;;  %p3292_p12 = scmp.lt.u32.totalorder %s3285_s24, %s4411_s8 }
  0xa8   : > { %p3288_p3 = pnand %p3286_p1, %p3656_p7 }
  0xaa   : > { %p3289_p11 = pneg %p3288_p3 }
  0xac   : > { %p3294_p13 = pnand %p3292_p12, %p3289_p11 }
  0xae   : > { %3297 = shalt.err (!%p3294_p13)
}
  0xaf   : > { %s3298_s29 = scalar_lea.vmem %s442_s5, 512  ;;  %p3306_p6 = scmp.lt.s32.totalorder %s442_s5, %s442_s5 }
  0xb0   : > { %p3299_p0 = scmp.ne.s32.totalorder %s442_s5, %s3298_s29  ;;  %p3307_p8 = scmp.lt.s32.totalorder %s3298_s29, %s3298_s29 }
  0xb2   : > { %p3301_p2 = pnand %p3299_p0, %p3656_p7  ;;  %p3308_p9 = por %p3307_p8, %p3306_p6 }
  0xb4   : > { %p3302_p4 = pneg %p3301_p2 }
  0xb6   : > { %p3309_p10 = pnand %p3308_p9, %p3302_p4 }
  0xb8   : > { %3312 = shalt.err (!%p3309_p10)
}
  0xb9   : > { %2979 = dma.hbm_to_vmem [thread:$0]  (!%p3640_p5), %s4411_s8, 512, %s442_s5, [#allocation15], %s4424_s11, %s4424_s11, %s4425_s13  }
  0xba   : > { %s3313_s22 = scalar_lea.hbm %s4415_s12, 512 }
  0xbb   : > { %p3314_p1 = scmp.ne.s32.totalorder %s4415_s12, %s3313_s22  ;;  %p3320_p12 = scmp.lt.u32.totalorder %s3313_s22, %s4415_s12 }
  0xbd   : > { %p3316_p3 = pnand %p3314_p1, %p3656_p7 }
  0xbf   : > { %p3317_p11 = pneg %p3316_p3 }
  0xc1   : > { %p3322_p13 = pnand %p3320_p12, %p3317_p11 }
  0xc3   : > { %3325 = shalt.err (!%p3322_p13)
}
  0xc4   : > { %s3326_s28 = scalar_lea.vmem %s464_s18, 512  ;;  %p3334_p6 = scmp.lt.s32.totalorder %s464_s18, %s464_s18 }
  0xc5   : > { %p3327_p0 = scmp.ne.s32.totalorder %s464_s18, %s3326_s28  ;;  %p3335_p8 = scmp.lt.s32.totalorder %s3326_s28, %s3326_s28 }
  0xc7   : > { %p3329_p2 = pnand %p3327_p0, %p3656_p7  ;;  %p3336_p9 = por %p3335_p8, %p3334_p6 }
  0xc9   : > { %p3330_p4 = pneg %p3329_p2 }
  0xcb   : > { %p3337_p10 = pnand %p3336_p9, %p3330_p4 }
  0xcd   : > { %3340 = shalt.err (!%p3337_p10)
}
  0xce   : > { %2982 = dma.hbm_to_vmem [thread:$0]  (!%p3640_p5), %s4415_s12, 512, %s464_s18, [#allocation18], %s4424_s11, %s4424_s11, %s4425_s13  }
  0xcf   : > { %s2573_s7 = sadd.s32 4294967294, %s3485_s15   ;;  %s42_s21 = sadd.s32 1, %s3477_s30 }
  0xd0   : > { %s45_s16 = sadd.s32 1, %s3481_s14  ;;  %p43_p7 = scmp.ge.s32.totalorder %s42_s21, 4 }
  0xd1   : > { %s54_s1 = sadd.s32 1, %s3465_s27  ;;  %p61_p1 = scmp.ne.s32.totalorder %s3465_s27, %s3461_s26 }
  0xd2   : > { %p62_p3 = scmp.eq.s32.totalorder %s3485_s15, 0  ;;  %s4479_s21 = smov (%p43_p7, %s42_s21), 0 }
  0xd3   : > { %s4481_s16 = smov (!%p43_p7, %s45_s16), %s3481_s14  ;;  %s50_s10 = ssub.s32 %s3477_s30, %s4479_s21 }
  0xd4   : > { %p3824_p11 = por %p62_p3, %p61_p1  ;;  %p47_p5 = scmp.ge.s32.totalorder %s4481_s16, 2 }
  0xd5   : > { %p67_p12 = scmp.ne.s32.totalorder %s3461_s26, %s3457_s25  ;;  %s4449_s18 = sadd.s32 4294967295, %s3485_s15  }
  0xd6   : > { %p345_p13 = scmp.eq.s32.totalorder %s4449_s18, 7  ;;  %p351_p0 = scmp.eq.s32.totalorder %s2573_s7, 7 }
  0xd7   : > { %s4483_s16 = smov (%p47_p5, %s4481_s16), 0  ;;  %p4450_p2 = scmp.ne.s32.totalorder %s4439_s17, 0 }
  0xd8   : > { %p3840_p6 = por %p345_p13, %p61_p1  ;;  %s49_s9 = ssub.s32 %s3481_s14, %s4483_s16 }
  0xd9   : > { %p3836_p4 = por %p4450_p2, %p67_p12  ;;  %p3846_p8 = por %p351_p0, %p67_p12 }
  0xda   : > { %s4452_s24 = scalar_select %p3840_p6, 1, 0 }
  0xdb   : > { %s4453_s20 = scalar_select %p3846_p8, 1, 0 }
  0xdc   : > { %s51_s23 = sor.u32 %s50_s10, %s49_s9  ;;  %p2998_p9 = scmp.lt.s32.totalorder %s3485_s15, 8 }
  0xdd   : > { %p52_p10 = scmp.eq.s32.totalorder %s51_s23, 0  ;;  %s477_s28 = sand.u32 1, %s3465_s27  }
  0xde   : > { %s2583_s5 = sshll.u32 %s477_s28, 3  ;;  %s2584_s7 = sshll.u32 %s3477_s30, 1 }
  0xdf   : > { %s3853_s29 = scalar_select %p52_p10, %s3465_s27, %s54_s1  }
  0xe0   : > { %s2585_s18 = sshll.u32 %s3481_s14, 3  ;;  %s481_s11 = scalar_lea.vmem [#allocation5], %s2583_s5 }
  0xe1   : > { %s490_s13 = sshll.u32 %s481_s11, 4  ;;  %s487_s2 = sadd.s32 %s2585_s18, %s2584_s7  ;;  %s3857_s13 = int_to_ptr.vmem [resolvable:$true] %s490_s13 }
  0xe2   : > { %s2586_s3 = sshll.u32 %s487_s2, 6  ;;  %p3861_p7 = pnand %p2998_p9, %p3824_p11 }
  0xe3   : > { %s3868_s1 = scalar_lea.hbm %s4403_s0, %s2586_s3  ;;  %s3870_s11 = scalar_lea.sflag [#allocation6], %s477_s28 }
  0xe4   : > { %s3341_s23 = scalar_lea.hbm %s3868_s1, 128  ;;  %p3343_p3 = pneg %p3861_p7 }
  0xe5   : > { %p3342_p1 = scmp.ne.s32.totalorder %s3868_s1, %s3341_s23  ;;  %s3346_s5 = scalar_lea.hbm %s4403_s0, 1024 }
  0xe6   : > { %p3347_p12 = scmp.lt.u32.totalorder %s3868_s1, %s4403_s0  ;;  %p3348_p13 = scmp.lt.u32.totalorder %s3346_s5, %s3341_s23 }
  0xe7   : > { %p3344_p11 = pnand %p3343_p3, %p3342_p1  ;;  %p3350_p2 = scmp.lt.u32.totalorder %s3341_s23, %s3868_s1 }
  0xe8   : > { %p3349_p0 = por %p3348_p13, %p3347_p12 }
  0xe9   : > { %p3345_p5 = pneg %p3344_p11 }
  0xea   : > { %p3351_p9 = por %p3350_p2, %p3349_p0 }
  0xec   : > { %p3352_p10 = pnand %p3351_p9, %p3345_p5 }
  0xee   : > { %3355 = shalt.err (!%p3352_p10)
}
  0xef   : > { %s3356_s28 = scalar_lea.vmem %s3857_s13, 128  ;;  %s3496_s18 = smov [#allocation5]  }
  0xf0   : > { %p3357_p1 = scmp.ne.s32.totalorder %s3857_s13, %s3356_s28  ;;  %s3361_s10 = sshll.u32 %s3496_s18, 4  ;;  %s3362_s10 = int_to_ptr.vmem [resolvable:$false] %s3361_s10 }
  0xf1   : > { %s3363_s9 = scalar_lea.vmem %s3362_s10, 256  ;;  %p3364_p6 = scmp.lt.s32.totalorder %s3857_s13, %s3362_s10 }
  0xf2   : > { %p3359_p11 = pnand %p3357_p1, %p3343_p3  ;;  %p3365_p12 = scmp.lt.s32.totalorder %s3363_s9, %s3356_s28 }
  0xf4   : > { %p3360_p8 = pneg %p3359_p11  ;;  %p3366_p13 = por %p3365_p12, %p3364_p6 }
  0xf6   : > { %p3367_p0 = pnand %p3366_p13, %p3360_p8 }
  0xf8   : > { %3370 = shalt.err (!%p3367_p0)
}
  0xf9   : > { %s4455_s23 = smov 4   ;;  %s4456_s2 = smov 64  }
  0xfa   : > { %2986 = dma.hbm_to_vmem [thread:$0]  (!%p3861_p7), %s3868_s1, 128, %s3857_s13, %s3870_s11, %s4456_s2, %s4456_s2, %s4455_s23  }
  0xfb   : > { %s4457_s19 = sld [smem:[#allocation28_spill]] }
 0x101   : > { %p4458_p3 = scmp.ne.s32.totalorder %s4457_s19, 0 }
 0x102   : > { %s3904_s5 = sand.u32 (!%p4458_p3), 1, %s3461_s26  }
 0x103   : > { %502 = sbr.rel (%p4458_p3) target bundleno = 1849 (0x739), region = 72  ;;  %s2588_s3 = sshll.u32 (!%p4458_p3), %s3904_s5, 3 }
 0x104   : > { %s505_s7 = scalar_lea.sflag (!%p4458_p3), [#allocation6], %s3904_s5  ;;  %s3908_s28 = scalar_lea.vmem (!%p4458_p3), [#allocation5], %s2588_s3 }
 0x10a   : > { %3432 = dma.done.wait (%p3836_p4), %s505_s7, 128  }
 0x10b   : > { %3434 = vsyncadd (%p3836_p4), %s505_s7, 4294967168  ;;  %p4459_p6 = scmp.ne.s32.totalorder %s4439_s17, 0 }
 0x10d   : > { %3436 = dma.done.wait (%p4459_p6), [#allocation9], 1024  }
 0x10e   : > { %3438 = vsyncadd (%p4459_p6), [#allocation9], 4294966272 }
 0x10f   : > { %3440 = dma.done.wait (%p4459_p6), [#allocation12], 1024  }
 0x110   : > { %3442 = vsyncadd (%p4459_p6), [#allocation12], 4294966272 }
 0x111   : > { %3444 = dma.done.wait (%p4459_p6), [#allocation15], 1024  }
 0x112   : > { %3446 = vsyncadd (%p4459_p6), [#allocation15], 4294966272 }
 0x113   : > { %3448 = dma.done.wait (%p4459_p6), [#allocation18], 512  }
 0x114   : > { %3450 = vsyncadd (%p4459_p6), [#allocation18], 4294966784  ;;  %s2596_s4 = sshll.u32 %s3904_s5, 4  ;;  %s4460_s22 = sld [smem:[#allocation26_spill]] }
 0x115   : > { %s3931_s13 = scalar_lea.vmem [#allocation19], %s2596_s4 }
 0x11a   : > { %p2597_p4 = scmp.ne.s32.totalorder %s4460_s22, 0 }
 0x11b   : > { %vm587_vm0 = vcmask (!%p2597_p4), 130048   ;;  %vm596_vm1 = vcmask (!%p2597_p4), 122880   ;;  %v3497_v0 = vmov (!%p2597_p4), 0.0  }
 0x11c   : > { %586 = sbr.rel (%p2597_p4) target bundleno = 291 (0x123), region = 108  ;;  %588 = vst.msk [vmem:[#allocation2] sm:$0xff] (!%p2597_p4), %vm587_vm0, %v3497_v0  ;;  %589 = vst.msk [vmem:[#allocation2 + $0x8] sm:$0xff] (!%p2597_p4), %vm587_vm0, %v3497_v0 }
 0x11d   : > { %590 = vst.msk [vmem:[#allocation2 + $0x10] sm:$0xff] (!%p2597_p4), %vm587_vm0, %v3497_v0  ;;  %591 = vst.msk [vmem:[#allocation2 + $0x18] sm:$0xff] (!%p2597_p4), %vm587_vm0, %v3497_v0 }
 0x11e   : > { %592 = vst.msk [vmem:[#allocation2 + $0x20] sm:$0xff] (!%p2597_p4), %vm587_vm0, %v3497_v0  ;;  %593 = vst.msk [vmem:[#allocation2 + $0x28] sm:$0xff] (!%p2597_p4), %vm587_vm0, %v3497_v0 }
 0x11f   : > { %594 = vst.msk [vmem:[#allocation2 + $0x30] sm:$0xff] (!%p2597_p4), %vm587_vm0, %v3497_v0  ;;  %595 = vst.msk [vmem:[#allocation2 + $0x38] sm:$0xff] (!%p2597_p4), %vm587_vm0, %v3497_v0 }
 0x120   : > { %597 = vst.msk [vmem:[#allocation3] sm:$0x1] (!%p2597_p4), %vm596_vm1, %v3497_v0  ;;  %598 = vst.msk [vmem:[#allocation3 + $0x1] sm:$0x1] (!%p2597_p4), %vm596_vm1, %v3497_v0 }
 0x121   : > { %599 = vst.msk [vmem:[#allocation3 + $0x2] sm:$0x1] (!%p2597_p4), %vm596_vm1, %v3497_v0  ;;  %600 = vst.msk [vmem:[#allocation3 + $0x3] sm:$0x1] (!%p2597_p4), %vm596_vm1, %v3497_v0 }
 0x123 PF: > { %v3096_v1 = vld [vmem:[#allocation8] sm:$0xff]   ;;  %v3498_v2 = vmov 0.0   ;;  %v3097_v3 = vld [vmem:[#allocation8 + $0x8] sm:$0xff]   ;;  %vm3499_vm2 = vmmov 0   ;;  %v3098_v5 = vld [vmem:[#allocation8 + $0x10] sm:$0xff]   ;;  %vm640_vm3 = vcmask 523264  }
 0x124   : > { %2737 = vmatprep.subr.bf16.mxu0 %v3498_v2  ;;  %2749 = vmatprep.subr.bf16.mxu1 %v3498_v2  ;;  %v3100_v4 = vld [vmem:[#allocation10] sm:$0xff]   ;;  %v3102_v6 = vld [vmem:[#allocation10 + $0x8] sm:$0xff]   ;;  %v3099_v7 = vld [vmem:[#allocation8 + $0x18] sm:$0xff]   ;;  %s4461_s11 = sld [smem:[#allocation36_spill]]  ;;  %s4463_s17 = sld [smem:[#allocation34_spill]]  ;;  %vm1631_vm4 = vcmask 261248  }
 0x125   : > { %2738 = vmatpush3.bf16.msra.mxu0 %v3096_v1  ;;  %2745 = vmatprep.mubr.msk.bf16.mxu0 %vm3499_vm2, %v3498_v2  ;;  %v3103_v8 = vld [vmem:[#allocation10 + $0x10] sm:$0xff]   ;;  %v3104_v10 = vld [vmem:[#allocation10 + $0x18] sm:$0xff]   ;;  %v3105_v11 = vld [vmem:[#allocation11] sm:$0xff]   ;;  %s4464_s10 = sld [smem:[#allocation35_spill]]  ;;  %s4465_s2 = sld [smem:[#allocation37_spill]]  ;;  %vm1927_vm5 = vcmask 392448  }
 0x126   : > { %2739 = vmatprep.subr.bf16.mxu0 %v3498_v2  ;;  %2757 = vmatprep.mubr.msk.bf16.mxu1 %vm3499_vm2, %v3498_v2  ;;  %v3101_v9 = vld [vmem:[%s3908_s28] sm:$0xff]   ;;  %v3106_v12 = vld [vmem:[#allocation11 + $0x8] sm:$0xff]   ;;  %v3109_v13 = vld [vmem:[#allocation13] sm:$0xff]   ;;  %s4462_s28 = sld [smem:[#allocation33_spill]]  ;;  %vm1172_vm6 = vcmask 130048   ;;  %vm2223_vm7 = vcmask 523648  }
 0x127   : > { %2750 = vmatpush3.bf16.msra.mxu1 %v3100_v4  ;;  %v3107_v14 = vld [vmem:[#allocation11 + $0x10] sm:$0xff]   ;;  %v3111_v15 = vld [vmem:[#allocation13 + $0x8] sm:$0xff]   ;;  %v3108_v16 = vld [vmem:[#allocation11 + $0x18] sm:$0xff]   ;;  %s3500_s19 = smov 96   ;;  %s3501_s3 = smov 112   ;;  %vm1427_vm8 = vcmask 122880  }
 0x128   : > { %2751 = vmatprep.subr.bf16.mxu1 %v3498_v2  ;;  %v3113_v17 = vld [vmem:[#allocation13 + $0x10] sm:$0xff]   ;;  %v3110_v18 = vld [vmem:[#allocation14] sm:$0xff]   ;;  %v3112_v19 = vld [vmem:[#allocation14 + $0x8] sm:$0xff]   ;;  %s3502_s7 = smov 80   ;;  %s3504_s4 = smov 48  }
 0x129   : > { %2740 = vmatpush3.bf16.msra.mxu0 %v3097_v3  ;;  %v3114_v20 = vld [vmem:[#allocation14 + $0x10] sm:$0xff]   ;;  %v3115_v21 = vld [vmem:[#allocation13 + $0x18] sm:$0xff]   ;;  %v3117_v26 = vld [vmem:[#allocation16] sm:$0xff]   ;;  %s3505_s22 = smov 32   ;;  %s4467_s1 = sld [smem:[#allocation27_spill]] }
 0x12a   : > { %2741 = vmatprep.subr.bf16.mxu0 %v3498_v2  ;;  %v3116_v22 = vld [vmem:[#allocation14 + $0x18] sm:$0xff]   ;;  %v3118_v27 = vld [vmem:[%s4461_s11] sm:$0xff]   ;;  %v3120_v33 = vld [vmem:[%s4461_s11 + $0x8] sm:$0xff]   ;;  %p4469_p7 = scmp.ne.s32.totalorder %s4452_s24, 0 }
 0x12b   : > { %2752 = vmatpush3.bf16.msra.mxu1 %v3102_v6  ;;  %v3119_v32 = vld [vmem:[#allocation16 + $0x8] sm:$0xff]   ;;  %v3121_v37 = vld [vmem:[#allocation16 + $0x10] sm:$0xff]   ;;  %v3123_v39 = vld [vmem:[#allocation16 + $0x18] sm:$0xff]  }
 0x12c   : > { %2753 = vmatprep.subr.bf16.mxu1 %v3498_v2  ;;  %v3122_v38 = vld [vmem:[%s4461_s11 + $0x10] sm:$0xff]   ;;  %v3124_v40 = vld [vmem:[%s4461_s11 + $0x18] sm:$0xff]   ;;  %v2614_v46 = vld [vmem:[%s4462_s28] ss:$0 sm:$0xff]  ;;  %s3503_s28 = smov 16  }
 0x12d   : > { %2742 = vmatpush3.bf16.msra.mxu0 %v3098_v5  ;;  %v2620_v47 = vld [vmem:[%s4463_s17] ss:$0 sm:$0xff]  ;;  %s4466_s17 = sld [smem:[#allocation26_spill]] }
 0x12e   : > { %2743 = vmatprep.subr.bf16.mxu0 %v3498_v2  ;;  %v2626_v62 = vld [vmem:[%s4464_s10] ss:$0 sm:$0xff] }
 0x12f   : > { %2754 = vmatpush3.bf16.msra.mxu1 %v3103_v8  ;;  %v2632_v63 = vld [vmem:[%s4465_s2] ss:$0 sm:$0xff]  ;;  %s2661_s10 = sshll.u32 %s4467_s1, 3  ;;  %s2415_s2 = sshll.u32 %s3931_s13, 4  ;;  %s4345_s2 = int_to_ptr.vmem [resolvable:$true] %s2415_s2 }
 0x130   : > { %2755 = vmatprep.subr.bf16.mxu1 %v3498_v2 }
 0x131   : > { %2744 = vmatpush3.bf16.msra.mxu0 %v3099_v7 }
 0x132   : > { %2761 = vmatprep.subr.bf16.mxu0 %v3498_v2 }
 0x133   : > { %2756 = vmatpush3.bf16.msra.mxu1 %v3104_v10  ;;  %s2660_s18 = sshll.u32 %s4466_s17, 1  ;;  %s3508_s17 = smov [#allocation19]  }
 0x134   : > { %2746 = vmatmul.mubr.msk.bf16.vlgmr.msra.gmra.mrb[0].mxu0 %vm640_vm3, %v3101_v9  ;;  %2773 = vmatprep.subr.bf16.mxu1 %v3498_v2  ;;  %s2412_s9 = sadd.s32 %s2661_s10, %s2660_s18  ;;  %s3375_s1 = sshll.u32 %s3508_s17, 4  ;;  %s3376_s1 = int_to_ptr.vmem [resolvable:$false] %s3375_s1 }
 0x135   : > { %2762 = vmatpush3.bf16.msra.mxu0 %v3105_v11  ;;  %2769 = vmatprep.mubr.msk.bf16.mxu0 %vm3499_vm2, %v3498_v2  ;;  %s2662_s23 = sshll.u32 %s2412_s9, 7  ;;  %s3377_s18 = scalar_lea.vmem %s3376_s1, 512 }
 0x136   : > { %2763 = vmatprep.subr.bf16.mxu0 %v3498_v2  ;;  %2758 = vmatmul.mubr.msk.bf16.vlgmr.msra.gmra.mrb[0].mxu1 %vm640_vm3, %v3101_v9  ;;  %p3378_p9 = scmp.lt.s32.totalorder %s4345_s2, %s3376_s1 }
 0x137   : > { %2774 = vmatpush3.bf16.msra.mxu1 %v3109_v13  ;;  %2781 = vmatprep.mubr.msk.bf16.mxu1 %vm3499_vm2, %v3498_v2 }
 0x138   : > { %2775 = vmatprep.subr.bf16.mxu1 %v3498_v2 }
 0x139   : > { %2764 = vmatpush3.bf16.msra.mxu0 %v3106_v12 }
 0x13a   : > { %2765 = vmatprep.subr.bf16.mxu0 %v3498_v2 }
 0x13b   : > { %2776 = vmatpush3.bf16.msra.mxu1 %v3111_v15 }
 0x13c   : > { %2777 = vmatprep.subr.bf16.mxu1 %v3498_v2 }
 0x13d   : > { %2766 = vmatpush3.bf16.msra.mxu0 %v3107_v14 }
 0x13e   : > { %2767 = vmatprep.subr.bf16.mxu0 %v3498_v2 }
 0x13f   : > { %2778 = vmatpush3.bf16.msra.mxu1 %v3113_v17 }
 0x140   : > { %2779 = vmatprep.subr.bf16.mxu1 %v3498_v2 }
 0x141   : > { %2768 = vmatpush3.bf16.msra.mxu0 %v3108_v16 }
 0x142   : > { %2785 = vmatprep.subr.bf16.mxu0 %v3498_v2 }
 0x143   : > { %2780 = vmatpush3.bf16.msra.mxu1 %v3115_v21 }
 0x144   : > { %2770 = vmatmul.mubr.msk.bf16.vlgmr.msra.gmra.mrb[4].mxu0 %vm640_vm3, %v3101_v9  ;;  %2797 = vmatprep.subr.bf16.mxu1 %v3498_v2 }
 0x145   : > { %2786 = vmatpush3.bf16.msra.mxu0 %v3110_v18  ;;  %2793 = vmatprep.mubr.msk.bf16.mxu0 %vm3499_vm2, %v3498_v2 }
 0x146   : > { %2787 = vmatprep.subr.bf16.mxu0 %v3498_v2 }
 0x149   : > { %2788 = vmatpush3.bf16.msra.mxu0 %v3112_v19 }
 0x14a   : > { %2789 = vmatprep.subr.bf16.mxu0 %v3498_v2 }
 0x14d   : > { %2790 = vmatpush3.bf16.msra.mxu0 %v3114_v20 }
 0x14e   : > { %2791 = vmatprep.subr.bf16.mxu0 %v3498_v2 }
 0x151   : > { %2792 = vmatpush3.bf16.msra.mxu0 %v3116_v22 }
 0x152   : > { %2809 = vmatprep.subr.bf16.mxu0 %v3498_v2 }
 0x207   : > { %v678_v23 = vpop.f32.mrb[0].mxu0 }
 0x208   : > { %v2747_v24 = vpop.f32.mrb[1].mxu0 }
 0x209   : > { %v681_v25 = vpop.f32.mrb[2].mxu0  ;;  %v751_v30 = vpop.f32.mrb[0].mxu1 }
 0x20a   : > { %v831_v28 = vpack.c.bf16 %v681_v25, %v678_v23  ;;  %v2748_v29 = vpop.f32.mrb[3].mxu0  ;;  %v2759_v31 = vpop.f32.mrb[1].mxu1 }
 0x20b   : > { %v754_v34 = vpop.f32.mrb[2].mxu1 }
 0x20c   : > { %2782 = vmatmul.mubr.msk.bf16.vlgmr.msra.gmra.mrb[4].mxu1 %vm640_vm3, %v831_v28  ;;  %2794 = vmatmul.mubr.msk.bf16.vlgmr.msra.gmra.mrb[8].mxu0 %vm640_vm3, %v831_v28  ;;  %v997_v35 = vpack.c.bf16 %v754_v34, %v751_v30  ;;  %v2760_v36 = vpop.f32.mrb[3].mxu1 }
 0x20d   : > { %2798 = vmatpush3.bf16.msra.mxu1 %v3117_v26  ;;  %2810 = vmatpush3.bf16.msra.mxu0 %v3118_v27 }
 0x20e   : > { %2799 = vmatprep.subr.bf16.mxu1 %v3498_v2  ;;  %2811 = vmatprep.subr.bf16.mxu0 %v3498_v2 }
 0x20f   : > { %2805 = vmatprep.mubr.msk.bf16.mxu1 %vm3499_vm2, %v3498_v2  ;;  %2817 = vmatprep.mubr.msk.bf16.mxu0 %vm3499_vm2, %v3498_v2 }
 0x211   : > { %2800 = vmatpush3.bf16.msra.mxu1 %v3119_v32  ;;  %2812 = vmatpush3.bf16.msra.mxu0 %v3120_v33 }
 0x212   : > { %2801 = vmatprep.subr.bf16.mxu1 %v3498_v2  ;;  %2813 = vmatprep.subr.bf16.mxu0 %v3498_v2 }
 0x215   : > { %2802 = vmatpush3.bf16.msra.mxu1 %v3121_v37  ;;  %2814 = vmatpush3.bf16.msra.mxu0 %v3122_v38  ;;  %v4058_v37 = vld [vmem:[#allocation3] sm:$0x1] }
 0x216   : > { %2803 = vmatprep.subr.bf16.mxu1 %v3498_v2  ;;  %2815 = vmatprep.subr.bf16.mxu0 %v3498_v2 }
 0x217   : > { %v824_v41 = vpop.f32.mrb[4].mxu0 }
 0x218   : > { %v2771_v42 = vpop.f32.mrb[5].mxu0 }
 0x219   : > { %2804 = vmatpush3.bf16.msra.mxu1 %v3123_v39  ;;  %2816 = vmatpush3.bf16.msra.mxu0 %v3124_v40  ;;  %v827_v43 = vpop.f32.mrb[6].mxu0  ;;  %v1163_v39 = vlaneseq }
 0x21a   : > { %v3994_v44 = vpack.c.bf16 %v827_v43, %v824_v41  ;;  %v2772_v45 = vpop.f32.mrb[7].mxu0  ;;  %2821 = vmatprep.subr.bf16.mxu1 %v3498_v2  ;;  %2845 = vmatprep.subr.bf16.mxu0 %v3498_v2  ;;  %v4067_v41 = vld [vmem:[#allocation3 + $0x1] sm:$0x1] }
 0x21b   : > { %v4065_v40 = vshrl.u32 %v1163_v39, 7  ;;  %v4076_v45 = vld [vmem:[#allocation3 + $0x3] sm:$0x1] }
 0x21c   : > { %2806 = vmatmul.mubr.msk.bf16.vlgmr.msra.gmra.mrb[8].mxu1 %vm640_vm3, %v997_v35  ;;  %2818 = vmatmul.mubr.msk.bf16.vlgmr.msra.gmra.mrb[12].mxu0 %vm640_vm3, %v997_v35  ;;  %v1225_v34 = vsel %vm1172_vm6, %v3994_v44, 1065369472 }
 0x21d   : > { %2823 = vmatprep.mubr.msk.bf16.mxu1 %vm3499_vm2, %v3498_v2  ;;  %2847 = vmatprep.mubr.msk.bf16.mxu0 %vm3499_vm2, %v3498_v2  ;;  %v4070_v42 = vsub.s32 0, %v4065_v40 }
 0x21f   : > { %v1588_v43 = vrot.slane %v4067_v41, %v4070_v42 }
 0x2df   : > { %v917_v48 = vpop.f32.mrb[4].mxu1  ;;  %v988_v49 = vpop.f32.mrb[8].mxu0 }
 0x2e0   : > { %v918_v50 = vadd.f32 %v2614_v46, %v917_v48  ;;  %v989_v51 = vadd.f32 %v2620_v47, %v988_v49  ;;  %v2783_v52 = vpop.f32.mrb[5].mxu1  ;;  %v2795_v53 = vpop.f32.mrb[9].mxu0  ;;  %v4084_v49 = vld [vmem:[#allocation2 + $0x10] sm:$0xff] }
 0x2e1   : > { %v920_v54 = vpop.f32.mrb[6].mxu1  ;;  %v991_v55 = vpop.f32.mrb[10].mxu0  ;;  %v4090_v53 = vld [vmem:[#allocation3 + $0x2] sm:$0x1] }
 0x2e2   : > { %v4010_v56 = vmul.f32 %v989_v51, %v918_v50  ;;  %v921_v57 = vadd.f32 %v2614_v46, %v920_v54  ;;  %v992_v58 = vadd.f32 %v2620_v47, %v991_v55  ;;  %v2784_v59 = vpop.f32.mrb[7].mxu1  ;;  %v2796_v60 = vpop.f32.mrb[11].mxu0  ;;  %v2180_v46 = vrot.slane %v4076_v45, %v4070_v42  ;;  %v4086_v50 = vld [vmem:[#allocation2 + $0x18] sm:$0xff] }
 0x2e3   : > { %v1540_v52 = vpack.c.bf16 %v4086_v50, %v4084_v49  ;;  %v1884_v55 = vrot.slane %v4090_v53, %v4070_v42  ;;  %v4106_v59 = vld [vmem:[#allocation2 + $0x28] sm:$0xff] }
 0x2e4   : > { %v4012_v61 = vmul.f32 %v992_v58, %v921_v57  ;;  %v4104_v58 = vld [vmem:[#allocation2 + $0x20] sm:$0xff] }
 0x2e5   : > { %v1836_v60 = vpack.c.bf16 %v4106_v59, %v4104_v58 }
 0x2e6   : > { %v4039_v30 = vpack.c.bf16 %v4012_v61, %v4010_v56 }
 0x2ef   : > { %v1083_v0 = vpop.f32.mrb[8].mxu1  ;;  %v1154_v1 = vpop.f32.mrb[12].mxu0 }
 0x2f0   : > { %v1084_v3 = vadd.f32 %v2626_v62, %v1083_v0  ;;  %v1155_v4 = vadd.f32 %v2632_v63, %v1154_v1  ;;  %v2807_v5 = vpop.f32.mrb[9].mxu1  ;;  %v2819_v6 = vpop.f32.mrb[13].mxu0 }
 0x2f1   : > { %v1086_v7 = vpop.f32.mrb[10].mxu1  ;;  %v1157_v8 = vpop.f32.mrb[14].mxu0 }
 0x2f2   : > { %v1161_v9 = vmul.f32 %v1155_v4, %v1084_v3  ;;  %v1087_v10 = vadd.f32 %v2626_v62, %v1086_v7  ;;  %v1158_v11 = vadd.f32 %v2632_v63, %v1157_v8  ;;  %v2808_v12 = vpop.f32.mrb[11].mxu1  ;;  %v2820_v13 = vpop.f32.mrb[15].mxu0  ;;  %v4122_v3 = vld [vmem:[#allocation2 + $0x30] sm:$0xff]  ;;  %v4124_v4 = vld [vmem:[#allocation2 + $0x38] sm:$0xff] }
 0x2f3   : > { %v2132_v5 = vpack.c.bf16 %v4124_v4, %v4122_v3  ;;  %v4145_v12 = vadd.s32 8, %v4065_v40 }
 0x2f4   : > { %v1162_v14 = vmul.f32 %v1158_v11, %v1087_v10  ;;  %v1417_v15 = vsel %vm1172_vm6, %v1161_v9, 0.0  ;;  %v1699_v16 = vsel %vm1631_vm4, %v1161_v9, 0.0  ;;  %v1995_v17 = vsel %vm1927_vm5, %v1161_v9, 0.0 }
 0x2f5   : > { %v2291_v26 = vsel %vm2223_vm7, %v1161_v9, 0.0  ;;  %v4142_v11 = vand.u32 127, %v1163_v39 }
 0x2f6   : > { %v1418_v18 = vsel %vm1172_vm6, %v1162_v14, 0.0  ;;  %v1171_v19 = vpack.c.bf16 %v1162_v14, %v1161_v9  ;;  %v1700_v20 = vsel %vm1631_vm4, %v1162_v14, 0.0  ;;  %v1996_v21 = vsel %vm1927_vm5, %v1162_v14, 0.0 }
 0x2f7   : > { %v1419_v22 = vadd.f32 %v1418_v18, %v1417_v15  ;;  %v4026_v23 = vadd.f32 %v1700_v20, %v1699_v16  ;;  %v4028_v24 = vadd.f32 %v1996_v21, %v1995_v17  ;;  %v2292_v27 = vsel %vm2223_vm7, %v1162_v14, 0.0  ;;  %v4151_v15 = vld [vmem:[#allocation2] sm:$0xff]  ;;  %v4153_v16 = vld [vmem:[#allocation2 + $0x8] sm:$0xff] }
 0x2f8   : > { %1730 = vrot.lane.b32.xlu1 %v1171_v19, %s3500_s19  ;;  %1433 = vrot.lane.b32.xlu0 %v1171_v19, %s3501_s3  ;;  %v1177_v25 = vsel %vm1172_vm6, %v1171_v19, 0  ;;  %v4035_v29 = vadd.f32 %v2292_v27, %v2291_v26  ;;  %vm1168_vm9 = vcmp.ge.s32.totalorder %v4065_v40, %v4142_v11  ;;  %vm1169_vm10 = vcmp.ge.s32.totalorder %v4145_v12, %v4142_v11 }
 0x2f9   : > { %2822 = vmatpush3.bf16.xpose.msra.mxu1 %v1177_v25  ;;  %v1420_v28 = vrot.slane %v1419_v22, 4 }
 0x2fa   : > { %2827 = vmatprep.subr.bf16.mxu1 %v3498_v2 }
 0x2fb   : > { %v1421_v31 = vadd.f32 %v1420_v28, %v1419_v22  ;;  %v1275_v22 = vpack.c.bf16 %v4153_v16, %v4151_v15 }
 0x2fc   : > { %1728 = vrot.lane.b32.xlu1 %v4039_v30, %s3500_s19  ;;  %1430 = vrot.lane.b32.xlu0 %v4039_v30, %s3501_s3 }
 0x2fd   : > { %v1422_v32 = vrot.slane %v1421_v31, 2 }
 0x2ff   : > { %v1423_v33 = vadd.f32 %v1422_v32, %v1421_v31 }
 0x300   : > { %2024 = vrot.lane.b32.xlu1 %v4039_v30, %s3502_s7  ;;  %2026 = vrot.lane.b32.xlu0 %v1171_v19, %s3502_s7 }
 0x301   : > { %2824 = vmatmul.mubr.msk.bf16.vlgmr.msra.gmra.mrb[12].mxu1 %vm1172_vm6, %v4039_v30  ;;  %v1424_v35 = vrot.slane %v1423_v33, 1 }
 0x302   : > { %2828 = vmatpush3.bf16.msra.mxu1 %v1225_v34  ;;  %2829 = vmatprep.mubr.msk.bf16.mxu1 %vm3499_vm2, %v3498_v2 }
 0x303   : > { %2833 = vmatprep.subr.bf16.mxu1 %v3498_v2  ;;  %v1425_v36 = vadd.f32 %v1424_v35, %v1423_v33 }
 0x304   : > { %1485 = vrot.lane.b32.xlu0 %v3994_v44, %s3501_s3 }
 0x305   : > { %v1426_v38 = vadd.f32 %v1425_v36, %v4058_v37 }
 0x307   : > { %1428 = vst.msk [vmem:[#allocation3] sm:$0x1] %vm1427_vm8, %v1426_v38 }
 0x308   : > { %1781 = vrot.lane.b32.xlu0 %v3994_v44, %s3500_s19 }
 0x323   : > { %1353 = vxpose.xlu1.c.b16.start.end [1/1] (short) (narrow) %v1171_v19, 16 }
 0x327   : > { %2077 = vrot.lane.b32.xlu1 %v3994_v44, %s3502_s7 }
 0x32b   : > { %1589 = vrot.lane.b32.xlu1 %v1588_v43, %s3503_s28 }
 0x32f   : > { %2181 = vrot.lane.b32.xlu1 %v2180_v46, %s3504_s4 }
 0x36a   : > { %v1434_v47 = vpop.permute.xlu0 %1433  ;;  %v1731_v51 = vpop.permute.xlu1 %1730 }
 0x36b   : > { %v1439_v48 = vsel %vm1172_vm6, %v1434_v47, 0  ;;  %1634 = vxpose.xlu0.c.b16.start.end [1/1] (short) (narrow) %v1434_v47, 16  ;;  %v1736_v57 = vsel %vm1172_vm6, %v1731_v51, 0 }
 0x36c   : > { %2846 = vmatpush3.bf16.xpose.msra.mxu0 %v1439_v48 }
 0x36d   : > { %2857 = vmatprep.subr.bf16.mxu0 %v3498_v2 }
 0x36e   : > { %v1431_v54 = vpop.permute.xlu0 %1430  ;;  %v1729_v62 = vpop.permute.xlu1 %1728 }
 0x36f   : > { %1930 = vxpose.xlu0.c.b16.start.end [1/1] (short) (narrow) %v1731_v51, 16 }
 0x372   : > { %v4114_v63 = vpop.permute.xlu0 %2026  ;;  %v2025_v1 = vpop.permute.xlu1 %2024 }
 0x373   : > { %2848 = vmatmul.mubr.msk.bf16.vlgmr.msra.gmra.mrb[16].mxu0 %vm1172_vm6, %v1431_v54  ;;  %v2032_v0 = vsel %vm1172_vm6, %v4114_v63, 0 }
 0x374   : > { %2858 = vmatpush3.bf16.msra.mxu0 %v1540_v52  ;;  %2859 = vmatprep.mubr.msk.bf16.mxu0 %vm3499_vm2, %v3498_v2 }
 0x375   : > { %2869 = vmatprep.subr.bf16.mxu0 %v3498_v2 }
 0x376   : > { %v1486_v13 = vpop.permute.xlu0 %1485 }
 0x377   : > { %v1488_v31 = vsel %vm1172_vm6, %v1486_v13, 1065369472 }
 0x378   : > { %1885 = vrot.lane.b32.xlu0 %v1884_v55, %s3505_s22 }
 0x37a   : > { %v1782_v26 = vpop.permute.xlu0 %1781 }
 0x37b   : > { %2860 = vmatmul.mubr.msk.bf16.vlgmr.msra.gmra.mrb[20].mxu0 %vm1172_vm6, %v1431_v54 }
 0x37c   : > { %2871 = vmatprep.mubr.msk.bf16.mxu0 %vm3499_vm2, %v3498_v2 }
 0x37d   : > { %2870 = vmatpush3.bf16.xpose.msra.mxu0 %v1736_v57 }
 0x37e   : > { %2881 = vmatprep.subr.bf16.mxu0 %v3498_v2 }
 0x384   : > { %2872 = vmatmul.mubr.msk.bf16.vlgmr.msra.gmra.mrb[24].mxu0 %vm1172_vm6, %v1729_v62 }
 0x385   : > { %2882 = vmatpush3.bf16.msra.mxu0 %v1836_v60  ;;  %2883 = vmatprep.mubr.msk.bf16.mxu0 %vm3499_vm2, %v3498_v2 }
 0x386   : > { %2893 = vmatprep.subr.bf16.mxu0 %v3498_v2 }
 0x389   : > { %v1361_v6 = vpop.trf.xlu1 }
 0x38c   : > { %2884 = vmatmul.mubr.msk.bf16.vlgmr.msra.gmra.mrb[28].mxu0 %vm1172_vm6, %v1729_v62 }
 0x38d   : > { %2895 = vmatprep.mubr.msk.bf16.mxu0 %vm3499_vm2, %v3498_v2 }
 0x38e   : > { %2894 = vmatpush3.bf16.xpose.msra.mxu0 %v2032_v0 }
 0x38f   : > { %2905 = vmatprep.subr.bf16.mxu0 %v3498_v2 }
 0x395   : > { %2896 = vmatmul.mubr.msk.bf16.vlgmr.msra.gmra.mrb[32].mxu0 %vm1172_vm6, %v2025_v1 }
 0x396   : > { %2906 = vmatpush3.bf16.msra.mxu0 %v2132_v5  ;;  %2907 = vmatprep.mubr.msk.bf16.mxu0 %vm3499_vm2, %v3498_v2 }
 0x397   : > { %2917 = vmatprep.subr.bf16.mxu0 %v3498_v2 }
 0x399   : > { %v4132_v7 = vpop.permute.xlu1 %2077 }
 0x39d   : > { %v1590_v8 = vpop.permute.xlu1 %1589  ;;  %2908 = vmatmul.mubr.msk.bf16.vlgmr.msra.gmra.mrb[36].mxu0 %vm1172_vm6, %v2025_v1  ;;  %v1784_v1 = vsel %vm1172_vm6, %v1782_v26, 1065369472 }
 0x39e   : > { %v1592_v9 = vmul.f32 %v1590_v8, %v4010_v56  ;;  %v1593_v10 = vmul.f32 %v1590_v8, %v4012_v61  ;;  %2925 = vmatprep.mubr.msk.bf16.mxu0 %vm3499_vm2, %v3498_v2 }
 0x3a0   : > { %1596 = vrot.lane.b32.xlu1 %v1592_v9, %s3501_s3  ;;  %1598 = vrot.lane.b32.xlu0 %v1593_v10, %s3501_s3 }
 0x3d1   : > { %v1642_v27 = vpop.trf.xlu0 }
 0x3d4   : > { %v1213_v14 = vpop.f32.mrb[12].mxu1 }
 0x3d5   : > { %v2825_v17 = vpop.f32.mrb[13].mxu1  ;;  %v1220_v19 = vsel %vm1168_vm9, %v1213_v14, 0.0  ;;  %v4172_v28 = vpop.trf.xlu0 }
 0x3d6   : > { %v1216_v18 = vpop.f32.mrb[14].mxu1 }
 0x3d7   : > { %v1221_v20 = vsel %vm1169_vm10, %v1216_v18, 0.0  ;;  %v2826_v21 = vpop.f32.mrb[15].mxu1 }
 0x3d8   : > { %v1227_v25 = vpack.c.bf16 %v1221_v20, %v1220_v19 }
 0x3da   : > { %2830 = vmatmul.mubr.msk.bf16.vlgmr.msra.gmra.mrb[16].mxu1 %vm1172_vm6, %v1227_v25 }
 0x3db   : > { %2834 = vmatpush3.bf16.msra.mxu1 %v1275_v22  ;;  %2835 = vmatprep.mubr.msk.bf16.mxu1 %vm3499_vm2, %v3498_v2  ;;  %v1323_v22 = vrot.slane %v4058_v37, %v4070_v42 }
 0x3dc   : > { %2839 = vmatprep.subr.bf16.mxu1 %v3498_v2 }
 0x3dd   : > { %v1326_v37 = vmul.f32 %v1323_v22, %v4012_v61 }
 0x3e2   : > { %2836 = vmatmul.mubr.msk.bf16.vlgmr.msra.gmra.mrb[20].mxu1 %vm1172_vm6, %v4039_v30 }
 0x3e3   : > { %2840 = vmatpush3.bf16.msra.mxu1 %v3994_v44  ;;  %2841 = vmatprep.mubr.msk.bf16.mxu1 %vm3499_vm2, %v3498_v2  ;;  %v2182_v44 = vpop.permute.xlu1 %2181 }
 0x3e4   : > { %2851 = vmatprep.subr.bf16.mxu1 %v3498_v2  ;;  %v2184_v30 = vmul.f32 %v2182_v44, %v4010_v56  ;;  %v2185_v35 = vmul.f32 %v2182_v44, %v4012_v61  ;;  %v2080_v44 = vsel %vm1172_vm6, %v4132_v7, 1065369472 }
 0x3ea   : > { %2842 = vmatmul.mubr.msk.bf16.vlgmr.msra.gmra.mrb[24].mxu1 %vm1172_vm6, %v1361_v6  ;;  %v1886_v32 = vpop.permute.xlu0 %1885 }
 0x3eb   : > { %2852 = vmatpush3.bf16.msra.mxu1 %v1488_v31  ;;  %v1888_v33 = vmul.f32 %v1886_v32, %v4010_v56  ;;  %v1889_v34 = vmul.f32 %v1886_v32, %v4012_v61  ;;  %2853 = vmatprep.mubr.msk.bf16.mxu1 %vm3499_vm2, %v3498_v2 }
 0x3ec   : > { %2863 = vmatprep.subr.bf16.mxu1 %v3498_v2 }
 0x3ed   : > { %1894 = vrot.lane.b32.xlu0 %v1889_v34, %s3500_s19  ;;  %1892 = vrot.lane.b32.xlu1 %v1888_v33, %s3500_s19  ;;  %v1325_v34 = vmul.f32 %v1323_v22, %v4010_v56 }
 0x3ef   : > { %v1327_v56 = vsel %vm1172_vm6, %v1325_v34, 0.0 }
 0x3f1   : > { %2190 = vrot.lane.b32.xlu0 %v2185_v35, %s3502_s7  ;;  %2188 = vrot.lane.b32.xlu1 %v2184_v30, %s3502_s7  ;;  %v1330_v35 = vsel %vm1172_vm6, %v1326_v37, 0.0 }
 0x412   : > { %v1597_v36 = vpop.permute.xlu1 %1596  ;;  %v1599_v38 = vpop.permute.xlu0 %1598 }
 0x413   : > { %v1605_v39 = vsel %vm1172_vm6, %v1599_v38, 0.0  ;;  %v1602_v43 = vsel %vm1172_vm6, %v1597_v36, 0.0 }
 0x414   : > { %1606 = vadd.xlane.f32.xlu0 %v1605_v39 }
 0x415   : > { %1603 = vadd.xlane.f32.xlu1 %v1602_v43 }
 0x446   : > { %v1475_v46 = vpop.f32.mrb[16].mxu0 }
 0x447   : > { %v2849_v47 = vpop.f32.mrb[17].mxu0  ;;  %v1482_v51 = vsel %vm1168_vm9, %v1475_v46, 0.0 }
 0x448   : > { %v1478_v48 = vpop.f32.mrb[18].mxu0 }
 0x449   : > { %v1483_v52 = vsel %vm1169_vm10, %v1478_v48, 0.0  ;;  %v2850_v54 = vpop.f32.mrb[19].mxu0 }
 0x44a   : > { %v1490_v55 = vpack.c.bf16 %v1483_v52, %v1482_v51  ;;  %v3506_v54 = vmov 16  }
 0x44b   : > { %3094 = vset.pattern.permute.xlu0 %v3506_v54  ;;  %3095 = vset.pattern.permute.xlu1 %v3506_v54 }
 0x44c   : > { %2854 = vmatmul.mubr.msk.bf16.vlgmr.msra.gmra.mrb[28].mxu1 %vm1172_vm6, %v1490_v55 }
 0x44d   : > { %2864 = vmatpush3.bf16.msra.mxu1 %v1486_v13  ;;  %2865 = vmatprep.mubr.msk.bf16.mxu1 %vm3499_vm2, %v3498_v2 }
 0x44e   : > { %v4199_v57 = vpop.f32.mrb[20].mxu0  ;;  %2875 = vmatprep.subr.bf16.mxu1 %v3498_v2 }
 0x44f   : > { %v2861_v60 = vpop.f32.mrb[21].mxu0 }
 0x450   : > { %v4202_v62 = vpop.f32.mrb[22].mxu0 }
 0x451   : > { %v2862_v0 = vpop.f32.mrb[23].mxu0 }
 0x454   : > { %2866 = vmatmul.mubr.msk.bf16.vlgmr.msra.gmra.mrb[32].mxu1 %vm1172_vm6, %v1642_v27 }
 0x455   : > { %2876 = vmatpush3.bf16.msra.mxu1 %v1784_v1  ;;  %2877 = vmatprep.mubr.msk.bf16.mxu1 %vm3499_vm2, %v3498_v2 }
 0x456   : > { %2887 = vmatprep.subr.bf16.mxu1 %v3498_v2 }
 0x457   : > { %v1772_v5 = vpop.f32.mrb[24].mxu0 }
 0x458   : > { %v2873_v6 = vpop.f32.mrb[25].mxu0  ;;  %v1779_v9 = vsel %vm1168_vm9, %v1772_v5, 0.0 }
 0x459   : > { %v1775_v8 = vpop.f32.mrb[26].mxu0 }
 0x45a   : > { %v1780_v10 = vsel %vm1169_vm10, %v1775_v8, 0.0  ;;  %v2874_v13 = vpop.f32.mrb[27].mxu0 }
 0x45b   : > { %v1786_v14 = vpack.c.bf16 %v1780_v10, %v1779_v9 }
 0x45d   : > { %2878 = vmatmul.mubr.msk.bf16.vlgmr.msra.gmra.mrb[36].mxu1 %vm1172_vm6, %v1786_v14 }
 0x45e   : > { %2888 = vmatpush3.bf16.msra.mxu1 %v1782_v26  ;;  %2889 = vmatprep.mubr.msk.bf16.mxu1 %vm3499_vm2, %v3498_v2 }
 0x45f   : > { %v1893_v17 = vpop.permute.xlu1 %1892  ;;  %v1895_v18 = vpop.permute.xlu0 %1894  ;;  %2899 = vmatprep.subr.bf16.mxu1 %v3498_v2 }
 0x460   : > { %v4219_v19 = vpop.f32.mrb[28].mxu0  ;;  %v1898_v20 = vsel %vm1172_vm6, %v1893_v17, 0.0  ;;  %v1901_v21 = vsel %vm1172_vm6, %v1895_v18, 0.0 }
 0x461   : > { %v2885_v25 = vpop.f32.mrb[29].mxu0  ;;  %1899 = vadd.xlane.f32.xlu0 %v1898_v20  ;;  %1902 = vadd.xlane.f32.xlu1 %v1901_v21 }
 0x462   : > { %v4225_v26 = vpop.f32.mrb[30].mxu0 }
 0x463   : > { %v2886_v27 = vpop.f32.mrb[31].mxu0  ;;  %v2189_v31 = vpop.permute.xlu1 %2188 }
 0x464   : > { %v2191_v32 = vpop.permute.xlu0 %2190  ;;  %v2194_v33 = vsel %vm1172_vm6, %v2189_v31, 0.0 }
 0x465   : > { %2195 = vadd.xlane.f32.xlu0 %v2194_v33  ;;  %v2197_v30 = vsel %vm1172_vm6, %v2191_v32, 0.0  ;;  %2890 = vmatmul.mubr.msk.bf16.vlgmr.msra.gmra.mrb[40].mxu1 %vm1172_vm6, %v4172_v28 }
 0x466   : > { %2198 = vadd.xlane.f32.xlu1 %v2197_v30  ;;  %2900 = vmatpush3.bf16.msra.mxu1 %v2080_v44 }
 0x467   : > { %2901 = vmatprep.mubr.msk.bf16.mxu1 %vm3499_vm2, %v3498_v2  ;;  %2911 = vmatprep.subr.bf16.mxu1 %v3498_v2 }
 0x468   : > { %v2068_v42 = vpop.f32.mrb[32].mxu0 }
 0x469   : > { %1328 = vadd.xlane.f32.xlu0 %v1327_v56  ;;  %v2897_v36 = vpop.f32.mrb[33].mxu0  ;;  %v2075_v61 = vsel %vm1168_vm9, %v2068_v42, 0.0 }
 0x46a   : > { %1331 = vadd.xlane.f32.xlu1 %v1330_v35  ;;  %v2071_v38 = vpop.f32.mrb[34].mxu0 }
 0x46b   : > { %v2076_v28 = vsel %vm1169_vm10, %v2071_v38, 0.0  ;;  %v2898_v39 = vpop.f32.mrb[35].mxu0 }
 0x46c   : > { %v2082_v43 = vpack.c.bf16 %v2076_v28, %v2075_v61 }
 0x46e   : > { %2902 = vmatmul.mubr.msk.bf16.vlgmr.msra.gmra.mrb[44].mxu1 %vm1172_vm6, %v2082_v43 }
 0x46f   : > { %2912 = vmatpush3.bf16.msra.mxu1 %v4132_v7  ;;  %2913 = vmatprep.mubr.msk.bf16.mxu1 %vm3499_vm2, %v3498_v2 }
 0x470   : > { %v4250_v46 = vpop.f32.mrb[36].mxu0 }
 0x471   : > { %v2909_v47 = vpop.f32.mrb[37].mxu0 }
 0x472   : > { %v4252_v48 = vpop.f32.mrb[38].mxu0 }
 0x473   : > { %v2910_v51 = vpop.f32.mrb[39].mxu0 }
 0x4a1   : > { %v1607_v27 = vpop.xlane.xlu0 %1606 }
 0x4a2   : > { %v1604_v18 = vpop.xlane.xlu1 %1603 }
 0x4ad   : > { %v4254_v52 = vpop.f32.mrb[16].mxu1 }
 0x4ae   : > { %v2831_v11 = vpop.f32.mrb[17].mxu1 }
 0x4af   : > { %v4256_v12 = vpop.f32.mrb[18].mxu1 }
 0x4b0   : > { %v2832_v55 = vpop.f32.mrb[19].mxu1 }
 0x4b5   : > { %v1310_v60 = vpop.f32.mrb[20].mxu1 }
 0x4b6   : > { %v4259_v7 = vadd.f32 %v1310_v60, %v4254_v52  ;;  %v2837_v0 = vpop.f32.mrb[21].mxu1 }
 0x4b7   : > { %v1313_v1 = vpop.f32.mrb[22].mxu1 }
 0x4b8   : > { %v4262_v5 = vadd.f32 %v1313_v1, %v4256_v12  ;;  %v2838_v6 = vpop.f32.mrb[23].mxu1 }
 0x4bd   : > { %v1406_v8 = vpop.f32.mrb[24].mxu1 }
 0x4be   : > { %v1413_v9 = vadd.f32 %v1406_v8, %v4151_v15  ;;  %v2843_v10 = vpop.f32.mrb[25].mxu1 }
 0x4bf   : > { %v1409_v13 = vpop.f32.mrb[26].mxu1 }
 0x4c0   : > { %1415 = vst.msk [vmem:[#allocation2] sm:$0xff] %vm1172_vm6, %v1413_v9  ;;  %v1414_v14 = vadd.f32 %v1409_v13, %v4153_v16  ;;  %v2844_v17 = vpop.f32.mrb[27].mxu1 }
 0x4c2   : > { %1416 = vst.msk [vmem:[#allocation2 + $0x8] sm:$0xff] %vm1172_vm6, %v1414_v14 }
 0x4ee   : > { %v1900_v36 = vpop.xlane.xlu0 %1899  ;;  %v1903_v39 = vpop.xlane.xlu1 %1902 }
 0x4f2   : > { %v2196_v8 = vpop.xlane.xlu0 %2195 }
 0x4f3   : > { %v2199_v9 = vpop.xlane.xlu1 %2198 }
 0x51f   : > { %v1528_v20 = vpop.f32.mrb[28].mxu1 }
 0x520   : > { %v4269_v21 = vadd.f32 %v4199_v57, %v1528_v20  ;;  %v1608_v22 = vadd.f32 %v1604_v18, %v1528_v20  ;;  %v2855_v25 = vpop.f32.mrb[29].mxu1  ;;  %v1329_v18 = vpop.xlane.xlu0 %1328 }
 0x521   : > { %v1531_v31 = vpop.f32.mrb[30].mxu1 }
 0x522   : > { %v1610_v32 = vadd.f32 1e-12, %v1608_v22  ;;  %v4272_v15 = vadd.f32 %v4202_v62, %v1531_v31  ;;  %v1609_v33 = vadd.f32 %v1607_v27, %v1531_v31  ;;  %v2856_v34 = vpop.f32.mrb[31].mxu1  ;;  %v1333_v31 = vadd.f32 %v1329_v18, %v4254_v52 }
 0x524   : > { %3129 = vrcp.f32 %v1610_v32  ;;  %v1611_v16 = vadd.f32 1e-12, %v1609_v33  ;;  %v1332_v33 = vpop.xlane.xlu1 %1331  ;;  %v1335_v34 = vadd.f32 1e-12, %v1333_v31 }
 0x526   : > { %3131 = vrcp.f32 %v1611_v16 }
 0x527   : > { %v1688_v44 = vpop.f32.mrb[32].mxu1 }
 0x528   : > { %v1695_v30 = vadd.f32 %v1688_v44, %v4084_v49  ;;  %v2867_v37 = vpop.f32.mrb[33].mxu1 }
 0x529   : > { %v1691_v42 = vpop.f32.mrb[34].mxu1 }
 0x52a   : > { %1697 = vst.msk [vmem:[#allocation2 + $0x10] sm:$0xff] %vm1172_vm6, %v1695_v30  ;;  %v1696_v57 = vadd.f32 %v1691_v42, %v4086_v50  ;;  %v2868_v56 = vpop.f32.mrb[35].mxu1 }
 0x52c   : > { %1698 = vst.msk [vmem:[#allocation2 + $0x18] sm:$0xff] %vm1172_vm6, %v1696_v57 }
 0x52e   : > { %v3130_v35 = vpop.eup %3129 }
 0x52f   : > { %1616 = vperm.xlu0 %3094, %v3130_v35   ;;  %v3125_v35 = vld [vmem:[#allocation17] sm:$0xff]  }
 0x530   : > { %v3132_v62 = vpop.eup %3131  ;;  %v1824_v38 = vpop.f32.mrb[36].mxu1  ;;  %2918 = vmatpush3.bf16.msra.mxu0 %v3125_v35 }
 0x531   : > { %v4279_v61 = vadd.f32 %v4219_v19, %v1824_v38  ;;  %v1904_v28 = vadd.f32 %v1900_v36, %v1824_v38  ;;  %1621 = vperm.xlu1 %3095, %v3132_v62   ;;  %v2879_v49 = vpop.f32.mrb[37].mxu1  ;;  %v3126_v62 = vld [vmem:[#allocation17 + $0x8] sm:$0xff]   ;;  %2919 = vmatprep.subr.bf16.mxu0 %v3498_v2  ;;  %v1702_v38 = vrot.slane %v4026_v23, 4 }
 0x532   : > { %v1827_v43 = vpop.f32.mrb[38].mxu1 }
 0x533   : > { %v1906_v47 = vadd.f32 1e-12, %v1904_v28  ;;  %v4282_v51 = vadd.f32 %v4225_v26, %v1827_v43  ;;  %v1905_v50 = vadd.f32 %v1903_v39, %v1827_v43  ;;  %v2880_v54 = vpop.f32.mrb[39].mxu1  ;;  %v1703_v49 = vadd.f32 %v1702_v38, %v4026_v23 }
 0x534   : > { %2920 = vmatpush3.bf16.msra.mxu0 %v3126_v62  ;;  %v2294_v54 = vrot.slane %v4035_v29, 4 }
 0x535   : > { %3133 = vrcp.f32 %v1906_v47  ;;  %v1907_v11 = vadd.f32 1e-12, %v1905_v50  ;;  %2921 = vmatprep.subr.bf16.mxu0 %v3498_v2  ;;  %v1704_v47 = vrot.slane %v1703_v49, 2 }
 0x536   : > { %v2295_v23 = vadd.f32 %v2294_v54, %v4035_v29 }
 0x537   : > { %3135 = vrcp.f32 %v1907_v11  ;;  %v1705_v11 = vadd.f32 %v1704_v47, %v1703_v49 }
 0x538   : > { %v1984_v55 = vpop.f32.mrb[40].mxu1 }
 0x539   : > { %v1991_v60 = vadd.f32 %v1984_v55, %v4104_v58  ;;  %v2891_v0 = vpop.f32.mrb[41].mxu1  ;;  %v3507_v55 = vmov 1966171168  }
 0x53a   : > { %v1987_v19 = vpop.f32.mrb[42].mxu1 }
 0x53b   : > { %1993 = vst.msk [vmem:[#allocation2 + $0x20] sm:$0xff] %vm1172_vm6, %v1991_v60  ;;  %v1992_v1 = vadd.f32 %v1987_v19, %v4106_v59  ;;  %v2892_v6 = vpop.f32.mrb[43].mxu1  ;;  %v1710_v60 = vunpack.c.l.s4 %v3507_v55  ;;  %v3127_v19 = vld [vmem:[#allocation17 + $0x10] sm:$0xff]  }
 0x53c   : > { %2922 = vmatpush3.bf16.msra.mxu0 %v3127_v19 }
 0x53d   : > { %1994 = vst.msk [vmem:[#allocation2 + $0x28] sm:$0xff] %vm1172_vm6, %v1992_v1  ;;  %v1706_v1 = vrot.slane %v1705_v11, 1  ;;  %2923 = vmatprep.subr.bf16.mxu0 %v3498_v2 }
 0x53f   : > { %v3134_v26 = vpop.eup %3133 }
 0x540   : > { %1912 = vperm.xlu1 %3095, %v3134_v26   ;;  %v1707_v26 = vadd.f32 %v1706_v1, %v1705_v11 }
 0x541   : > { %v2120_v10 = vpop.f32.mrb[44].mxu1  ;;  %v3136_v58 = vpop.eup %3135 }
 0x542   : > { %v4289_v13 = vadd.f32 %v4250_v46, %v2120_v10  ;;  %v2200_v14 = vadd.f32 %v2196_v8, %v2120_v10  ;;  %v2903_v17 = vpop.f32.mrb[45].mxu1  ;;  %v1334_v46 = vadd.f32 %v1332_v33, %v4256_v12 }
 0x543   : > { %v2123_v20 = vpop.f32.mrb[46].mxu1 }
 0x544   : > { %v2202_v22 = vadd.f32 1e-12, %v2200_v14  ;;  %v4292_v25 = vadd.f32 %v4252_v48, %v2123_v20  ;;  %v2201_v59 = vadd.f32 %v2199_v9, %v2123_v20  ;;  %1917 = vperm.xlu1 %3095, %v3136_v58   ;;  %v2904_v27 = vpop.f32.mrb[47].mxu1  ;;  %v1336_v16 = vadd.f32 1e-12, %v1334_v46 }
 0x546   : > { %3137 = vrcp.f32 %v2202_v22  ;;  %v2203_v32 = vadd.f32 1e-12, %v2201_v59 }
 0x548   : > { %3139 = vrcp.f32 %v2203_v32 }
 0x549   : > { %3141 = vrcp.f32 %v1335_v34 }
 0x54a   : > { %3143 = vrcp.f32 %v1336_v16 }
 0x550   : > { %v3138_v44 = vpop.eup %3137 }
 0x551   : > { %2208 = vperm.xlu1 %3095, %v3138_v44  }
 0x552   : > { %v3140_v30 = vpop.eup %3139 }
 0x553   : > { %v3142_v48 = vpop.eup %3141 }
 0x554   : > { %v3144_v37 = vpop.eup %3143 }
 0x555   : > { %2213 = vperm.xlu1 %3095, %v3140_v30  }
 0x559   : > { %1341 = vperm.xlu1 %3095, %v3142_v48  }
 0x55d   : > { %1346 = vperm.xlu1 %3095, %v3144_v37  }
 0x5ae   : > { %v1617_v42 = vpop.permute.xlu0 %1616 }
 0x5af   : > { %v1624_v57 = vmul.f32 %v1617_v42, %v4269_v21  ;;  %v1998_v21 = vrot.slane %v4028_v24, 4 }
 0x5b0   : > { %v1622_v52 = vpop.permute.xlu1 %1621 }
 0x5b1   : > { %v1625_v56 = vmul.f32 %v1622_v52, %v4272_v15  ;;  %v1999_v50 = vadd.f32 %v1998_v21, %v4028_v24  ;;  %v3128_v24 = vld [vmem:[#allocation17 + $0x18] sm:$0xff]  }
 0x5b2   : > { %2924 = vmatpush3.bf16.msra.mxu0 %v3128_v24 }
 0x5b3   : > { %v1626_v12 = vpack.c.bf16 %v1625_v56, %v1624_v57  ;;  %v2000_v0 = vrot.slane %v1999_v50, 2 }
 0x5b5   : > { %1628 = vrot.lane.b32.xlu1 %v1626_v12, %s3503_s28  ;;  %v2001_v6 = vadd.f32 %v2000_v0, %v1999_v50 }
 0x5b7   : > { %v2002_v10 = vrot.slane %v2001_v6, 1 }
 0x5b9   : > { %v2003_v22 = vadd.f32 %v2002_v10, %v2001_v6 }
 0x5bf   : > { %v1913_v36 = vpop.permute.xlu1 %1912 }
 0x5c0   : > { %v1920_v15 = vmul.f32 %v1913_v36, %v4279_v61  ;;  %v1711_v61 = vunpack.c.0.s8 %v1710_v60 }
 0x5c2   : > { %v1714_v9 = vsub.s32 %v1711_v61, %v4065_v40 }
 0x5c3   : > { %v1918_v28 = vpop.permute.xlu1 %1917 }
 0x5c4   : > { %v1921_v39 = vmul.f32 %v1918_v28, %v4282_v51  ;;  %v2296_v51 = vrot.slane %v2295_v23, 2  ;;  %v1715_v20 = vrot.slane %v1707_v26, %v1714_v9  ;;  %v2011_v31 = vrot.slane %v2003_v22, %v1714_v9 }
 0x5c6   : > { %v1922_v43 = vpack.c.bf16 %v1921_v39, %v1920_v15  ;;  %v2297_v14 = vadd.f32 %v2296_v51, %v2295_v23  ;;  %v1722_v2 = vrot.slane %v1715_v20, %v1714_v9  ;;  %v2018_v34 = vrot.slane %v2011_v31, %v1714_v9 }
 0x5c8   : > { %1924 = vrot.lane.b32.xlu0 %v1922_v43, %s3505_s22  ;;  %v2298_v59 = vrot.slane %v2297_v14, 1  ;;  %s3371_s22 = scalar_lea.vmem %s4345_s2, 256 }
 0x5c9   : > { %p3372_p8 = scmp.ne.s32.totalorder %s4345_s2, %s3371_s22  ;;  %p3379_p10 = scmp.lt.s32.totalorder %s3377_s18, %s3371_s22 }
 0x5ca   : > { %v2299_v32 = vadd.f32 %v2298_v59, %v2297_v14 }
 0x5cb   : > { %p3373_p5 = pnand %p3372_p8, %p4469_p7  ;;  %p3380_p1 = por %p3379_p10, %p3378_p9 }
 0x5cd   : > { %p3374_p2 = pneg %p3373_p5 }
 0x5cf   : > { %p3381_p11 = pnand %p3380_p1, %p3374_p2 }
 0x5d0   : > { %v2209_v8 = vpop.permute.xlu1 %2208 }
 0x5d1   : > { %v2216_v58 = vmul.f32 %v2209_v8, %v4289_v13 }
 0x5d4   : > { %v2214_v17 = vpop.permute.xlu1 %2213 }
 0x5d5   : > { %v2217_v29 = vmul.f32 %v2214_v17, %v4292_v25  ;;  %v2307_v25 = vrot.slane %v2299_v32, %v1714_v9 }
 0x5d7   : > { %v2218_v18 = vpack.c.bf16 %v2217_v29, %v2216_v58  ;;  %v2314_v16 = vrot.slane %v2307_v25, %v1714_v9 }
 0x5d8   : > { %v1342_v27 = vpop.permute.xlu1 %1341 }
 0x5d9   : > { %2220 = vrot.lane.b32.xlu1 %v2218_v18, %s3504_s4  ;;  %v1349_v40 = vmul.f32 %v1342_v27, %v4259_v7  ;;  %s2400_s4 = scalar_lea.sflag [#allocation7], %s3904_s5 }
 0x5dc   : > { %v1347_v33 = vpop.permute.xlu1 %1346 }
 0x5dd   : > { %v1350_v46 = vmul.f32 %v1347_v33, %v4262_v5  ;;  %1723 = vrot.lane.b32.xlu1 %v1722_v2, %s3501_s3 }
 0x5df   : > { %v1351_v13 = vpack.c.bf16 %v1350_v46, %v1349_v40 }
 0x5e1   : > { %1352 = vst.msk [vmem:[#allocation4] sm:$0xff] %vm1172_vm6, %v1351_v13  ;;  %2019 = vrot.lane.b32.xlu1 %v2018_v34, %s3500_s19 }
 0x5e5   : > { %2315 = vrot.lane.b32.xlu1 %v2314_v16, %s3502_s7  ;;  %s4468_s7 = sld [smem:[#allocation38_spill]] }
 0x5e6   : > { %2226 = vxpose.xlu0.c.b16.start.end [1/1] (short) (narrow) %v4114_v63, 16 }
 0x5eb   : > { %s4343_s28 = scalar_lea.hbm %s4468_s7, %s2662_s23 }
 0x627   : > { %v1629_v44 = vpop.permute.xlu1 %1628 }
 0x628   : > { %1632 = vst.msk [vmem:[#allocation4] sm:$0xff] %vm1631_vm4, %v1629_v44 }
 0x63a   : > { %v1925_v7 = vpop.permute.xlu0 %1924 }
 0x63b   : > { %1928 = vst.msk [vmem:[#allocation4] sm:$0xff] %vm1927_vm5, %v1925_v7 }
 0x64b   : > { %v2221_v5 = vpop.permute.xlu1 %2220 }
 0x64c   : > { %2224 = vst.msk [vmem:[#allocation4] sm:$0xff] %vm2223_vm7, %v2221_v5  ;;  %v2234_v30 = vpop.trf.xlu0 }
 0x64d   : > { %2914 = vmatmul.mubr.msk.bf16.vlgmr.msra.gmra.mrb[48].mxu1 %vm1172_vm6, %v2234_v30 }
 0x64f   : > { %v1724_v48 = vpop.permute.xlu1 %1723 }
 0x650   : > { %v1726_v37 = vadd.f32 %v1724_v48, %v4067_v41 }
 0x652   : > { %1727 = vst.msk [vmem:[#allocation3 + $0x1] sm:$0x1] %vm1427_vm8, %v1726_v37 }
 0x653   : > { %v2020_v63 = vpop.permute.xlu1 %2019  ;;  %v2320_v42 = vld [vmem:[#allocation4] sm:$0xff] }
 0x654   : > { %v2022_v52 = vadd.f32 %v2020_v63, %v4090_v53  ;;  %2926 = vmatmul.mubr.msk.bf16.vlgmr.msra.gmra.mrb[40].mxu0 %vm640_vm3, %v2320_v42 }
 0x656   : > { %2023 = vst.msk [vmem:[#allocation3 + $0x2] sm:$0x1] %vm1427_vm8, %v2022_v52 }
 0x657   : > { %v2316_v57 = vpop.permute.xlu1 %2315 }
 0x658   : > { %v2318_v56 = vadd.f32 %v2316_v57, %v4076_v45 }
 0x65a   : > { %2319 = vst.msk [vmem:[#allocation3 + $0x3] sm:$0x1] %vm1427_vm8, %v2318_v56 }
 0x720   : > { %v2280_v41 = vpop.f32.mrb[48].mxu1 }
 0x721   : > { %v2287_v12 = vadd.f32 %v2280_v41, %v4122_v3  ;;  %v2915_v35 = vpop.f32.mrb[49].mxu1 }
 0x722   : > { %v2283_v53 = vpop.f32.mrb[50].mxu1 }
 0x723   : > { %2289 = vst.msk [vmem:[#allocation2 + $0x30] sm:$0xff] %vm1172_vm6, %v2287_v12  ;;  %v2288_v62 = vadd.f32 %v2283_v53, %v4124_v4  ;;  %v2916_v36 = vpop.f32.mrb[51].mxu1 }
 0x725   : > { %2290 = vst.msk [vmem:[#allocation2 + $0x38] sm:$0xff] %vm1172_vm6, %v2288_v62 }
 0x727   : > { %v2390_v45 = vpop.f32.mrb[40].mxu0 }
 0x728   : > { %2397 = vst.msk [vmem:[%s3931_s13] sm:$0xff] %vm640_vm3, %v2390_v45  ;;  %v2927_v3 = vpop.f32.mrb[41].mxu0 }
 0x729   : > { %v2393_v4 = vpop.f32.mrb[42].mxu0 }
 0x72a   : > { %2398 = vst.msk [vmem:[%s3931_s13 + $0x8] sm:$0xff] %vm640_vm3, %v2393_v4  ;;  %v2928_v38 = vpop.f32.mrb[43].mxu0 }
 0x72b   : > { %3384 = shalt.err (!%p3381_p11)
}
 0x72c   : > { %s3385_s13 = scalar_lea.hbm %s4343_s28, 256  ;;  %s3389_s23 = scalar_lea.hbm %s4468_s7, 2048 }
 0x72d   : > { %p3386_p12 = scmp.ne.s32.totalorder %s4343_s28, %s3385_s13  ;;  %p3390_p3 = scmp.lt.u32.totalorder %s4343_s28, %s4468_s7 }
 0x72e   : > { %p3391_p6 = scmp.lt.u32.totalorder %s3389_s23, %s3385_s13  ;;  %p3393_p8 = scmp.lt.u32.totalorder %s3385_s13, %s4343_s28 }
 0x72f   : > { %p3387_p13 = pnand %p3386_p12, %p4469_p7 }
 0x730   : > { %p3392_p4 = por %p3391_p6, %p3390_p3 }
 0x731   : > { %p3388_p0 = pneg %p3387_p13 }
 0x732   : > { %p3394_p5 = por %p3393_p8, %p3392_p4 }
 0x734   : > { %p3395_p2 = pnand %p3394_p5, %p3388_p0 }
 0x736   : > { %3398 = shalt.err (!%p3395_p2)
}
 0x737   : > { %s3509_s22 = smov 128   ;;  %s3510_s17 = smov 8  }
 0x738   : > { %2959 = dma.vmem_to_hbm [thread:$0]  (%p4469_p7), %s4345_s2, 256, %s4343_s28, %s2400_s4, %s3509_s22, %s3509_s22, %s3510_s17  }
 0x739 PF: > { %p3006_p9 = scmp.ge.s32.totalorder %s3485_s15, 2  ;;  %s2430_s1 = sand.u32 1, %s3457_s25  }
 0x73a   : > { %p4470_p10 = scmp.ne.s32.totalorder %s4453_s20, 0  ;;  %s2431_s18 = scalar_lea.sflag [#allocation7], %s2430_s1 }
 0x73c   : > { %p2988_p1 = pnand %p3006_p9, %p4470_p10 }
 0x73e   : > { %3452 = dma.done.wait (!%p2988_p1), %s2431_s18, 256  }
 0x73f   : > { %3454 = vsyncadd (!%p2988_p1), %s2431_s18, 4294967040  ;;  %s33_s15 = sadd.s32 1, %s3485_s15   ;;  %s4471_s25 = smov %s3461_s26 }
 0x740   : > { %p30_p11 = scmp.ge.s32.totalorder %s33_s15, 10   ;;  %s4472_s26 = smov %s3465_s27 }
 0x741   : > { %s4473_s27 = smov %s3853_s29  ;;  %s4474_s28 = smov %s3477_s30 }
 0x742   : > { %s4475_s29 = smov %s3481_s14  ;;  %s4476_s30 = smov %s4479_s21 }
 0x743   : > { %s4477_s14 = smov %s4483_s16  ;;  %32 = sbr.rel (!%p30_p11) target bundleno = 22 (0x16), region = 155 }
 0x74a   :  { %2436 = vsyncpa [#allocation6], 1 }
 0x74b   :  { %2438 = vsyncpa [#allocation6 + $0x1], 1 }
 0x74c   :  { %2439 = vsyncpa [#allocation9], 1 }
 0x74d   :  { %2440 = vsyncpa [#allocation12], 1 }
 0x74e   :  { %2441 = vsyncpa [#allocation15], 1 }
 0x74f   :  { %2442 = vsyncpa [#allocation18], 1 }
 0x750   :  { %2443 = vsyncpa [#allocation7], 1 }
 0x751   :  { %2445 = vsyncpa [#allocation7 + $0x1], 1 }

// kernel: tpu_custom_call.1
= control target key start
LH: loop header
LB: loop body
LE: loop exit
PB: predicated region body
PF: predicated region fallthrough
CT: control target
= control target key end

     0   :  { %s4403_s0 = inlined_call_operand.hbm [shape: bf16[2,64,64], index: 0, kind: input, shape index: {}]   ;;  %s4404_s1 = inlined_call_operand.hbm [shape: bf16[64,64], index: 1, kind: input, shape index: {}]   ;;  %s4405_s2 = inlined_call_operand.hbm [shape: bf16[64,64], index: 2, kind: input, shape index: {}]   ;;  %s4406_s3 = inlined_call_operand.hbm [shape: bf16[64,64], index: 3, kind: input, shape index: {}]   ;;  %s4407_s4 = inlined_call_operand.hbm [shape: bf16[64,64], index: 4, kind: input, shape index: {}]   ;;  %s4408_s5 = inlined_call_operand.vmem [shape: f32[1,64], index: 5, kind: input, shape index: {}]   ;;  %s4409_s6 = inlined_call_operand.hbm [shape: bf16[64,64], index: 6, kind: input, shape index: {}]   ;;  %s4410_s7 = inlined_call_operand.vmem [shape: f32[1,64], index: 7, kind: input, shape index: {}]   ;;  %s4411_s8 = inlined_call_operand.hbm [shape: bf16[64,64], index: 8, kind: input, shape index: {}]   ;;  %s4412_s9 = inlined_call_operand.vmem [shape: f32[1,64], index: 9, kind: input, shape index: {}]   ;;  %s4413_s10 = inlined_call_operand.vmem [shape: bf16[64,64], index: 10, kind: input, shape index: {}]   ;;  %s4414_s11 = inlined_call_operand.vmem [shape: f32[1,64], index: 11, kind: input, shape index: {}]   ;;  %s4415_s12 = inlined_call_operand.hbm [shape: bf16[64,64], index: 12, kind: input, shape index: {}]   ;;  %s4416_s13 = inlined_call_operand.hbm [shape: f32[2,64,64], index: 13, kind: output, shape index: {}]  }
   0x1   :  { %4427 = sst [smem:[#allocation29_spill]] %s4404_s1 }
   0x2   :  { %4428 = sst [smem:[#allocation30_spill]] %s4405_s2 }
   0x3   :  { %4429 = sst [smem:[#allocation31_spill]] %s4406_s3 }
   0x4   :  { %4430 = sst [smem:[#allocation32_spill]] %s4407_s4 }
   0x5   :  { %4431 = sst [smem:[#allocation33_spill]] %s4408_s5 }
   0x6   :  { %4432 = sst [smem:[#allocation34_spill]] %s4410_s7 }
   0x7   :  { %4433 = sst [smem:[#allocation35_spill]] %s4412_s9 }
   0x8   :  { %4434 = sst [smem:[#allocation36_spill]] %s4413_s10 }
   0x9   :  { %4435 = sst [smem:[#allocation37_spill]] %s4414_s11 }
   0xa   :  { %4436 = sst [smem:[#allocation38_spill]] %s4416_s13 }
   0xb   :  { %18 = vsyncpa [#allocation6], 0 }
   0xc   :  { %20 = vsyncpa [#allocation6 + $0x1], 0 }
   0xd   :  { %21 = vsyncpa [#allocation9], 0 }
   0xe   :  { %22 = vsyncpa [#allocation12], 0 }
   0xf   :  { %23 = vsyncpa [#allocation15], 0 }
  0x10   :  { %24 = vsyncpa [#allocation18], 0 }
  0x11   :  { %25 = vsyncpa [#allocation7], 0 }
  0x12   :  { %27 = vsyncpa [#allocation7 + $0x1], 0  ;;  %s3581_s25 = smov 0   ;;  %s3583_s26 = smov 0  }
  0x13   :  { %s3585_s27 = smov 0   ;;  %s3587_s28 = smov 0  }
  0x14   :  { %s3589_s29 = smov 0   ;;  %s3591_s30 = smov 0  }
  0x15   :  { %s3593_s14 = smov 0   ;;  %s3595_s15 = smov 0  }
  0x16 LB: > { %4437 = sst [smem:[#allocation26_spill]] %s3469_s28  ;;  %s4417_s16 = sadd.s32 4294967295, %s3485_s15   ;;  %s3485_s15 = sphi %s3595_s15, %s33_s15   ;;  %s3481_s14 = sphi %s3593_s14, %s4477_s14   ;;  %s3477_s30 = sphi %s3591_s30, %s4476_s30   ;;  %s3473_s29 = sphi %s3589_s29, %s4475_s29   ;;  %s3469_s28 = sphi %s3587_s28, %s4474_s28   ;;  %s3465_s27 = sphi %s3585_s27, %s4473_s27   ;;  %s3461_s26 = sphi %s3583_s26, %s4472_s26   ;;  %s3457_s25 = sphi %s3581_s25, %s4471_s25  }
  0x17   : > { %4438 = sst [smem:[#allocation27_spill]] %s3473_s29  ;;  %p2574_p0 = scmp.ge.s32.totalorder %s3485_s15, 1 }
  0x18   : > { %p3625_p1 = scmp.eq.s32.totalorder %s4417_s16, 0  ;;  %p358_p2 = scmp.lt.s32.totalorder %s3485_s15, 9 }
  0x19   : > { %s3487_s19 = smov [#allocation8]   ;;  %s3488_s22 = smov [#allocation11]  }
  0x1a   : > { %s4439_s17 = scalar_select %p3625_p1, 1, 0 }
  0x1b   : > { %p3630_p3 = pnand %p2574_p0, %p358_p2  ;;  %s370_s20 = sshll.u32 %s3487_s19, 4  ;;  %s3634_s20 = int_to_ptr.vmem [resolvable:$true] %s370_s20 }
  0x1c   : > { %s396_s23 = sshll.u32 %s3488_s22, 4  ;;  %s3489_s24 = smov [#allocation14]   ;;  %s3644_s23 = int_to_ptr.vmem [resolvable:$true] %s396_s23 }
  0x1d   : > { %s4440_s18 = scalar_select %p3630_p3, 1, 0 }
  0x1e   : > { %p2961_p4 = pneg %p3630_p3  ;;  %s3646_s16 = sshll.u32 %s3489_s24, 4  ;;  %s426_s16 = int_to_ptr.vmem [resolvable:$true] %s3646_s16 }
  0x1f   : > { %4441 = sst [smem:[#allocation28_spill]] %s4440_s18  ;;  %s4443_s1 = sld [smem:[#allocation29_spill]] }
  0x20   : > { %p3640_p5 = pnand %p2961_p4, %p3625_p1 }
  0x22   : > { %p3656_p7 = pneg %p3640_p5 }
  0x25   : > { %s3145_s19 = scalar_lea.hbm %s4443_s1, 512 }
  0x26   : > { %p3146_p6 = scmp.ne.s32.totalorder %s4443_s1, %s3145_s19  ;;  %p3152_p10 = scmp.lt.u32.totalorder %s3145_s19, %s4443_s1 }
  0x28   : > { %p3148_p8 = pnand %p3656_p7, %p3146_p6 }
  0x2a   : > { %p3149_p9 = pneg %p3148_p8 }
  0x2c   : > { %p3154_p11 = pnand %p3152_p10, %p3149_p9 }
  0x2e   : > { %3157 = shalt.err (!%p3154_p11)
}
  0x2f   : > { %s3158_s9 = scalar_lea.vmem %s3634_s20, 512  ;;  %p3166_p2 = scmp.lt.s32.totalorder %s3634_s20, %s3634_s20 }
  0x30   : > { %p3159_p12 = scmp.ne.s32.totalorder %s3634_s20, %s3158_s9  ;;  %p3167_p4 = scmp.lt.s32.totalorder %s3158_s9, %s3158_s9 }
  0x32   : > { %p3161_p13 = pnand %p3159_p12, %p3656_p7  ;;  %p3168_p6 = por %p3167_p4, %p3166_p2 }
  0x34   : > { %p3162_p0 = pneg %p3161_p13 }
  0x36   : > { %p3169_p8 = pnand %p3168_p6, %p3162_p0 }
  0x38   : > { %3172 = shalt.err (!%p3169_p8)
}
  0x39   : > { %s4424_s11 = smov 64   ;;  %s4425_s13 = smov 4  }
  0x3a   : > { %2964 = dma.hbm_to_vmem [thread:$0]  (!%p3640_p5), %s4443_s1, 512, %s3634_s20, [#allocation9], %s4424_s11, %s4424_s11, %s4425_s13  }
  0x3b   : > { %s4445_s3 = sld [smem:[#allocation31_spill]] }
  0x41   : > { %s3173_s9 = scalar_lea.hbm %s4445_s3, 512 }
  0x42   : > { %p3174_p9 = scmp.ne.s32.totalorder %s4445_s3, %s3173_s9  ;;  %p3180_p12 = scmp.lt.u32.totalorder %s3173_s9, %s4445_s3 }
  0x44   : > { %p3176_p10 = pnand %p3174_p9, %p3656_p7 }
  0x46   : > { %p3177_p11 = pneg %p3176_p10 }
  0x48   : > { %p3182_p13 = pnand %p3180_p12, %p3177_p11 }
  0x4a   : > { %3185 = shalt.err (!%p3182_p13)
}
  0x4b   : > { %s3186_s20 = scalar_lea.vmem %s3644_s23, 512  ;;  %p3194_p6 = scmp.lt.s32.totalorder %s3644_s23, %s3644_s23 }
  0x4c   : > { %p3187_p0 = scmp.ne.s32.totalorder %s3644_s23, %s3186_s20  ;;  %p3195_p8 = scmp.lt.s32.totalorder %s3186_s20, %s3186_s20 }
  0x4e   : > { %p3189_p2 = pnand %p3187_p0, %p3656_p7  ;;  %p3196_p9 = por %p3195_p8, %p3194_p6 }
  0x50   : > { %p3190_p4 = pneg %p3189_p2 }
  0x52   : > { %p3197_p10 = pnand %p3196_p9, %p3190_p4 }
  0x54   : > { %3200 = shalt.err (!%p3197_p10)
}
  0x55   : > { %2970 = dma.hbm_to_vmem [thread:$0]  (!%p3640_p5), %s4445_s3, 512, %s3644_s23, [#allocation12], %s4424_s11, %s4424_s11, %s4425_s13  }
  0x56   : > { %s3201_s29 = scalar_lea.hbm %s4409_s6, 512 }
  0x57   : > { %p3202_p11 = scmp.ne.s32.totalorder %s4409_s6, %s3201_s29  ;;  %p3208_p0 = scmp.lt.u32.totalorder %s3201_s29, %s4409_s6 }
  0x59   : > { %p3204_p12 = pnand %p3202_p11, %p3656_p7 }
  0x5b   : > { %p3205_p13 = pneg %p3204_p12 }
  0x5d   : > { %p3210_p2 = pnand %p3208_p0, %p3205_p13 }
  0x5f   : > { %3213 = shalt.err (!%p3210_p2)
}
  0x60   : > { %s3214_s20 = scalar_lea.vmem %s426_s16, 512  ;;  %p3222_p9 = scmp.lt.s32.totalorder %s426_s16, %s426_s16 }
  0x61   : > { %p3215_p4 = scmp.ne.s32.totalorder %s426_s16, %s3214_s20  ;;  %p3223_p10 = scmp.lt.s32.totalorder %s3214_s20, %s3214_s20 }
  0x63   : > { %p3217_p6 = pnand %p3215_p4, %p3656_p7  ;;  %p3224_p3 = por %p3223_p10, %p3222_p9 }
  0x65   : > { %p3218_p8 = pneg %p3217_p6 }
  0x67   : > { %p3225_p1 = pnand %p3224_p3, %p3218_p8 }
  0x69   : > { %3228 = shalt.err (!%p3225_p1)
}
  0x6a   : > { %2976 = dma.hbm_to_vmem [thread:$0]  (!%p3640_p5), %s4409_s6, 512, %s426_s16, [#allocation15], %s4424_s11, %s4424_s11, %s4425_s13  }
  0x6b   : > { %s3492_s10 = smov [#allocation10]   ;;  %s3493_s18 = smov [#allocation13]  }
  0x6c   : > { %s383_s28 = sshll.u32 %s3492_s10, 4  ;;  %s409_s29 = sshll.u32 %s3493_s18, 4  ;;  %s384_s28 = int_to_ptr.vmem [resolvable:$true] %s383_s28  ;;  %s410_s29 = int_to_ptr.vmem [resolvable:$true] %s409_s29 }
  0x6d   : > { %s4446_s2 = sld [smem:[#allocation30_spill]] }
  0x73   : > { %s3229_s24 = scalar_lea.hbm %s4446_s2, 512 }
  0x74   : > { %p3230_p1 = scmp.ne.s32.totalorder %s4446_s2, %s3229_s24  ;;  %p3236_p12 = scmp.lt.u32.totalorder %s3229_s24, %s4446_s2 }
  0x76   : > { %p3232_p3 = pnand %p3230_p1, %p3656_p7 }
  0x78   : > { %p3233_p11 = pneg %p3232_p3 }
  0x7a   : > { %p3238_p13 = pnand %p3236_p12, %p3233_p11 }
  0x7c   : > { %3241 = shalt.err (!%p3238_p13)
}
  0x7d   : > { %s3242_s16 = scalar_lea.vmem %s384_s28, 512  ;;  %p3250_p6 = scmp.lt.s32.totalorder %s384_s28, %s384_s28 }
  0x7e   : > { %p3243_p0 = scmp.ne.s32.totalorder %s384_s28, %s3242_s16  ;;  %p3251_p8 = scmp.lt.s32.totalorder %s3242_s16, %s3242_s16 }
  0x80   : > { %p3245_p2 = pnand %p3243_p0, %p3656_p7  ;;  %p3252_p9 = por %p3251_p8, %p3250_p6 }
  0x82   : > { %p3246_p4 = pneg %p3245_p2 }
  0x84   : > { %p3253_p10 = pnand %p3252_p9, %p3246_p4 }
  0x86   : > { %3256 = shalt.err (!%p3253_p10)
}
  0x87   : > { %2967 = dma.hbm_to_vmem [thread:$0]  (!%p3640_p5), %s4446_s2, 512, %s384_s28, [#allocation9], %s4424_s11, %s4424_s11, %s4425_s13  }
  0x88   : > { %s4447_s4 = sld [smem:[#allocation32_spill]] }
  0x8e   : > { %s3257_s19 = scalar_lea.hbm %s4447_s4, 512 }
  0x8f   : > { %p3258_p1 = scmp.ne.s32.totalorder %s4447_s4, %s3257_s19  ;;  %p3264_p12 = scmp.lt.u32.totalorder %s3257_s19, %s4447_s4 }
  0x91   : > { %p3260_p3 = pnand %p3258_p1, %p3656_p7 }
  0x93   : > { %p3261_p11 = pneg %p3260_p3 }
  0x95   : > { %p3266_p13 = pnand %p3264_p12, %p3261_p11 }
  0x97   : > { %3269 = shalt.err (!%p3266_p13)
}
  0x98   : > { %s3270_s23 = scalar_lea.vmem %s410_s29, 512  ;;  %p3278_p6 = scmp.lt.s32.totalorder %s410_s29, %s410_s29 }
  0x99   : > { %p3271_p0 = scmp.ne.s32.totalorder %s410_s29, %s3270_s23  ;;  %p3279_p8 = scmp.lt.s32.totalorder %s3270_s23, %s3270_s23 }
  0x9b   : > { %p3273_p2 = pnand %p3271_p0, %p3656_p7  ;;  %p3280_p9 = por %p3279_p8, %p3278_p6 }
  0x9d   : > { %p3274_p4 = pneg %p3273_p2 }
  0x9f   : > { %p3281_p10 = pnand %p3280_p9, %p3274_p4 }
  0xa1   : > { %3284 = shalt.err (!%p3281_p10)
}
  0xa2   : > { %2973 = dma.hbm_to_vmem [thread:$0]  (!%p3640_p5), %s4447_s4, 512, %s410_s29, [#allocation12], %s4424_s11, %s4424_s11, %s4425_s13  }
  0xa3   : > { %s3494_s1 = smov [#allocation16]   ;;  %s3495_s10 = smov [#allocation17]  }
  0xa4   : > { %s441_s5 = sshll.u32 %s3494_s1, 4  ;;  %s463_s18 = sshll.u32 %s3495_s10, 4  ;;  %s442_s5 = int_to_ptr.vmem [resolvable:$true] %s441_s5  ;;  %s464_s18 = int_to_ptr.vmem [resolvable:$true] %s463_s18 }
  0xa5   : > { %s3285_s24 = scalar_lea.hbm %s4411_s8, 512 }
  0xa6   : > { %p3286_p1 = scmp.ne.s32.totalorder %s4411_s8, %s3285_s24  ;;  %p3292_p12 = scmp.lt.u32.totalorder %s3285_s24, %s4411_s8 }
  0xa8   : > { %p3288_p3 = pnand %p3286_p1, %p3656_p7 }
  0xaa   : > { %p3289_p11 = pneg %p3288_p3 }
  0xac   : > { %p3294_p13 = pnand %p3292_p12, %p3289_p11 }
  0xae   : > { %3297 = shalt.err (!%p3294_p13)
}
  0xaf   : > { %s3298_s29 = scalar_lea.vmem %s442_s5, 512  ;;  %p3306_p6 = scmp.lt.s32.totalorder %s442_s5, %s442_s5 }
  0xb0   : > { %p3299_p0 = scmp.ne.s32.totalorder %s442_s5, %s3298_s29  ;;  %p3307_p8 = scmp.lt.s32.totalorder %s3298_s29, %s3298_s29 }
  0xb2   : > { %p3301_p2 = pnand %p3299_p0, %p3656_p7  ;;  %p3308_p9 = por %p3307_p8, %p3306_p6 }
  0xb4   : > { %p3302_p4 = pneg %p3301_p2 }
  0xb6   : > { %p3309_p10 = pnand %p3308_p9, %p3302_p4 }
  0xb8   : > { %3312 = shalt.err (!%p3309_p10)
}
  0xb9   : > { %2979 = dma.hbm_to_vmem [thread:$0]  (!%p3640_p5), %s4411_s8, 512, %s442_s5, [#allocation15], %s4424_s11, %s4424_s11, %s4425_s13  }
  0xba   : > { %s3313_s22 = scalar_lea.hbm %s4415_s12, 512 }
  0xbb   : > { %p3314_p1 = scmp.ne.s32.totalorder %s4415_s12, %s3313_s22  ;;  %p3320_p12 = scmp.lt.u32.totalorder %s3313_s22, %s4415_s12 }
  0xbd   : > { %p3316_p3 = pnand %p3314_p1, %p3656_p7 }
  0xbf   : > { %p3317_p11 = pneg %p3316_p3 }
  0xc1   : > { %p3322_p13 = pnand %p3320_p12, %p3317_p11 }
  0xc3   : > { %3325 = shalt.err (!%p3322_p13)
}
  0xc4   : > { %s3326_s28 = scalar_lea.vmem %s464_s18, 512  ;;  %p3334_p6 = scmp.lt.s32.totalorder %s464_s18, %s464_s18 }
  0xc5   : > { %p3327_p0 = scmp.ne.s32.totalorder %s464_s18, %s3326_s28  ;;  %p3335_p8 = scmp.lt.s32.totalorder %s3326_s28, %s3326_s28 }
  0xc7   : > { %p3329_p2 = pnand %p3327_p0, %p3656_p7  ;;  %p3336_p9 = por %p3335_p8, %p3334_p6 }
  0xc9   : > { %p3330_p4 = pneg %p3329_p2 }
  0xcb   : > { %p3337_p10 = pnand %p3336_p9, %p3330_p4 }
  0xcd   : > { %3340 = shalt.err (!%p3337_p10)
}
  0xce   : > { %2982 = dma.hbm_to_vmem [thread:$0]  (!%p3640_p5), %s4415_s12, 512, %s464_s18, [#allocation18], %s4424_s11, %s4424_s11, %s4425_s13  }
  0xcf   : > { %s2573_s7 = sadd.s32 4294967294, %s3485_s15   ;;  %s42_s21 = sadd.s32 1, %s3477_s30 }
  0xd0   : > { %s45_s16 = sadd.s32 1, %s3481_s14  ;;  %p43_p7 = scmp.ge.s32.totalorder %s42_s21, 4 }
  0xd1   : > { %s54_s1 = sadd.s32 1, %s3465_s27  ;;  %p61_p1 = scmp.ne.s32.totalorder %s3465_s27, %s3461_s26 }
  0xd2   : > { %p62_p3 = scmp.eq.s32.totalorder %s3485_s15, 0  ;;  %s4479_s21 = smov (%p43_p7, %s42_s21), 0 }
  0xd3   : > { %s4481_s16 = smov (!%p43_p7, %s45_s16), %s3481_s14  ;;  %s50_s10 = ssub.s32 %s3477_s30, %s4479_s21 }
  0xd4   : > { %p3824_p11 = por %p62_p3, %p61_p1  ;;  %p47_p5 = scmp.ge.s32.totalorder %s4481_s16, 2 }
  0xd5   : > { %p67_p12 = scmp.ne.s32.totalorder %s3461_s26, %s3457_s25  ;;  %s4449_s18 = sadd.s32 4294967295, %s3485_s15  }
  0xd6   : > { %p345_p13 = scmp.eq.s32.totalorder %s4449_s18, 7  ;;  %p351_p0 = scmp.eq.s32.totalorder %s2573_s7, 7 }
  0xd7   : > { %s4483_s16 = smov (%p47_p5, %s4481_s16), 0  ;;  %p4450_p2 = scmp.ne.s32.totalorder %s4439_s17, 0 }
  0xd8   : > { %p3840_p6 = por %p345_p13, %p61_p1  ;;  %s49_s9 = ssub.s32 %s3481_s14, %s4483_s16 }
  0xd9   : > { %p3836_p4 = por %p4450_p2, %p67_p12  ;;  %p3846_p8 = por %p351_p0, %p67_p12 }
  0xda   : > { %s4452_s24 = scalar_select %p3840_p6, 1, 0 }
  0xdb   : > { %s4453_s20 = scalar_select %p3846_p8, 1, 0 }
  0xdc   : > { %s51_s23 = sor.u32 %s50_s10, %s49_s9  ;;  %p2998_p9 = scmp.lt.s32.totalorder %s3485_s15, 8 }
  0xdd   : > { %p52_p10 = scmp.eq.s32.totalorder %s51_s23, 0  ;;  %s477_s28 = sand.u32 1, %s3465_s27  }
  0xde   : > { %s2583_s5 = sshll.u32 %s477_s28, 3  ;;  %s2584_s7 = sshll.u32 %s3477_s30, 1 }
  0xdf   : > { %s3853_s29 = scalar_select %p52_p10, %s3465_s27, %s54_s1  }
  0xe0   : > { %s2585_s18 = sshll.u32 %s3481_s14, 3  ;;  %s481_s11 = scalar_lea.vmem [#allocation5], %s2583_s5 }
  0xe1   : > { %s490_s13 = sshll.u32 %s481_s11, 4  ;;  %s487_s2 = sadd.s32 %s2585_s18, %s2584_s7  ;;  %s3857_s13 = int_to_ptr.vmem [resolvable:$true] %s490_s13 }
  0xe2   : > { %s2586_s3 = sshll.u32 %s487_s2, 6  ;;  %p3861_p7 = pnand %p2998_p9, %p3824_p11 }
  0xe3   : > { %s3868_s1 = scalar_lea.hbm %s4403_s0, %s2586_s3  ;;  %s3870_s11 = scalar_lea.sflag [#allocation6], %s477_s28 }
  0xe4   : > { %s3341_s23 = scalar_lea.hbm %s3868_s1, 128  ;;  %p3343_p3 = pneg %p3861_p7 }
  0xe5   : > { %p3342_p1 = scmp.ne.s32.totalorder %s3868_s1, %s3341_s23  ;;  %s3346_s5 = scalar_lea.hbm %s4403_s0, 1024 }
  0xe6   : > { %p3347_p12 = scmp.lt.u32.totalorder %s3868_s1, %s4403_s0  ;;  %p3348_p13 = scmp.lt.u32.totalorder %s3346_s5, %s3341_s23 }
  0xe7   : > { %p3344_p11 = pnand %p3343_p3, %p3342_p1  ;;  %p3350_p2 = scmp.lt.u32.totalorder %s3341_s23, %s3868_s1 }
  0xe8   : > { %p3349_p0 = por %p3348_p13, %p3347_p12 }
  0xe9   : > { %p3345_p5 = pneg %p3344_p11 }
  0xea   : > { %p3351_p9 = por %p3350_p2, %p3349_p0 }
  0xec   : > { %p3352_p10 = pnand %p3351_p9, %p3345_p5 }
  0xee   : > { %3355 = shalt.err (!%p3352_p10)
}
  0xef   : > { %s3356_s28 = scalar_lea.vmem %s3857_s13, 128  ;;  %s3496_s18 = smov [#allocation5]  }
  0xf0   : > { %p3357_p1 = scmp.ne.s32.totalorder %s3857_s13, %s3356_s28  ;;  %s3361_s10 = sshll.u32 %s3496_s18, 4  ;;  %s3362_s10 = int_to_ptr.vmem [resolvable:$false] %s3361_s10 }
  0xf1   : > { %s3363_s9 = scalar_lea.vmem %s3362_s10, 256  ;;  %p3364_p6 = scmp.lt.s32.totalorder %s3857_s13, %s3362_s10 }
  0xf2   : > { %p3359_p11 = pnand %p3357_p1, %p3343_p3  ;;  %p3365_p12 = scmp.lt.s32.totalorder %s3363_s9, %s3356_s28 }
  0xf4   : > { %p3360_p8 = pneg %p3359_p11  ;;  %p3366_p13 = por %p3365_p12, %p3364_p6 }
  0xf6   : > { %p3367_p0 = pnand %p3366_p13, %p3360_p8 }
  0xf8   : > { %3370 = shalt.err (!%p3367_p0)
}
  0xf9   : > { %s4455_s23 = smov 4   ;;  %s4456_s2 = smov 64  }
  0xfa   : > { %2986 = dma.hbm_to_vmem [thread:$0]  (!%p3861_p7), %s3868_s1, 128, %s3857_s13, %s3870_s11, %s4456_s2, %s4456_s2, %s4455_s23  }
  0xfb   : > { %s4457_s19 = sld [smem:[#allocation28_spill]] }
 0x101   : > { %p4458_p3 = scmp.ne.s32.totalorder %s4457_s19, 0 }
 0x102   : > { %s3904_s5 = sand.u32 (!%p4458_p3), 1, %s3461_s26  }
 0x103   : > { %502 = sbr.rel (%p4458_p3) target bundleno = 1849 (0x739), region = 72  ;;  %s2588_s3 = sshll.u32 (!%p4458_p3), %s3904_s5, 3 }
 0x104   : > { %s505_s7 = scalar_lea.sflag (!%p4458_p3), [#allocation6], %s3904_s5  ;;  %s3908_s28 = scalar_lea.vmem (!%p4458_p3), [#allocation5], %s2588_s3 }
 0x10a   : > { %3432 = dma.done.wait (%p3836_p4), %s505_s7, 128  }
 0x10b   : > { %3434 = vsyncadd (%p3836_p4), %s505_s7, 4294967168  ;;  %p4459_p6 = scmp.ne.s32.totalorder %s4439_s17, 0 }
 0x10d   : > { %3436 = dma.done.wait (%p4459_p6), [#allocation9], 1024  }
 0x10e   : > { %3438 = vsyncadd (%p4459_p6), [#allocation9], 4294966272 }
 0x10f   : > { %3440 = dma.done.wait (%p4459_p6), [#allocation12], 1024  }
 0x110   : > { %3442 = vsyncadd (%p4459_p6), [#allocation12], 4294966272 }
 0x111   : > { %3444 = dma.done.wait (%p4459_p6), [#allocation15], 1024  }
 0x112   : > { %3446 = vsyncadd (%p4459_p6), [#allocation15], 4294966272 }
 0x113   : > { %3448 = dma.done.wait (%p4459_p6), [#allocation18], 512  }
 0x114   : > { %3450 = vsyncadd (%p4459_p6), [#allocation18], 4294966784  ;;  %s2596_s4 = sshll.u32 %s3904_s5, 4  ;;  %s4460_s22 = sld [smem:[#allocation26_spill]] }
 0x115   : > { %s3931_s13 = scalar_lea.vmem [#allocation19], %s2596_s4 }
 0x11a   : > { %p2597_p4 = scmp.ne.s32.totalorder %s4460_s22, 0 }
 0x11b   : > { %vm587_vm0 = vcmask (!%p2597_p4), 130048   ;;  %vm596_vm1 = vcmask (!%p2597_p4), 122880   ;;  %v3497_v0 = vmov (!%p2597_p4), 0.0  }
 0x11c   : > { %586 = sbr.rel (%p2597_p4) target bundleno = 291 (0x123), region = 108  ;;  %588 = vst.msk [vmem:[#allocation2] sm:$0xff] (!%p2597_p4), %vm587_vm0, %v3497_v0  ;;  %589 = vst.msk [vmem:[#allocation2 + $0x8] sm:$0xff] (!%p2597_p4), %vm587_vm0, %v3497_v0 }
 0x11d   : > { %590 = vst.msk [vmem:[#allocation2 + $0x10] sm:$0xff] (!%p2597_p4), %vm587_vm0, %v3497_v0  ;;  %591 = vst.msk [vmem:[#allocation2 + $0x18] sm:$0xff] (!%p2597_p4), %vm587_vm0, %v3497_v0 }
 0x11e   : > { %592 = vst.msk [vmem:[#allocation2 + $0x20] sm:$0xff] (!%p2597_p4), %vm587_vm0, %v3497_v0  ;;  %593 = vst.msk [vmem:[#allocation2 + $0x28] sm:$0xff] (!%p2597_p4), %vm587_vm0, %v3497_v0 }
 0x11f   : > { %594 = vst.msk [vmem:[#allocation2 + $0x30] sm:$0xff] (!%p2597_p4), %vm587_vm0, %v3497_v0  ;;  %595 = vst.msk [vmem:[#allocation2 + $0x38] sm:$0xff] (!%p2597_p4), %vm587_vm0, %v3497_v0 }
 0x120   : > { %597 = vst.msk [vmem:[#allocation3] sm:$0x1] (!%p2597_p4), %vm596_vm1, %v3497_v0  ;;  %598 = vst.msk [vmem:[#allocation3 + $0x1] sm:$0x1] (!%p2597_p4), %vm596_vm1, %v3497_v0 }
 0x121   : > { %599 = vst.msk [vmem:[#allocation3 + $0x2] sm:$0x1] (!%p2597_p4), %vm596_vm1, %v3497_v0  ;;  %600 = vst.msk [vmem:[#allocation3 + $0x3] sm:$0x1] (!%p2597_p4), %vm596_vm1, %v3497_v0 }
 0x123 PF: > { %v3096_v1 = vld [vmem:[#allocation8] sm:$0xff]   ;;  %v3498_v2 = vmov 0.0   ;;  %v3097_v3 = vld [vmem:[#allocation8 + $0x8] sm:$0xff]   ;;  %vm3499_vm2 = vmmov 0   ;;  %v3098_v5 = vld [vmem:[#allocation8 + $0x10] sm:$0xff]   ;;  %vm640_vm3 = vcmask 523264  }
 0x124   : > { %2737 = vmatprep.subr.bf16.mxu0 %v3498_v2  ;;  %2749 = vmatprep.subr.bf16.mxu1 %v3498_v2  ;;  %v3100_v4 = vld [vmem:[#allocation10] sm:$0xff]   ;;  %v3102_v6 = vld [vmem:[#allocation10 + $0x8] sm:$0xff]   ;;  %v3099_v7 = vld [vmem:[#allocation8 + $0x18] sm:$0xff]   ;;  %s4461_s11 = sld [smem:[#allocation36_spill]]  ;;  %s4463_s17 = sld [smem:[#allocation34_spill]]  ;;  %vm1631_vm4 = vcmask 261248  }
 0x125   : > { %2738 = vmatpush3.bf16.msra.mxu0 %v3096_v1  ;;  %2745 = vmatprep.mubr.msk.bf16.mxu0 %vm3499_vm2, %v3498_v2  ;;  %v3103_v8 = vld [vmem:[#allocation10 + $0x10] sm:$0xff]   ;;  %v3104_v10 = vld [vmem:[#allocation10 + $0x18] sm:$0xff]   ;;  %v3105_v11 = vld [vmem:[#allocation11] sm:$0xff]   ;;  %s4464_s10 = sld [smem:[#allocation35_spill]]  ;;  %s4465_s2 = sld [smem:[#allocation37_spill]]  ;;  %vm1927_vm5 = vcmask 392448  }
 0x126   : > { %2739 = vmatprep.subr.bf16.mxu0 %v3498_v2  ;;  %2757 = vmatprep.mubr.msk.bf16.mxu1 %vm3499_vm2, %v3498_v2  ;;  %v3101_v9 = vld [vmem:[%s3908_s28] sm:$0xff]   ;;  %v3106_v12 = vld [vmem:[#allocation11 + $0x8] sm:$0xff]   ;;  %v3109_v13 = vld [vmem:[#allocation13] sm:$0xff]   ;;  %s4462_s28 = sld [smem:[#allocation33_spill]]  ;;  %vm1172_vm6 = vcmask 130048   ;;  %vm2223_vm7 = vcmask 523648  }
 0x127   : > { %2750 = vmatpush3.bf16.msra.mxu1 %v3100_v4  ;;  %v3107_v14 = vld [vmem:[#allocation11 + $0x10] sm:$0xff]   ;;  %v3111_v15 = vld [vmem:[#allocation13 + $0x8] sm:$0xff]   ;;  %v3108_v16 = vld [vmem:[#allocation11 + $0x18] sm:$0xff]   ;;  %s3500_s19 = smov 96   ;;  %s3501_s3 = smov 112   ;;  %vm1427_vm8 = vcmask 122880  }
 0x128   : > { %2751 = vmatprep.subr.bf16.mxu1 %v3498_v2  ;;  %v3113_v17 = vld [vmem:[#allocation13 + $0x10] sm:$0xff]   ;;  %v3110_v18 = vld [vmem:[#allocation14] sm:$0xff]   ;;  %v3112_v19 = vld [vmem:[#allocation14 + $0x8] sm:$0xff]   ;;  %s3502_s7 = smov 80   ;;  %s3504_s4 = smov 48  }
 0x129   : > { %2740 = vmatpush3.bf16.msra.mxu0 %v3097_v3  ;;  %v3114_v20 = vld [vmem:[#allocation14 + $0x10] sm:$0xff]   ;;  %v3115_v21 = vld [vmem:[#allocation13 + $0x18] sm:$0xff]   ;;  %v3117_v26 = vld [vmem:[#allocation16] sm:$0xff]   ;;  %s3505_s22 = smov 32   ;;  %s4467_s1 = sld [smem:[#allocation27_spill]] }
 0x12a   : > { %2741 = vmatprep.subr.bf16.mxu0 %v3498_v2  ;;  %v3116_v22 = vld [vmem:[#allocation14 + $0x18] sm:$0xff]   ;;  %v3118_v27 = vld [vmem:[%s4461_s11] sm:$0xff]   ;;  %v3120_v33 = vld [vmem:[%s4461_s11 + $0x8] sm:$0xff]   ;;  %p4469_p7 = scmp.ne.s32.totalorder %s4452_s24, 0 }
 0x12b   : > { %2752 = vmatpush3.bf16.msra.mxu1 %v3102_v6  ;;  %v3119_v32 = vld [vmem:[#allocation16 + $0x8] sm:$0xff]   ;;  %v3121_v37 = vld [vmem:[#allocation16 + $0x10] sm:$0xff]   ;;  %v3123_v39 = vld [vmem:[#allocation16 + $0x18] sm:$0xff]  }
 0x12c   : > { %2753 = vmatprep.subr.bf16.mxu1 %v3498_v2  ;;  %v3122_v38 = vld [vmem:[%s4461_s11 + $0x10] sm:$0xff]   ;;  %v3124_v40 = vld [vmem:[%s4461_s11 + $0x18] sm:$0xff]   ;;  %v2614_v46 = vld [vmem:[%s4462_s28] ss:$0 sm:$0xff]  ;;  %s3503_s28 = smov 16  }
 0x12d   : > { %2742 = vmatpush3.bf16.msra.mxu0 %v3098_v5  ;;  %v2620_v47 = vld [vmem:[%s4463_s17] ss:$0 sm:$0xff]  ;;  %s4466_s17 = sld [smem:[#allocation26_spill]] }
 0x12e   : > { %2743 = vmatprep.subr.bf16.mxu0 %v3498_v2  ;;  %v2626_v62 = vld [vmem:[%s4464_s10] ss:$0 sm:$0xff] }
 0x12f   : > { %2754 = vmatpush3.bf16.msra.mxu1 %v3103_v8  ;;  %v2632_v63 = vld [vmem:[%s4465_s2] ss:$0 sm:$0xff]  ;;  %s2661_s10 = sshll.u32 %s4467_s1, 3  ;;  %s2415_s2 = sshll.u32 %s3931_s13, 4  ;;  %s4345_s2 = int_to_ptr.vmem [resolvable:$true] %s2415_s2 }
 0x130   : > { %2755 = vmatprep.subr.bf16.mxu1 %v3498_v2 }
 0x131   : > { %2744 = vmatpush3.bf16.msra.mxu0 %v3099_v7 }
 0x132   : > { %2761 = vmatprep.subr.bf16.mxu0 %v3498_v2 }
 0x133   : > { %2756 = vmatpush3.bf16.msra.mxu1 %v3104_v10  ;;  %s2660_s18 = sshll.u32 %s4466_s17, 1  ;;  %s3508_s17 = smov [#allocation19]  }
 0x134   : > { %2746 = vmatmul.mubr.msk.bf16.vlgmr.msra.gmra.mrb[0].mxu0 %vm640_vm3, %v3101_v9  ;;  %2773 = vmatprep.subr.bf16.mxu1 %v3498_v2  ;;  %s2412_s9 = sadd.s32 %s2661_s10, %s2660_s18  ;;  %s3375_s1 = sshll.u32 %s3508_s17, 4  ;;  %s3376_s1 = int_to_ptr.vmem [resolvable:$false] %s3375_s1 }
 0x135   : > { %2762 = vmatpush3.bf16.msra.mxu0 %v3105_v11  ;;  %2769 = vmatprep.mubr.msk.bf16.mxu0 %vm3499_vm2, %v3498_v2  ;;  %s2662_s23 = sshll.u32 %s2412_s9, 7  ;;  %s3377_s18 = scalar_lea.vmem %s3376_s1, 512 }
 0x136   : > { %2763 = vmatprep.subr.bf16.mxu0 %v3498_v2  ;;  %2758 = vmatmul.mubr.msk.bf16.vlgmr.msra.gmra.mrb[0].mxu1 %vm640_vm3, %v3101_v9  ;;  %p3378_p9 = scmp.lt.s32.totalorder %s4345_s2, %s3376_s1 }
 0x137   : > { %2774 = vmatpush3.bf16.msra.mxu1 %v3109_v13  ;;  %2781 = vmatprep.mubr.msk.bf16.mxu1 %vm3499_vm2, %v3498_v2 }
 0x138   : > { %2775 = vmatprep.subr.bf16.mxu1 %v3498_v2 }
 0x139   : > { %2764 = vmatpush3.bf16.msra.mxu0 %v3106_v12 }
 0x13a   : > { %2765 = vmatprep.subr.bf16.mxu0 %v3498_v2 }
 0x13b   : > { %2776 = vmatpush3.bf16.msra.mxu1 %v3111_v15 }
 0x13c   : > { %2777 = vmatprep.subr.bf16.mxu1 %v3498_v2 }
 0x13d   : > { %2766 = vmatpush3.bf16.msra.mxu0 %v3107_v14 }
 0x13e   : > { %2767 = vmatprep.subr.bf16.mxu0 %v3498_v2 }
 0x13f   : > { %2778 = vmatpush3.bf16.msra.mxu1 %v3113_v17 }
 0x140   : > { %2779 = vmatprep.subr.bf16.mxu1 %v3498_v2 }
 0x141   : > { %2768 = vmatpush3.bf16.msra.mxu0 %v3108_v16 }
 0x142   : > { %2785 = vmatprep.subr.bf16.mxu0 %v3498_v2 }
 0x143   : > { %2780 = vmatpush3.bf16.msra.mxu1 %v3115_v21 }
 0x144   : > { %2770 = vmatmul.mubr.msk.bf16.vlgmr.msra.gmra.mrb[4].mxu0 %vm640_vm3, %v3101_v9  ;;  %2797 = vmatprep.subr.bf16.mxu1 %v3498_v2 }
 0x145   : > { %2786 = vmatpush3.bf16.msra.mxu0 %v3110_v18  ;;  %2793 = vmatprep.mubr.msk.bf16.mxu0 %vm3499_vm2, %v3498_v2 }
 0x146   : > { %2787 = vmatprep.subr.bf16.mxu0 %v3498_v2 }
 0x149   : > { %2788 = vmatpush3.bf16.msra.mxu0 %v3112_v19 }
 0x14a   : > { %2789 = vmatprep.subr.bf16.mxu0 %v3498_v2 }
 0x14d   : > { %2790 = vmatpush3.bf16.msra.mxu0 %v3114_v20 }
 0x14e   : > { %2791 = vmatprep.subr.bf16.mxu0 %v3498_v2 }
 0x151   : > { %2792 = vmatpush3.bf16.msra.mxu0 %v3116_v22 }
 0x152   : > { %2809 = vmatprep.subr.bf16.mxu0 %v3498_v2 }
 0x207   : > { %v678_v23 = vpop.f32.mrb[0].mxu0 }
 0x208   : > { %v2747_v24 = vpop.f32.mrb[1].mxu0 }
 0x209   : > { %v681_v25 = vpop.f32.mrb[2].mxu0  ;;  %v751_v30 = vpop.f32.mrb[0].mxu1 }
 0x20a   : > { %v831_v28 = vpack.c.bf16 %v681_v25, %v678_v23  ;;  %v2748_v29 = vpop.f32.mrb[3].mxu0  ;;  %v2759_v31 = vpop.f32.mrb[1].mxu1 }
 0x20b   : > { %v754_v34 = vpop.f32.mrb[2].mxu1 }
 0x20c   : > { %2782 = vmatmul.mubr.msk.bf16.vlgmr.msra.gmra.mrb[4].mxu1 %vm640_vm3, %v831_v28  ;;  %2794 = vmatmul.mubr.msk.bf16.vlgmr.msra.gmra.mrb[8].mxu0 %vm640_vm3, %v831_v28  ;;  %v997_v35 = vpack.c.bf16 %v754_v34, %v751_v30  ;;  %v2760_v36 = vpop.f32.mrb[3].mxu1 }
 0x20d   : > { %2798 = vmatpush3.bf16.msra.mxu1 %v3117_v26  ;;  %2810 = vmatpush3.bf16.msra.mxu0 %v3118_v27 }
 0x20e   : > { %2799 = vmatprep.subr.bf16.mxu1 %v3498_v2  ;;  %2811 = vmatprep.subr.bf16.mxu0 %v3498_v2 }
 0x20f   : > { %2805 = vmatprep.mubr.msk.bf16.mxu1 %vm3499_vm2, %v3498_v2  ;;  %2817 = vmatprep.mubr.msk.bf16.mxu0 %vm3499_vm2, %v3498_v2 }
 0x211   : > { %2800 = vmatpush3.bf16.msra.mxu1 %v3119_v32  ;;  %2812 = vmatpush3.bf16.msra.mxu0 %v3120_v33 }
 0x212   : > { %2801 = vmatprep.subr.bf16.mxu1 %v3498_v2  ;;  %2813 = vmatprep.subr.bf16.mxu0 %v3498_v2 }
 0x215   : > { %2802 = vmatpush3.bf16.msra.mxu1 %v3121_v37  ;;  %2814 = vmatpush3.bf16.msra.mxu0 %v3122_v38  ;;  %v4058_v37 = vld [vmem:[#allocation3] sm:$0x1] }
 0x216   : > { %2803 = vmatprep.subr.bf16.mxu1 %v3498_v2  ;;  %2815 = vmatprep.subr.bf16.mxu0 %v3498_v2 }
 0x217   : > { %v824_v41 = vpop.f32.mrb[4].mxu0 }
 0x218   : > { %v2771_v42 = vpop.f32.mrb[5].mxu0 }
 0x219   : > { %2804 = vmatpush3.bf16.msra.mxu1 %v3123_v39  ;;  %2816 = vmatpush3.bf16.msra.mxu0 %v3124_v40  ;;  %v827_v43 = vpop.f32.mrb[6].mxu0  ;;  %v1163_v39 = vlaneseq }
 0x21a   : > { %v3994_v44 = vpack.c.bf16 %v827_v43, %v824_v41  ;;  %v2772_v45 = vpop.f32.mrb[7].mxu0  ;;  %2821 = vmatprep.subr.bf16.mxu1 %v3498_v2  ;;  %2845 = vmatprep.subr.bf16.mxu0 %v3498_v2  ;;  %v4067_v41 = vld [vmem:[#allocation3 + $0x1] sm:$0x1] }
 0x21b   : > { %v4065_v40 = vshrl.u32 %v1163_v39, 7  ;;  %v4076_v45 = vld [vmem:[#allocation3 + $0x3] sm:$0x1] }
 0x21c   : > { %2806 = vmatmul.mubr.msk.bf16.vlgmr.msra.gmra.mrb[8].mxu1 %vm640_vm3, %v997_v35  ;;  %2818 = vmatmul.mubr.msk.bf16.vlgmr.msra.gmra.mrb[12].mxu0 %vm640_vm3, %v997_v35  ;;  %v1225_v34 = vsel %vm1172_vm6, %v3994_v44, 1065369472 }
 0x21d   : > { %2823 = vmatprep.mubr.msk.bf16.mxu1 %vm3499_vm2, %v3498_v2  ;;  %2847 = vmatprep.mubr.msk.bf16.mxu0 %vm3499_vm2, %v3498_v2  ;;  %v4070_v42 = vsub.s32 0, %v4065_v40 }
 0x21f   : > { %v1588_v43 = vrot.slane %v4067_v41, %v4070_v42 }
 0x2df   : > { %v917_v48 = vpop.f32.mrb[4].mxu1  ;;  %v988_v49 = vpop.f32.mrb[8].mxu0 }
 0x2e0   : > { %v918_v50 = vadd.f32 %v2614_v46, %v917_v48  ;;  %v989_v51 = vadd.f32 %v2620_v47, %v988_v49  ;;  %v2783_v52 = vpop.f32.mrb[5].mxu1  ;;  %v2795_v53 = vpop.f32.mrb[9].mxu0  ;;  %v4084_v49 = vld [vmem:[#allocation2 + $0x10] sm:$0xff] }
 0x2e1   : > { %v920_v54 = vpop.f32.mrb[6].mxu1  ;;  %v991_v55 = vpop.f32.mrb[10].mxu0  ;;  %v4090_v53 = vld [vmem:[#allocation3 + $0x2] sm:$0x1] }
 0x2e2   : > { %v4010_v56 = vmul.f32 %v989_v51, %v918_v50  ;;  %v921_v57 = vadd.f32 %v2614_v46, %v920_v54  ;;  %v992_v58 = vadd.f32 %v2620_v47, %v991_v55  ;;  %v2784_v59 = vpop.f32.mrb[7].mxu1  ;;  %v2796_v60 = vpop.f32.mrb[11].mxu0  ;;  %v2180_v46 = vrot.slane %v4076_v45, %v4070_v42  ;;  %v4086_v50 = vld [vmem:[#allocation2 + $0x18] sm:$0xff] }
 0x2e3   : > { %v1540_v52 = vpack.c.bf16 %v4086_v50, %v4084_v49  ;;  %v1884_v55 = vrot.slane %v4090_v53, %v4070_v42  ;;  %v4106_v59 = vld [vmem:[#allocation2 + $0x28] sm:$0xff] }
 0x2e4   : > { %v4012_v61 = vmul.f32 %v992_v58, %v921_v57  ;;  %v4104_v58 = vld [vmem:[#allocation2 + $0x20] sm:$0xff] }
 0x2e5   : > { %v1836_v60 = vpack.c.bf16 %v4106_v59, %v4104_v58 }
 0x2e6   : > { %v4039_v30 = vpack.c.bf16 %v4012_v61, %v4010_v56 }
 0x2ef   : > { %v1083_v0 = vpop.f32.mrb[8].mxu1  ;;  %v1154_v1 = vpop.f32.mrb[12].mxu0 }
 0x2f0   : > { %v1084_v3 = vadd.f32 %v2626_v62, %v1083_v0  ;;  %v1155_v4 = vadd.f32 %v2632_v63, %v1154_v1  ;;  %v2807_v5 = vpop.f32.mrb[9].mxu1  ;;  %v2819_v6 = vpop.f32.mrb[13].mxu0 }
 0x2f1   : > { %v1086_v7 = vpop.f32.mrb[10].mxu1  ;;  %v1157_v8 = vpop.f32.mrb[14].mxu0 }
 0x2f2   : > { %v1161_v9 = vmul.f32 %v1155_v4, %v1084_v3  ;;  %v1087_v10 = vadd.f32 %v2626_v62, %v1086_v7  ;;  %v1158_v11 = vadd.f32 %v2632_v63, %v1157_v8  ;;  %v2808_v12 = vpop.f32.mrb[11].mxu1  ;;  %v2820_v13 = vpop.f32.mrb[15].mxu0  ;;  %v4122_v3 = vld [vmem:[#allocation2 + $0x30] sm:$0xff]  ;;  %v4124_v4 = vld [vmem:[#allocation2 + $0x38] sm:$0xff] }
 0x2f3   : > { %v2132_v5 = vpack.c.bf16 %v4124_v4, %v4122_v3  ;;  %v4145_v12 = vadd.s32 8, %v4065_v40 }
 0x2f4   : > { %v1162_v14 = vmul.f32 %v1158_v11, %v1087_v10  ;;  %v1417_v15 = vsel %vm1172_vm6, %v1161_v9, 0.0  ;;  %v1699_v16 = vsel %vm1631_vm4, %v1161_v9, 0.0  ;;  %v1995_v17 = vsel %vm1927_vm5, %v1161_v9, 0.0 }
 0x2f5   : > { %v2291_v26 = vsel %vm2223_vm7, %v1161_v9, 0.0  ;;  %v4142_v11 = vand.u32 127, %v1163_v39 }
 0x2f6   : > { %v1418_v18 = vsel %vm1172_vm6, %v1162_v14, 0.0  ;;  %v1171_v19 = vpack.c.bf16 %v1162_v14, %v1161_v9  ;;  %v1700_v20 = vsel %vm1631_vm4, %v1162_v14, 0.0  ;;  %v1996_v21 = vsel %vm1927_vm5, %v1162_v14, 0.0 }
 0x2f7   : > { %v1419_v22 = vadd.f32 %v1418_v18, %v1417_v15  ;;  %v4026_v23 = vadd.f32 %v1700_v20, %v1699_v16  ;;  %v4028_v24 = vadd.f32 %v1996_v21, %v1995_v17  ;;  %v2292_v27 = vsel %vm2223_vm7, %v1162_v14, 0.0  ;;  %v4151_v15 = vld [vmem:[#allocation2] sm:$0xff]  ;;  %v4153_v16 = vld [vmem:[#allocation2 + $0x8] sm:$0xff] }
 0x2f8   : > { %1730 = vrot.lane.b32.xlu1 %v1171_v19, %s3500_s19  ;;  %1433 = vrot.lane.b32.xlu0 %v1171_v19, %s3501_s3  ;;  %v1177_v25 = vsel %vm1172_vm6, %v1171_v19, 0  ;;  %v4035_v29 = vadd.f32 %v2292_v27, %v2291_v26  ;;  %vm1168_vm9 = vcmp.ge.s32.totalorder %v4065_v40, %v4142_v11  ;;  %vm1169_vm10 = vcmp.ge.s32.totalorder %v4145_v12, %v4142_v11 }
 0x2f9   : > { %2822 = vmatpush3.bf16.xpose.msra.mxu1 %v1177_v25  ;;  %v1420_v28 = vrot.slane %v1419_v22, 4 }
 0x2fa   : > { %2827 = vmatprep.subr.bf16.mxu1 %v3498_v2 }
 0x2fb   : > { %v1421_v31 = vadd.f32 %v1420_v28, %v1419_v22  ;;  %v1275_v22 = vpack.c.bf16 %v4153_v16, %v4151_v15 }
 0x2fc   : > { %1728 = vrot.lane.b32.xlu1 %v4039_v30, %s3500_s19  ;;  %1430 = vrot.lane.b32.xlu0 %v4039_v30, %s3501_s3 }
 0x2fd   : > { %v1422_v32 = vrot.slane %v1421_v31, 2 }
 0x2ff   : > { %v1423_v33 = vadd.f32 %v1422_v32, %v1421_v31 }
 0x300   : > { %2024 = vrot.lane.b32.xlu1 %v4039_v30, %s3502_s7  ;;  %2026 = vrot.lane.b32.xlu0 %v1171_v19, %s3502_s7 }
 0x301   : > { %2824 = vmatmul.mubr.msk.bf16.vlgmr.msra.gmra.mrb[12].mxu1 %vm1172_vm6, %v4039_v30  ;;  %v1424_v35 = vrot.slane %v1423_v33, 1 }
 0x302   : > { %2828 = vmatpush3.bf16.msra.mxu1 %v1225_v34  ;;  %2829 = vmatprep.mubr.msk.bf16.mxu1 %vm3499_vm2, %v3498_v2 }
 0x303   : > { %2833 = vmatprep.subr.bf16.mxu1 %v3498_v2  ;;  %v1425_v36 = vadd.f32 %v1424_v35, %v1423_v33 }
 0x304   : > { %1485 = vrot.lane.b32.xlu0 %v3994_v44, %s3501_s3 }
 0x305   : > { %v1426_v38 = vadd.f32 %v1425_v36, %v4058_v37 }
 0x307   : > { %1428 = vst.msk [vmem:[#allocation3] sm:$0x1] %vm1427_vm8, %v1426_v38 }
 0x308   : > { %1781 = vrot.lane.b32.xlu0 %v3994_v44, %s3500_s19 }
 0x323   : > { %1353 = vxpose.xlu1.c.b16.start.end [1/1] (short) (narrow) %v1171_v19, 16 }
 0x327   : > { %2077 = vrot.lane.b32.xlu1 %v3994_v44, %s3502_s7 }
 0x32b   : > { %1589 = vrot.lane.b32.xlu1 %v1588_v43, %s3503_s28 }
 0x32f   : > { %2181 = vrot.lane.b32.xlu1 %v2180_v46, %s3504_s4 }
 0x36a   : > { %v1434_v47 = vpop.permute.xlu0 %1433  ;;  %v1731_v51 = vpop.permute.xlu1 %1730 }
 0x36b   : > { %v1439_v48 = vsel %vm1172_vm6, %v1434_v47, 0  ;;  %1634 = vxpose.xlu0.c.b16.start.end [1/1] (short) (narrow) %v1434_v47, 16  ;;  %v1736_v57 = vsel %vm1172_vm6, %v1731_v51, 0 }
 0x36c   : > { %2846 = vmatpush3.bf16.xpose.msra.mxu0 %v1439_v48 }
 0x36d   : > { %2857 = vmatprep.subr.bf16.mxu0 %v3498_v2 }
 0x36e   : > { %v1431_v54 = vpop.permute.xlu0 %1430  ;;  %v1729_v62 = vpop.permute.xlu1 %1728 }
 0x36f   : > { %1930 = vxpose.xlu0.c.b16.start.end [1/1] (short) (narrow) %v1731_v51, 16 }
 0x372   : > { %v4114_v63 = vpop.permute.xlu0 %2026  ;;  %v2025_v1 = vpop.permute.xlu1 %2024 }
 0x373   : > { %2848 = vmatmul.mubr.msk.bf16.vlgmr.msra.gmra.mrb[16].mxu0 %vm1172_vm6, %v1431_v54  ;;  %v2032_v0 = vsel %vm1172_vm6, %v4114_v63, 0 }
 0x374   : > { %2858 = vmatpush3.bf16.msra.mxu0 %v1540_v52  ;;  %2859 = vmatprep.mubr.msk.bf16.mxu0 %vm3499_vm2, %v3498_v2 }
 0x375   : > { %2869 = vmatprep.subr.bf16.mxu0 %v3498_v2 }
 0x376   : > { %v1486_v13 = vpop.permute.xlu0 %1485 }
 0x377   : > { %v1488_v31 = vsel %vm1172_vm6, %v1486_v13, 1065369472 }
 0x378   : > { %1885 = vrot.lane.b32.xlu0 %v1884_v55, %s3505_s22 }
 0x37a   : > { %v1782_v26 = vpop.permute.xlu0 %1781 }
 0x37b   : > { %2860 = vmatmul.mubr.msk.bf16.vlgmr.msra.gmra.mrb[20].mxu0 %vm1172_vm6, %v1431_v54 }
 0x37c   : > { %2871 = vmatprep.mubr.msk.bf16.mxu0 %vm3499_vm2, %v3498_v2 }
 0x37d   : > { %2870 = vmatpush3.bf16.xpose.msra.mxu0 %v1736_v57 }
 0x37e   : > { %2881 = vmatprep.subr.bf16.mxu0 %v3498_v2 }
 0x384   : > { %2872 = vmatmul.mubr.msk.bf16.vlgmr.msra.gmra.mrb[24].mxu0 %vm1172_vm6, %v1729_v62 }
 0x385   : > { %2882 = vmatpush3.bf16.msra.mxu0 %v1836_v60  ;;  %2883 = vmatprep.mubr.msk.bf16.mxu0 %vm3499_vm2, %v3498_v2 }
 0x386   : > { %2893 = vmatprep.subr.bf16.mxu0 %v3498_v2 }
 0x389   : > { %v1361_v6 = vpop.trf.xlu1 }
 0x38c   : > { %2884 = vmatmul.mubr.msk.bf16.vlgmr.msra.gmra.mrb[28].mxu0 %vm1172_vm6, %v1729_v62 }
 0x38d   : > { %2895 = vmatprep.mubr.msk.bf16.mxu0 %vm3499_vm2, %v3498_v2 }
 0x38e   : > { %2894 = vmatpush3.bf16.xpose.msra.mxu0 %v2032_v0 }
 0x38f   : > { %2905 = vmatprep.subr.bf16.mxu0 %v3498_v2 }
 0x395   : > { %2896 = vmatmul.mubr.msk.bf16.vlgmr.msra.gmra.mrb[32].mxu0 %vm1172_vm6, %v2025_v1 }
 0x396   : > { %2906 = vmatpush3.bf16.msra.mxu0 %v2132_v5  ;;  %2907 = vmatprep.mubr.msk.bf16.mxu0 %vm3499_vm2, %v3498_v2 }
 0x397   : > { %2917 = vmatprep.subr.bf16.mxu0 %v3498_v2 }
 0x399   : > { %v4132_v7 = vpop.permute.xlu1 %2077 }
 0x39d   : > { %v1590_v8 = vpop.permute.xlu1 %1589  ;;  %2908 = vmatmul.mubr.msk.bf16.vlgmr.msra.gmra.mrb[36].mxu0 %vm1172_vm6, %v2025_v1  ;;  %v1784_v1 = vsel %vm1172_vm6, %v1782_v26, 1065369472 }
 0x39e   : > { %v1592_v9 = vmul.f32 %v1590_v8, %v4010_v56  ;;  %v1593_v10 = vmul.f32 %v1590_v8, %v4012_v61  ;;  %2925 = vmatprep.mubr.msk.bf16.mxu0 %vm3499_vm2, %v3498_v2 }
 0x3a0   : > { %1596 = vrot.lane.b32.xlu1 %v1592_v9, %s3501_s3  ;;  %1598 = vrot.lane.b32.xlu0 %v1593_v10, %s3501_s3 }
 0x3d1   : > { %v1642_v27 = vpop.trf.xlu0 }
 0x3d4   : > { %v1213_v14 = vpop.f32.mrb[12].mxu1 }
 0x3d5   : > { %v2825_v17 = vpop.f32.mrb[13].mxu1  ;;  %v1220_v19 = vsel %vm1168_vm9, %v1213_v14, 0.0  ;;  %v4172_v28 = vpop.trf.xlu0 }
 0x3d6   : > { %v1216_v18 = vpop.f32.mrb[14].mxu1 }
 0x3d7   : > { %v1221_v20 = vsel %vm1169_vm10, %v1216_v18, 0.0  ;;  %v2826_v21 = vpop.f32.mrb[15].mxu1 }
 0x3d8   : > { %v1227_v25 = vpack.c.bf16 %v1221_v20, %v1220_v19 }
 0x3da   : > { %2830 = vmatmul.mubr.msk.bf16.vlgmr.msra.gmra.mrb[16].mxu1 %vm1172_vm6, %v1227_v25 }
 0x3db   : > { %2834 = vmatpush3.bf16.msra.mxu1 %v1275_v22  ;;  %2835 = vmatprep.mubr.msk.bf16.mxu1 %vm3499_vm2, %v3498_v2  ;;  %v1323_v22 = vrot.slane %v4058_v37, %v4070_v42 }
 0x3dc   : > { %2839 = vmatprep.subr.bf16.mxu1 %v3498_v2 }
 0x3dd   : > { %v1326_v37 = vmul.f32 %v1323_v22, %v4012_v61 }
 0x3e2   : > { %2836 = vmatmul.mubr.msk.bf16.vlgmr.msra.gmra.mrb[20].mxu1 %vm1172_vm6, %v4039_v30 }
 0x3e3   : > { %2840 = vmatpush3.bf16.msra.mxu1 %v3994_v44  ;;  %2841 = vmatprep.mubr.msk.bf16.mxu1 %vm3499_vm2, %v3498_v2  ;;  %v2182_v44 = vpop.permute.xlu1 %2181 }
 0x3e4   : > { %2851 = vmatprep.subr.bf16.mxu1 %v3498_v2  ;;  %v2184_v30 = vmul.f32 %v2182_v44, %v4010_v56  ;;  %v2185_v35 = vmul.f32 %v2182_v44, %v4012_v61  ;;  %v2080_v44 = vsel %vm1172_vm6, %v4132_v7, 1065369472 }
 0x3ea   : > { %2842 = vmatmul.mubr.msk.bf16.vlgmr.msra.gmra.mrb[24].mxu1 %vm1172_vm6, %v1361_v6  ;;  %v1886_v32 = vpop.permute.xlu0 %1885 }
 0x3eb   : > { %2852 = vmatpush3.bf16.msra.mxu1 %v1488_v31  ;;  %v1888_v33 = vmul.f32 %v1886_v32, %v4010_v56  ;;  %v1889_v34 = vmul.f32 %v1886_v32, %v4012_v61  ;;  %2853 = vmatprep.mubr.msk.bf16.mxu1 %vm3499_vm2, %v3498_v2 }
 0x3ec   : > { %2863 = vmatprep.subr.bf16.mxu1 %v3498_v2 }
 0x3ed   : > { %1894 = vrot.lane.b32.xlu0 %v1889_v34, %s3500_s19  ;;  %1892 = vrot.lane.b32.xlu1 %v1888_v33, %s3500_s19  ;;  %v1325_v34 = vmul.f32 %v1323_v22, %v4010_v56 }
 0x3ef   : > { %v1327_v56 = vsel %vm1172_vm6, %v1325_v34, 0.0 }
 0x3f1   : > { %2190 = vrot.lane.b32.xlu0 %v2185_v35, %s3502_s7  ;;  %2188 = vrot.lane.b32.xlu1 %v2184_v30, %s3502_s7  ;;  %v1330_v35 = vsel %vm1172_vm6, %v1326_v37, 0.0 }
 0x412   : > { %v1597_v36 = vpop.permute.xlu1 %1596  ;;  %v1599_v38 = vpop.permute.xlu0 %1598 }
 0x413   : > { %v1605_v39 = vsel %vm1172_vm6, %v1599_v38, 0.0  ;;  %v1602_v43 = vsel %vm1172_vm6, %v1597_v36, 0.0 }
 0x414   : > { %1606 = vadd.xlane.f32.xlu0 %v1605_v39 }
 0x415   : > { %1603 = vadd.xlane.f32.xlu1 %v1602_v43 }
 0x446   : > { %v1475_v46 = vpop.f32.mrb[16].mxu0 }
 0x447   : > { %v2849_v47 = vpop.f32.mrb[17].mxu0  ;;  %v1482_v51 = vsel %vm1168_vm9, %v1475_v46, 0.0 }
 0x448   : > { %v1478_v48 = vpop.f32.mrb[18].mxu0 }
 0x449   : > { %v1483_v52 = vsel %vm1169_vm10, %v1478_v48, 0.0  ;;  %v2850_v54 = vpop.f32.mrb[19].mxu0 }
 0x44a   : > { %v1490_v55 = vpack.c.bf16 %v1483_v52, %v1482_v51  ;;  %v3506_v54 = vmov 16  }
 0x44b   : > { %3094 = vset.pattern.permute.xlu0 %v3506_v54  ;;  %3095 = vset.pattern.permute.xlu1 %v3506_v54 }
 0x44c   : > { %2854 = vmatmul.mubr.msk.bf16.vlgmr.msra.gmra.mrb[28].mxu1 %vm1172_vm6, %v1490_v55 }
 0x44d   : > { %2864 = vmatpush3.bf16.msra.mxu1 %v1486_v13  ;;  %2865 = vmatprep.mubr.msk.bf16.mxu1 %vm3499_vm2, %v3498_v2 }
 0x44e   : > { %v4199_v57 = vpop.f32.mrb[20].mxu0  ;;  %2875 = vmatprep.subr.bf16.mxu1 %v3498_v2 }
 0x44f   : > { %v2861_v60 = vpop.f32.mrb[21].mxu0 }
 0x450   : > { %v4202_v62 = vpop.f32.mrb[22].mxu0 }
 0x451   : > { %v2862_v0 = vpop.f32.mrb[23].mxu0 }
 0x454   : > { %2866 = vmatmul.mubr.msk.bf16.vlgmr.msra.gmra.mrb[32].mxu1 %vm1172_vm6, %v1642_v27 }
 0x455   : > { %2876 = vmatpush3.bf16.msra.mxu1 %v1784_v1  ;;  %2877 = vmatprep.mubr.msk.bf16.mxu1 %vm3499_vm2, %v3498_v2 }
 0x456   : > { %2887 = vmatprep.subr.bf16.mxu1 %v3498_v2 }
 0x457   : > { %v1772_v5 = vpop.f32.mrb[24].mxu0 }
 0x458   : > { %v2873_v6 = vpop.f32.mrb[25].mxu0  ;;  %v1779_v9 = vsel %vm1168_vm9, %v1772_v5, 0.0 }
 0x459   : > { %v1775_v8 = vpop.f32.mrb[26].mxu0 }
 0x45a   : > { %v1780_v10 = vsel %vm1169_vm10, %v1775_v8, 0.0  ;;  %v2874_v13 = vpop.f32.mrb[27].mxu0 }
 0x45b   : > { %v1786_v14 = vpack.c.bf16 %v1780_v10, %v1779_v9 }
 0x45d   : > { %2878 = vmatmul.mubr.msk.bf16.vlgmr.msra.gmra.mrb[36].mxu1 %vm1172_vm6, %v1786_v14 }
 0x45e   : > { %2888 = vmatpush3.bf16.msra.mxu1 %v1782_v26  ;;  %2889 = vmatprep.mubr.msk.bf16.mxu1 %vm3499_vm2, %v3498_v2 }
 0x45f   : > { %v1893_v17 = vpop.permute.xlu1 %1892  ;;  %v1895_v18 = vpop.permute.xlu0 %1894  ;;  %2899 = vmatprep.subr.bf16.mxu1 %v3498_v2 }
 0x460   : > { %v4219_v19 = vpop.f32.mrb[28].mxu0  ;;  %v1898_v20 = vsel %vm1172_vm6, %v1893_v17, 0.0  ;;  %v1901_v21 = vsel %vm1172_vm6, %v1895_v18, 0.0 }
 0x461   : > { %v2885_v25 = vpop.f32.mrb[29].mxu0  ;;  %1899 = vadd.xlane.f32.xlu0 %v1898_v20  ;;  %1902 = vadd.xlane.f32.xlu1 %v1901_v21 }
 0x462   : > { %v4225_v26 = vpop.f32.mrb[30].mxu0 }
 0x463   : > { %v2886_v27 = vpop.f32.mrb[31].mxu0  ;;  %v2189_v31 = vpop.permute.xlu1 %2188 }
 0x464   : > { %v2191_v32 = vpop.permute.xlu0 %2190  ;;  %v2194_v33 = vsel %vm1172_vm6, %v2189_v31, 0.0 }
 0x465   : > { %2195 = vadd.xlane.f32.xlu0 %v2194_v33  ;;  %v2197_v30 = vsel %vm1172_vm6, %v2191_v32, 0.0  ;;  %2890 = vmatmul.mubr.msk.bf16.vlgmr.msra.gmra.mrb[40].mxu1 %vm1172_vm6, %v4172_v28 }
 0x466   : > { %2198 = vadd.xlane.f32.xlu1 %v2197_v30  ;;  %2900 = vmatpush3.bf16.msra.mxu1 %v2080_v44 }
 0x467   : > { %2901 = vmatprep.mubr.msk.bf16.mxu1 %vm3499_vm2, %v3498_v2  ;;  %2911 = vmatprep.subr.bf16.mxu1 %v3498_v2 }
 0x468   : > { %v2068_v42 = vpop.f32.mrb[32].mxu0 }
 0x469   : > { %1328 = vadd.xlane.f32.xlu0 %v1327_v56  ;;  %v2897_v36 = vpop.f32.mrb[33].mxu0  ;;  %v2075_v61 = vsel %vm1168_vm9, %v2068_v42, 0.0 }
 0x46a   : > { %1331 = vadd.xlane.f32.xlu1 %v1330_v35  ;;  %v2071_v38 = vpop.f32.mrb[34].mxu0 }
 0x46b   : > { %v2076_v28 = vsel %vm1169_vm10, %v2071_v38, 0.0  ;;  %v2898_v39 = vpop.f32.mrb[35].mxu0 }
 0x46c   : > { %v2082_v43 = vpack.c.bf16 %v2076_v28, %v2075_v61 }
 0x46e   : > { %2902 = vmatmul.mubr.msk.bf16.vlgmr.msra.gmra.mrb[44].mxu1 %vm1172_vm6, %v2082_v43 }
 0x46f   : > { %2912 = vmatpush3.bf16.msra.mxu1 %v4132_v7  ;;  %2913 = vmatprep.mubr.msk.bf16.mxu1 %vm3499_vm2, %v3498_v2 }
 0x470   : > { %v4250_v46 = vpop.f32.mrb[36].mxu0 }
 0x471   : > { %v2909_v47 = vpop.f32.mrb[37].mxu0 }
 0x472   : > { %v4252_v48 = vpop.f32.mrb[38].mxu0 }
 0x473   : > { %v2910_v51 = vpop.f32.mrb[39].mxu0 }
 0x4a1   : > { %v1607_v27 = vpop.xlane.xlu0 %1606 }
 0x4a2   : > { %v1604_v18 = vpop.xlane.xlu1 %1603 }
 0x4ad   : > { %v4254_v52 = vpop.f32.mrb[16].mxu1 }
 0x4ae   : > { %v2831_v11 = vpop.f32.mrb[17].mxu1 }
 0x4af   : > { %v4256_v12 = vpop.f32.mrb[18].mxu1 }
 0x4b0   : > { %v2832_v55 = vpop.f32.mrb[19].mxu1 }
 0x4b5   : > { %v1310_v60 = vpop.f32.mrb[20].mxu1 }
 0x4b6   : > { %v4259_v7 = vadd.f32 %v1310_v60, %v4254_v52  ;;  %v2837_v0 = vpop.f32.mrb[21].mxu1 }
 0x4b7   : > { %v1313_v1 = vpop.f32.mrb[22].mxu1 }
 0x4b8   : > { %v4262_v5 = vadd.f32 %v1313_v1, %v4256_v12  ;;  %v2838_v6 = vpop.f32.mrb[23].mxu1 }
 0x4bd   : > { %v1406_v8 = vpop.f32.mrb[24].mxu1 }
 0x4be   : > { %v1413_v9 = vadd.f32 %v1406_v8, %v4151_v15  ;;  %v2843_v10 = vpop.f32.mrb[25].mxu1 }
 0x4bf   : > { %v1409_v13 = vpop.f32.mrb[26].mxu1 }
 0x4c0   : > { %1415 = vst.msk [vmem:[#allocation2] sm:$0xff] %vm1172_vm6, %v1413_v9  ;;  %v1414_v14 = vadd.f32 %v1409_v13, %v4153_v16  ;;  %v2844_v17 = vpop.f32.mrb[27].mxu1 }
 0x4c2   : > { %1416 = vst.msk [vmem:[#allocation2 + $0x8] sm:$0xff] %vm1172_vm6, %v1414_v14 }
 0x4ee   : > { %v1900_v36 = vpop.xlane.xlu0 %1899  ;;  %v1903_v39 = vpop.xlane.xlu1 %1902 }
 0x4f2   : > { %v2196_v8 = vpop.xlane.xlu0 %2195 }
 0x4f3   : > { %v2199_v9 = vpop.xlane.xlu1 %2198 }
 0x51f   : > { %v1528_v20 = vpop.f32.mrb[28].mxu1 }
 0x520   : > { %v4269_v21 = vadd.f32 %v4199_v57, %v1528_v20  ;;  %v1608_v22 = vadd.f32 %v1604_v18, %v1528_v20  ;;  %v2855_v25 = vpop.f32.mrb[29].mxu1  ;;  %v1329_v18 = vpop.xlane.xlu0 %1328 }
 0x521   : > { %v1531_v31 = vpop.f32.mrb[30].mxu1 }
 0x522   : > { %v1610_v32 = vadd.f32 1e-12, %v1608_v22  ;;  %v4272_v15 = vadd.f32 %v4202_v62, %v1531_v31  ;;  %v1609_v33 = vadd.f32 %v1607_v27, %v1531_v31  ;;  %v2856_v34 = vpop.f32.mrb[31].mxu1  ;;  %v1333_v31 = vadd.f32 %v1329_v18, %v4254_v52 }
 0x524   : > { %3129 = vrcp.f32 %v1610_v32  ;;  %v1611_v16 = vadd.f32 1e-12, %v1609_v33  ;;  %v1332_v33 = vpop.xlane.xlu1 %1331  ;;  %v1335_v34 = vadd.f32 1e-12, %v1333_v31 }
 0x526   : > { %3131 = vrcp.f32 %v1611_v16 }
 0x527   : > { %v1688_v44 = vpop.f32.mrb[32].mxu1 }
 0x528   : > { %v1695_v30 = vadd.f32 %v1688_v44, %v4084_v49  ;;  %v2867_v37 = vpop.f32.mrb[33].mxu1 }
 0x529   : > { %v1691_v42 = vpop.f32.mrb[34].mxu1 }
 0x52a   : > { %1697 = vst.msk [vmem:[#allocation2 + $0x10] sm:$0xff] %vm1172_vm6, %v1695_v30  ;;  %v1696_v57 = vadd.f32 %v1691_v42, %v4086_v50  ;;  %v2868_v56 = vpop.f32.mrb[35].mxu1 }
 0x52c   : > { %1698 = vst.msk [vmem:[#allocation2 + $0x18] sm:$0xff] %vm1172_vm6, %v1696_v57 }
 0x52e   : > { %v3130_v35 = vpop.eup %3129 }
 0x52f   : > { %1616 = vperm.xlu0 %3094, %v3130_v35   ;;  %v3125_v35 = vld [vmem:[#allocation17] sm:$0xff]  }
 0x530   : > { %v3132_v62 = vpop.eup %3131  ;;  %v1824_v38 = vpop.f32.mrb[36].mxu1  ;;  %2918 = vmatpush3.bf16.msra.mxu0 %v3125_v35 }
 0x531   : > { %v4279_v61 = vadd.f32 %v4219_v19, %v1824_v38  ;;  %v1904_v28 = vadd.f32 %v1900_v36, %v1824_v38  ;;  %1621 = vperm.xlu1 %3095, %v3132_v62   ;;  %v2879_v49 = vpop.f32.mrb[37].mxu1  ;;  %v3126_v62 = vld [vmem:[#allocation17 + $0x8] sm:$0xff]   ;;  %2919 = vmatprep.subr.bf16.mxu0 %v3498_v2  ;;  %v1702_v38 = vrot.slane %v4026_v23, 4 }
 0x532   : > { %v1827_v43 = vpop.f32.mrb[38].mxu1 }
 0x533   : > { %v1906_v47 = vadd.f32 1e-12, %v1904_v28  ;;  %v4282_v51 = vadd.f32 %v4225_v26, %v1827_v43  ;;  %v1905_v50 = vadd.f32 %v1903_v39, %v1827_v43  ;;  %v2880_v54 = vpop.f32.mrb[39].mxu1  ;;  %v1703_v49 = vadd.f32 %v1702_v38, %v4026_v23 }
 0x534   : > { %2920 = vmatpush3.bf16.msra.mxu0 %v3126_v62  ;;  %v2294_v54 = vrot.slane %v4035_v29, 4 }
 0x535   : > { %3133 = vrcp.f32 %v1906_v47  ;;  %v1907_v11 = vadd.f32 1e-12, %v1905_v50  ;;  %2921 = vmatprep.subr.bf16.mxu0 %v3498_v2  ;;  %v1704_v47 = vrot.slane %v1703_v49, 2 }
 0x536   : > { %v2295_v23 = vadd.f32 %v2294_v54, %v4035_v29 }
 0x537   : > { %3135 = vrcp.f32 %v1907_v11  ;;  %v1705_v11 = vadd.f32 %v1704_v47, %v1703_v49 }
 0x538   : > { %v1984_v55 = vpop.f32.mrb[40].mxu1 }
 0x539   : > { %v1991_v60 = vadd.f32 %v1984_v55, %v4104_v58  ;;  %v2891_v0 = vpop.f32.mrb[41].mxu1  ;;  %v3507_v55 = vmov 1966171168  }
 0x53a   : > { %v1987_v19 = vpop.f32.mrb[42].mxu1 }
 0x53b   : > { %1993 = vst.msk [vmem:[#allocation2 + $0x20] sm:$0xff] %vm1172_vm6, %v1991_v60  ;;  %v1992_v1 = vadd.f32 %v1987_v19, %v4106_v59  ;;  %v2892_v6 = vpop.f32.mrb[43].mxu1  ;;  %v1710_v60 = vunpack.c.l.s4 %v3507_v55  ;;  %v3127_v19 = vld [vmem:[#allocation17 + $0x10] sm:$0xff]  }
 0x53c   : > { %2922 = vmatpush3.bf16.msra.mxu0 %v3127_v19 }
 0x53d   : > { %1994 = vst.msk [vmem:[#allocation2 + $0x28] sm:$0xff] %vm1172_vm6, %v1992_v1  ;;  %v1706_v1 = vrot.slane %v1705_v11, 1  ;;  %2923 = vmatprep.subr.bf16.mxu0 %v3498_v2 }
 0x53f   : > { %v3134_v26 = vpop.eup %3133 }
 0x540   : > { %1912 = vperm.xlu1 %3095, %v3134_v26   ;;  %v1707_v26 = vadd.f32 %v1706_v1, %v1705_v11 }
 0x541   : > { %v2120_v10 = vpop.f32.mrb[44].mxu1  ;;  %v3136_v58 = vpop.eup %3135 }
 0x542   : > { %v4289_v13 = vadd.f32 %v4250_v46, %v2120_v10  ;;  %v2200_v14 = vadd.f32 %v2196_v8, %v2120_v10  ;;  %v2903_v17 = vpop.f32.mrb[45].mxu1  ;;  %v1334_v46 = vadd.f32 %v1332_v33, %v4256_v12 }
 0x543   : > { %v2123_v20 = vpop.f32.mrb[46].mxu1 }
 0x544   : > { %v2202_v22 = vadd.f32 1e-12, %v2200_v14  ;;  %v4292_v25 = vadd.f32 %v4252_v48, %v2123_v20  ;;  %v2201_v59 = vadd.f32 %v2199_v9, %v2123_v20  ;;  %1917 = vperm.xlu1 %3095, %v3136_v58   ;;  %v2904_v27 = vpop.f32.mrb[47].mxu1  ;;  %v1336_v16 = vadd.f32 1e-12, %v1334_v46 }
 0x546   : > { %3137 = vrcp.f32 %v2202_v22  ;;  %v2203_v32 = vadd.f32 1e-12, %v2201_v59 }
 0x548   : > { %3139 = vrcp.f32 %v2203_v32 }
 0x549   : > { %3141 = vrcp.f32 %v1335_v34 }
 0x54a   : > { %3143 = vrcp.f32 %v1336_v16 }
 0x550   : > { %v3138_v44 = vpop.eup %3137 }
 0x551   : > { %2208 = vperm.xlu1 %3095, %v3138_v44  }
 0x552   : > { %v3140_v30 = vpop.eup %3139 }
 0x553   : > { %v3142_v48 = vpop.eup %3141 }
 0x554   : > { %v3144_v37 = vpop.eup %3143 }
 0x555   : > { %2213 = vperm.xlu1 %3095, %v3140_v30  }
 0x559   : > { %1341 = vperm.xlu1 %3095, %v3142_v48  }
 0x55d   : > { %1346 = vperm.xlu1 %3095, %v3144_v37  }
 0x5ae   : > { %v1617_v42 = vpop.permute.xlu0 %1616 }
 0x5af   : > { %v1624_v57 = vmul.f32 %v1617_v42, %v4269_v21  ;;  %v1998_v21 = vrot.slane %v4028_v24, 4 }
 0x5b0   : > { %v1622_v52 = vpop.permute.xlu1 %1621 }
 0x5b1   : > { %v1625_v56 = vmul.f32 %v1622_v52, %v4272_v15  ;;  %v1999_v50 = vadd.f32 %v1998_v21, %v4028_v24  ;;  %v3128_v24 = vld [vmem:[#allocation17 + $0x18] sm:$0xff]  }
 0x5b2   : > { %2924 = vmatpush3.bf16.msra.mxu0 %v3128_v24 }
 0x5b3   : > { %v1626_v12 = vpack.c.bf16 %v1625_v56, %v1624_v57  ;;  %v2000_v0 = vrot.slane %v1999_v50, 2 }
 0x5b5   : > { %1628 = vrot.lane.b32.xlu1 %v1626_v12, %s3503_s28  ;;  %v2001_v6 = vadd.f32 %v2000_v0, %v1999_v50 }
 0x5b7   : > { %v2002_v10 = vrot.slane %v2001_v6, 1 }
 0x5b9   : > { %v2003_v22 = vadd.f32 %v2002_v10, %v2001_v6 }
 0x5bf   : > { %v1913_v36 = vpop.permute.xlu1 %1912 }
 0x5c0   : > { %v1920_v15 = vmul.f32 %v1913_v36, %v4279_v61  ;;  %v1711_v61 = vunpack.c.0.s8 %v1710_v60 }
 0x5c2   : > { %v1714_v9 = vsub.s32 %v1711_v61, %v4065_v40 }
 0x5c3   : > { %v1918_v28 = vpop.permute.xlu1 %1917 }
 0x5c4   : > { %v1921_v39 = vmul.f32 %v1918_v28, %v4282_v51  ;;  %v2296_v51 = vrot.slane %v2295_v23, 2  ;;  %v1715_v20 = vrot.slane %v1707_v26, %v1714_v9  ;;  %v2011_v31 = vrot.slane %v2003_v22, %v1714_v9 }
 0x5c6   : > { %v1922_v43 = vpack.c.bf16 %v1921_v39, %v1920_v15  ;;  %v2297_v14 = vadd.f32 %v2296_v51, %v2295_v23  ;;  %v1722_v2 = vrot.slane %v1715_v20, %v1714_v9  ;;  %v2018_v34 = vrot.slane %v2011_v31, %v1714_v9 }
 0x5c8   : > { %1924 = vrot.lane.b32.xlu0 %v1922_v43, %s3505_s22  ;;  %v2298_v59 = vrot.slane %v2297_v14, 1  ;;  %s3371_s22 = scalar_lea.vmem %s4345_s2, 256 }
 0x5c9   : > { %p3372_p8 = scmp.ne.s32.totalorder %s4345_s2, %s3371_s22  ;;  %p3379_p10 = scmp.lt.s32.totalorder %s3377_s18, %s3371_s22 }
 0x5ca   : > { %v2299_v32 = vadd.f32 %v2298_v59, %v2297_v14 }
 0x5cb   : > { %p3373_p5 = pnand %p3372_p8, %p4469_p7  ;;  %p3380_p1 = por %p3379_p10, %p3378_p9 }
 0x5cd   : > { %p3374_p2 = pneg %p3373_p5 }
 0x5cf   : > { %p3381_p11 = pnand %p3380_p1, %p3374_p2 }
 0x5d0   : > { %v2209_v8 = vpop.permute.xlu1 %2208 }
 0x5d1   : > { %v2216_v58 = vmul.f32 %v2209_v8, %v4289_v13 }
 0x5d4   : > { %v2214_v17 = vpop.permute.xlu1 %2213 }
 0x5d5   : > { %v2217_v29 = vmul.f32 %v2214_v17, %v4292_v25  ;;  %v2307_v25 = vrot.slane %v2299_v32, %v1714_v9 }
 0x5d7   : > { %v2218_v18 = vpack.c.bf16 %v2217_v29, %v2216_v58  ;;  %v2314_v16 = vrot.slane %v2307_v25, %v1714_v9 }
 0x5d8   : > { %v1342_v27 = vpop.permute.xlu1 %1341 }
 0x5d9   : > { %2220 = vrot.lane.b32.xlu1 %v2218_v18, %s3504_s4  ;;  %v1349_v40 = vmul.f32 %v1342_v27, %v4259_v7  ;;  %s2400_s4 = scalar_lea.sflag [#allocation7], %s3904_s5 }
 0x5dc   : > { %v1347_v33 = vpop.permute.xlu1 %1346 }
 0x5dd   : > { %v1350_v46 = vmul.f32 %v1347_v33, %v4262_v5  ;;  %1723 = vrot.lane.b32.xlu1 %v1722_v2, %s3501_s3 }
 0x5df   : > { %v1351_v13 = vpack.c.bf16 %v1350_v46, %v1349_v40 }
 0x5e1   : > { %1352 = vst.msk [vmem:[#allocation4] sm:$0xff] %vm1172_vm6, %v1351_v13  ;;  %2019 = vrot.lane.b32.xlu1 %v2018_v34, %s3500_s19 }
 0x5e5   : > { %2315 = vrot.lane.b32.xlu1 %v2314_v16, %s3502_s7  ;;  %s4468_s7 = sld [smem:[#allocation38_spill]] }
 0x5e6   : > { %2226 = vxpose.xlu0.c.b16.start.end [1/1] (short) (narrow) %v4114_v63, 16 }
 0x5eb   : > { %s4343_s28 = scalar_lea.hbm %s4468_s7, %s2662_s23 }
 0x627   : > { %v1629_v44 = vpop.permute.xlu1 %1628 }
 0x628   : > { %1632 = vst.msk [vmem:[#allocation4] sm:$0xff] %vm1631_vm4, %v1629_v44 }
 0x63a   : > { %v1925_v7 = vpop.permute.xlu0 %1924 }
 0x63b   : > { %1928 = vst.msk [vmem:[#allocation4] sm:$0xff] %vm1927_vm5, %v1925_v7 }
 0x64b   : > { %v2221_v5 = vpop.permute.xlu1 %2220 }
 0x64c   : > { %2224 = vst.msk [vmem:[#allocation4] sm:$0xff] %vm2223_vm7, %v2221_v5  ;;  %v2234_v30 = vpop.trf.xlu0 }
 0x64d   : > { %2914 = vmatmul.mubr.msk.bf16.vlgmr.msra.gmra.mrb[48].mxu1 %vm1172_vm6, %v2234_v30 }
 0x64f   : > { %v1724_v48 = vpop.permute.xlu1 %1723 }
 0x650   : > { %v1726_v37 = vadd.f32 %v1724_v48, %v4067_v41 }
 0x652   : > { %1727 = vst.msk [vmem:[#allocation3 + $0x1] sm:$0x1] %vm1427_vm8, %v1726_v37 }
 0x653   : > { %v2020_v63 = vpop.permute.xlu1 %2019  ;;  %v2320_v42 = vld [vmem:[#allocation4] sm:$0xff] }
 0x654   : > { %v2022_v52 = vadd.f32 %v2020_v63, %v4090_v53  ;;  %2926 = vmatmul.mubr.msk.bf16.vlgmr.msra.gmra.mrb[40].mxu0 %vm640_vm3, %v2320_v42 }
 0x656   : > { %2023 = vst.msk [vmem:[#allocation3 + $0x2] sm:$0x1] %vm1427_vm8, %v2022_v52 }
 0x657   : > { %v2316_v57 = vpop.permute.xlu1 %2315 }
 0x658   : > { %v2318_v56 = vadd.f32 %v2316_v57, %v4076_v45 }
 0x65a   : > { %2319 = vst.msk [vmem:[#allocation3 + $0x3] sm:$0x1] %vm1427_vm8, %v2318_v56 }
 0x720   : > { %v2280_v41 = vpop.f32.mrb[48].mxu1 }
 0x721   : > { %v2287_v12 = vadd.f32 %v2280_v41, %v4122_v3  ;;  %v2915_v35 = vpop.f32.mrb[49].mxu1 }
 0x722   : > { %v2283_v53 = vpop.f32.mrb[50].mxu1 }
 0x723   : > { %2289 = vst.msk [vmem:[#allocation2 + $0x30] sm:$0xff] %vm1172_vm6, %v2287_v12  ;;  %v2288_v62 = vadd.f32 %v2283_v53, %v4124_v4  ;;  %v2916_v36 = vpop.f32.mrb[51].mxu1 }
 0x725   : > { %2290 = vst.msk [vmem:[#allocation2 + $0x38] sm:$0xff] %vm1172_vm6, %v2288_v62 }
 0x727   : > { %v2390_v45 = vpop.f32.mrb[40].mxu0 }
 0x728   : > { %2397 = vst.msk [vmem:[%s3931_s13] sm:$0xff] %vm640_vm3, %v2390_v45  ;;  %v2927_v3 = vpop.f32.mrb[41].mxu0 }
 0x729   : > { %v2393_v4 = vpop.f32.mrb[42].mxu0 }
 0x72a   : > { %2398 = vst.msk [vmem:[%s3931_s13 + $0x8] sm:$0xff] %vm640_vm3, %v2393_v4  ;;  %v2928_v38 = vpop.f32.mrb[43].mxu0 }
 0x72b   : > { %3384 = shalt.err (!%p3381_p11)
}
 0x72c   : > { %s3385_s13 = scalar_lea.hbm %s4343_s28, 256  ;;  %s3389_s23 = scalar_lea.hbm %s4468_s7, 2048 }
 0x72d   : > { %p3386_p12 = scmp.ne.s32.totalorder %s4343_s28, %s3385_s13  ;;  %p3390_p3 = scmp.lt.u32.totalorder %s4343_s28, %s4468_s7 }
 0x72e   : > { %p3391_p6 = scmp.lt.u32.totalorder %s3389_s23, %s3385_s13  ;;  %p3393_p8 = scmp.lt.u32.totalorder %s3385_s13, %s4343_s28 }
 0x72f   : > { %p3387_p13 = pnand %p3386_p12, %p4469_p7 }
 0x730   : > { %p3392_p4 = por %p3391_p6, %p3390_p3 }
 0x731   : > { %p3388_p0 = pneg %p3387_p13 }
 0x732   : > { %p3394_p5 = por %p3393_p8, %p3392_p4 }
 0x734   : > { %p3395_p2 = pnand %p3394_p5, %p3388_p0 }
 0x736   : > { %3398 = shalt.err (!%p3395_p2)
}
 0x737   : > { %s3509_s22 = smov 128   ;;  %s3510_s17 = smov 8  }
 0x738   : > { %2959 = dma.vmem_to_hbm [thread:$0]  (%p4469_p7), %s4345_s2, 256, %s4343_s28, %s2400_s4, %s3509_s22, %s3509_s22, %s3510_s17  }
 0x739 PF: > { %p3006_p9 = scmp.ge.s32.totalorder %s3485_s15, 2  ;;  %s2430_s1 = sand.u32 1, %s3457_s25  }
 0x73a   : > { %p4470_p10 = scmp.ne.s32.totalorder %s4453_s20, 0  ;;  %s2431_s18 = scalar_lea.sflag [#allocation7], %s2430_s1 }
 0x73c   : > { %p2988_p1 = pnand %p3006_p9, %p4470_p10 }
 0x73e   : > { %3452 = dma.done.wait (!%p2988_p1), %s2431_s18, 256  }
 0x73f   : > { %3454 = vsyncadd (!%p2988_p1), %s2431_s18, 4294967040  ;;  %s33_s15 = sadd.s32 1, %s3485_s15   ;;  %s4471_s25 = smov %s3461_s26 }
 0x740   : > { %p30_p11 = scmp.ge.s32.totalorder %s33_s15, 10   ;;  %s4472_s26 = smov %s3465_s27 }
 0x741   : > { %s4473_s27 = smov %s3853_s29  ;;  %s4474_s28 = smov %s3477_s30 }
 0x742   : > { %s4475_s29 = smov %s3481_s14  ;;  %s4476_s30 = smov %s4479_s21 }
 0x743   : > { %s4477_s14 = smov %s4483_s16  ;;  %32 = sbr.rel (!%p30_p11) target bundleno = 22 (0x16), region = 155 }
 0x74a   :  { %2436 = vsyncpa [#allocation6], 1 }
 0x74b   :  { %2438 = vsyncpa [#allocation6 + $0x1], 1 }
 0x74c   :  { %2439 = vsyncpa [#allocation9], 1 }
 0x74d   :  { %2440 = vsyncpa [#allocation12], 1 }
 0x74e   :  { %2441 = vsyncpa [#allocation15], 1 }
 0x74f   :  { %2442 = vsyncpa [#allocation18], 1 }
 0x750   :  { %2443 = vsyncpa [#allocation7], 1 }
 0x751   :  { %2445 = vsyncpa [#allocation7 + $0x1], 1 }

</bundles_post_ra>
